<compile_context>
chip_gen: v5e
topology: v5e:2x2
jax: 0.10.0
libtpu: 0.0.40
codegen_flags: <defaults>
</compile_context>

<pallas_src>
import functools

import jax
import jax.numpy as jnp
import numpy as np
from jax import lax
from jax.experimental import pallas as pl
from jax.experimental.pallas import tpu as pltpu

LEAKY_SLOPE = 0.01      # torch.nn.LeakyReLU default
BN_EPS = 1e-5

# bf16 operands for the HBM-traffic-bound 2D convs (accumulation stays f32);
# the tiny 1D convs and the VMEM-resident LSTM stay f32 (no DMA bytes to save).
CONV2D_DTYPE = jnp.bfloat16
CONV1D_DTYPE = jnp.float32


def _round_up(x, m):
    return (x + m - 1) // m * m


# ---------------------------------------------------------------------------
# Fused conv-as-matmul kernel (every Conv2d / Conv1d in the network).
# ---------------------------------------------------------------------------
def _conv_taps_kernel(p_ref, w_ref, b_ref, o_ref, *, activation, slope):
    # p_ref: (K, TL)      im2col patches, batch folded into the lane axis
    # w_ref: (C_out, K)   repacked conv weight (K = taps * C_in)
    # b_ref: (C_out, 1)   f32 bias (BatchNorm folded in where applicable)
    # o_ref: (C_out, TL)  lane-dense f32 output
    y = jnp.dot(w_ref[...], p_ref[...], preferred_element_type=jnp.float32)
    y = y + b_ref[...]
    if activation == "relu":
        y = jnp.maximum(y, 0.0)
    elif activation == "leaky_relu":
        y = jnp.maximum(y, slope * y)      # == LeakyReLU for 0 < slope < 1
    o_ref[...] = y.astype(o_ref.dtype)


def _pick_tile(lp):
    if lp <= 2048:
        return lp
    for t in (2048, 1024, 512, 256, 128):
        if lp % t == 0:
            return t
    return 128


def _conv_vmem_limit(K, C_out, TL, in_itemsize):
    need = (2 * K * TL * in_itemsize            # double-buffered patch tile
            + 2 * C_out * TL * 4                # double-buffered output tile
            + C_out * max(K, 128) * in_itemsize # weights
            + C_out * 128 * 4)                  # bias tile
    # No 32 MiB floor; leave headroom below v7x's 64 MiB physical VMEM.
    return int(min(need + (8 << 20), 48 << 20))


def conv_taps(patches, weight, bias, *, activation="none", slope=LEAKY_SLOPE):
    """patches (K, L); weight (C_out, K); bias (C_out,) -> (C_out, L) f32."""
    K, L = patches.shape
    C_out = weight.shape[0]

    Lp = max(_round_up(L, 128), 128)
    if Lp != L:
        patches = jnp.pad(patches, ((0, 0), (0, Lp - L)))
    TL = _pick_tile(Lp)

    itemsize = np.dtype(patches.dtype).itemsize
    weight = weight.astype(patches.dtype)
    b_col = bias.astype(jnp.float32).reshape(C_out, 1)

    kernel = functools.partial(_conv_taps_kernel, activation=activation,
                               slope=slope)
    cost = pl.CostEstimate(
        flops=int(2 * C_out * K * Lp),
        transcendentals=0,
        bytes_accessed=int(K * Lp * itemsize + C_out * K * itemsize
                           + C_out * Lp * 4))

    out = pl.pallas_call(
        kernel,
        out_shape=jax.ShapeDtypeStruct((C_out, Lp), jnp.float32),
        grid_spec=pltpu.PrefetchScalarGridSpec(
            num_scalar_prefetch=0,
            grid=(Lp // TL,),
            in_specs=[
                pl.BlockSpec((K, TL), lambda l: (0, l)),
                pl.BlockSpec((C_out, K), lambda l: (0, 0)),
                pl.BlockSpec((C_out, 1), lambda l: (0, 0)),
            ],
            out_specs=pl.BlockSpec((C_out, TL), lambda l: (0, l)),
        ),
        compiler_params=pltpu.CompilerParams(
            dimension_semantics=("parallel",),
            vmem_limit_bytes=_conv_vmem_limit(K, C_out, TL, itemsize)),
        cost_estimate=cost,
    )(patches, weight, b_col)
    return out[:, :L]


# im2col builders (channel-major layout; batch folded into the lane axis).
def conv2d_3x3(x, w, b, *, activation):
    # x: (C, N, H, W) -> (C_out, N, H, W)
    C, N, H, W = x.shape
    C_out = w.shape[0]
    xp = jnp.pad(x.astype(CONV2D_DTYPE), ((0, 0), (0, 0), (1, 1), (1, 1)))
    taps = [xp[:, :, kh:kh + H, kw:kw + W]
            for kh in range(3) for kw in range(3)]
    patches = jnp.concatenate(taps, axis=0).reshape(9 * C, N * H * W)
    w2 = jnp.transpose(w, (0, 2, 3, 1)).reshape(C_out, 9 * C)   # tap-major
    y = conv_taps(patches, w2, b, activation=activation)
    return y.reshape(C_out, N, H, W)


def conv1d_3(x, w, b, *, activation, pad_value=None):
    # x: (C, N, T) -> (C_out, N, T).  pad_value (C,) gives the per-channel
    # value the conv padding must take (used for the exact BN2d pre-fold).
    C, N, T = x.shape
    C_out = w.shape[0]
    xc = x.astype(CONV1D_DTYPE)
    if pad_value is None:
        pad_col = jnp.zeros((C, N, 1), xc.dtype)
    else:
        pad_col = jnp.broadcast_to(
            pad_value.astype(xc.dtype).reshape(C, 1, 1), (C, N, 1))
    xp = jnp.concatenate([pad_col, xc, pad_col], axis=2)        # (C, N, T+2)
    taps = [xp[:, :, k:k + T] for k in range(3)]
    patches = jnp.concatenate(taps, axis=0).reshape(3 * C, N * T)
    w2 = jnp.transpose(w, (0, 2, 1)).reshape(C_out, 3 * C)      # tap-major
    y = conv_taps(patches, w2, b, activation=activation)
    return y.reshape(C_out, N, T)


# ---------------------------------------------------------------------------
# Fused 2-layer bidirectional LSTM in a single pallas_call.
# ---------------------------------------------------------------------------
def _sig(z):
    # sigmoid via tanh (EUP slot) — avoids an explicit divide on the VPU.
    return 0.5 * jnp.tanh(0.5 * z) + 0.5


def _bilstm_kernel(x_ref, wih_ref, whh_ref, b_ref, o_ref,
                   f0_ref, b0_ref, f1_ref, b1_ref, *, T, B, H):
    # x_ref:   (T*B, C)    time-major flattened input sequence
    # wih_ref: (4, C, 4H)  per (layer, dir) W_ih^T, gate columns ordered i|f|g|o
    # whh_ref: (4, H, 4H)  per (layer, dir) W_hh^T
    # b_ref:   (4, 1, 4H)  per (layer, dir) (b_ih + b_hh)
    # o_ref:   (T*B, 2H)   layer-1 [fwd | bwd] output — single store at the end
    # scratch: four (T*B, H) VMEM buffers holding the per-direction sequences
    def run_dir(xin, k, out_ref, reverse):
        # Hoisted input projection: one (T*B, C) @ (C, 4H) matmul (+ bias).
        xp = (jnp.dot(xin, wih_ref[k], preferred_element_type=jnp.float32)
              + b_ref[k])
        whh = whh_ref[k]
        h = jnp.zeros((B, H), jnp.float32)
        c = jnp.zeros((B, H), jnp.float32)
        for s in range(T):                         # static unroll (T is small)
            t = T - 1 - s if reverse else s        # reversal via index math
            g = xp[t * B:(t + 1) * B, :] + jnp.dot(
                h, whh, preferred_element_type=jnp.float32)
            i = _sig(g[:, 0:H])
            f = _sig(g[:, H:2 * H])
            gg = jnp.tanh(g[:, 2 * H:3 * H])
            o = _sig(g[:, 3 * H:4 * H])
            c = f * c + i * gg
            h = o * jnp.tanh(c)
            out_ref[t * B:(t + 1) * B, :] = h

    x0 = x_ref[...]
    run_dir(x0, 0, f0_ref, False)                  # layer 0, forward
    run_dir(x0, 1, b0_ref, True)                   # layer 0, backward
    x1 = jnp.concatenate([f0_ref[...], b0_ref[...]], axis=-1)
    run_dir(x1, 2, f1_ref, False)                  # layer 1, forward
    run_dir(x1, 3, b1_ref, True)                   # layer 1, backward
    o_ref[...] = jnp.concatenate([f1_ref[...], b1_ref[...]], axis=-1)


def bidirectional_lstm(x_tbc, lstm_params):
    """x_tbc (T, B, C) -> (T, B, 2H), 2-layer bidirectional LSTM."""
    T, B, C = x_tbc.shape
    keys = ("l0", "l0_r", "l1", "l1_r")
    H = lstm_params["l0"][1].shape[1]
    # NET_VGG always sets hidden = out_channels // 2, so both layers share the
    # same input width (C == 2H) and the weights can be stacked.
    assert C == 2 * H, "layer-0 / layer-1 LSTM input widths must match"

    wih = jnp.stack([jnp.transpose(lstm_params[k][0]) for k in keys])  # (4,C,4H)
    whh = jnp.stack([jnp.transpose(lstm_params[k][1]) for k in keys])  # (4,H,4H)
    bb = jnp.stack([(lstm_params[k][2] + lstm_params[k][3]).reshape(1, 4 * H)
                    for k in keys])                                    # (4,1,4H)
    x2 = x_tbc.reshape(T * B, C).astype(jnp.float32)

    kernel = functools.partial(_bilstm_kernel, T=T, B=B, H=H)
    cost = pl.CostEstimate(
        flops=int(4 * (2 * T * B * C * 4 * H + 2 * T * B * H * 4 * H)),
        transcendentals=int(4 * T * B * 5 * H),
        bytes_accessed=int(4 * (T * B * C + (C + H + 1) * 4 * H) * 4
                           + 2 * T * B * 2 * H * 4))

    out = pl.pallas_call(
        kernel,
        out_shape=jax.ShapeDtypeStruct((T * B, 2 * H), jnp.float32),
        grid_spec=pltpu.PrefetchScalarGridSpec(
            num_scalar_prefetch=0,
            grid=(1,),
            in_specs=[
                pl.BlockSpec((T * B, C), lambda i: (0, 0)),
                pl.BlockSpec((4, C, 4 * H), lambda i: (0, 0, 0)),
                pl.BlockSpec((4, H, 4 * H), lambda i: (0, 0, 0)),
                pl.BlockSpec((4, 1, 4 * H), lambda i: (0, 0, 0)),
            ],
            out_specs=pl.BlockSpec((T * B, 2 * H), lambda i: (0, 0)),
            scratch_shapes=[pltpu.VMEM((T * B, H), jnp.float32)] * 4,
        ),
        compiler_params=pltpu.CompilerParams(
            dimension_semantics=("arbitrary",),
            vmem_limit_bytes=16 << 20),
        cost_estimate=cost,
    )(x2, wih, whh, bb)
    return out.reshape(T, B, 2 * H)


# ---------------------------------------------------------------------------
# Thin XLA glue.
# ---------------------------------------------------------------------------
def maxpool2d_2x2(x):
    C, N, H, W = x.shape
    return x.reshape(C, N, H // 2, 2, W // 2, 2).max(axis=(3, 5))


# ---------------------------------------------------------------------------
# Full NET_VGG forward (Pallas path).  Channel-major (C, N, spatial) layout:
# the batch folds into the lane axis so every conv is one lane-dense matmul.
# ---------------------------------------------------------------------------
def net_vgg_forward(x_nhwc, P):
    x = jnp.transpose(x_nhwc, (3, 0, 1, 2))                   # (C, N, H, W)

    # blocks_2d
    x = conv2d_3x3(x, P["c2d1_w"], P["c2d1_b"], activation="relu")
    x = maxpool2d_2x2(x)
    x = conv2d_3x3(x, P["c2d2_w"], P["c2d2_b"], activation="leaky_relu")
    x = conv2d_3x3(x, P["c2d3_w"], P["c2d3_b"], activation="leaky_relu")
    x = maxpool2d_2x2(x)

    # mean over height; the trailing BatchNorm2d affine commutes with the mean
    # and is folded into the first Conv1d below — no separate BN pass.
    v = jnp.mean(x, axis=2)                                    # (C, N, T)

    # Conv1d #1: BN2d folded on the input side (scale s2 into input-channel
    # weights, shift t2 into the bias; the conv's ZERO padding is reproduced
    # exactly by padding the patches with -t2/s2 per channel), BN1d folded on
    # the output side.  Exact in eval mode.
    s2 = P["bn2d_g"] * lax.rsqrt(P["bn2d_v"] + BN_EPS)
    t2 = P["bn2d_b"] - P["bn2d_m"] * s2
    s1 = P["bn1d1_g"] * lax.rsqrt(P["bn1d1_v"] + BN_EPS)
    w1 = P["c1d1_w"] * s2[None, :, None] * s1[:, None, None]
    b1 = (P["c1d1_b"] + jnp.sum(P["c1d1_w"] * t2[None, :, None], axis=(1, 2))
          - P["bn1d1_m"]) * s1 + P["bn1d1_b"]
    x = conv1d_3(v, w1, b1, activation="leaky_relu", pad_value=-t2 / s2)

    # Conv1d #2: BN1d folded on the output side.
    s2b = P["bn1d2_g"] * lax.rsqrt(P["bn1d2_v"] + BN_EPS)
    w2 = P["c1d2_w"] * s2b[:, None, None]
    b2 = (P["c1d2_b"] - P["bn1d2_m"]) * s2b + P["bn1d2_b"]
    x = conv1d_3(x, w2, b2, activation="leaky_relu")           # (C, N, T)

    # 2-layer bidirectional LSTM — one fused Pallas call.
    xt = jnp.transpose(x, (2, 1, 0))                           # (T, N, C)
    y = bidirectional_lstm(xt, P["lstm"])                      # (T, N, 2H)

    # output Conv1d(16, num_classes)
    yc = jnp.transpose(y, (2, 1, 0))                           # (2H, N, T)
    out = conv1d_3(yc, P["out_w"], P["out_b"], activation="none")
    return jnp.transpose(out, (1, 0, 2))                       # (N, classes, T)


# ---------------------------------------------------------------------------
# Pure-JAX reference for the correctness check (PyTorch NCHW semantics).
# ---------------------------------------------------------------------------
def _leaky_ref(x):
    return jnp.where(x >= 0, x, LEAKY_SLOPE * x)


def _bn_ref(x, gamma, beta, mean, var, spatial_dims, eps=BN_EPS):
    shape = (1, -1) + (1,) * spatial_dims
    return ((x - mean.reshape(shape)) / jnp.sqrt(var.reshape(shape) + eps)
            * gamma.reshape(shape) + beta.reshape(shape))


def _conv2d_ref(x, w, b):
    y = lax.conv_general_dilated(x, w, (1, 1), ((1, 1), (1, 1)),
                                 dimension_numbers=("NCHW", "OIHW", "NCHW"))
    return y + b.reshape(1, -1, 1, 1)


def _conv1d_ref(x, w, b):
    y = lax.conv_general_dilated(x, w, (1,), ((1, 1),),
                                 dimension_numbers=("NCH", "OIH", "NCH"))
    return y + b.reshape(1, -1, 1)


def _maxpool_ref(x):
    return lax.reduce_window(x, -jnp.inf, lax.max, (1, 1, 2, 2), (1, 1, 2, 2),
                             "VALID")


def _lstm_ref_dir(x_tbc, w_ih, w_hh, b_ih, b_hh):
    T, B, _ = x_tbc.shape
    H = w_hh.shape[1]

    def step(carry, x_t):
        h, c = carry
        gates = x_t @ w_ih.T + h @ w_hh.T + b_ih + b_hh
        i = jax.nn.sigmoid(gates[:, 0:H])
        f = jax.nn.sigmoid(gates[:, H:2 * H])
        g = jnp.tanh(gates[:, 2 * H:3 * H])
        o = jax.nn.sigmoid(gates[:, 3 * H:4 * H])
        c = f * c + i * g
        h = o * jnp.tanh(c)
        return (h, c), h

    init = (jnp.zeros((B, H), jnp.float32), jnp.zeros((B, H), jnp.float32))
    _, hs = lax.scan(step, init, x_tbc)
    return hs


def net_vgg_reference(x_nhwc, P):
    x = jnp.transpose(x_nhwc, (0, 3, 1, 2))
    x = jnp.maximum(_conv2d_ref(x, P["c2d1_w"], P["c2d1_b"]), 0.0)
    x = _maxpool_ref(x)
    x = _leaky_ref(_conv2d_ref(x, P["c2d2_w"], P["c2d2_b"]))
    x = _leaky_ref(_conv2d_ref(x, P["c2d3_w"], P["c2d3_b"]))
    x = _maxpool_ref(x)
    x = _bn_ref(x, P["bn2d_g"], P["bn2d_b"], P["bn2d_m"], P["bn2d_v"], 2)
    x = jnp.mean(x, axis=2)
    x = _leaky_ref(_bn_ref(_conv1d_ref(x, P["c1d1_w"], P["c1d1_b"]),
                           P["bn1d1_g"], P["bn1d1_b"], P["bn1d1_m"],
                           P["bn1d1_v"], 1))
    x = _leaky_ref(_bn_ref(_conv1d_ref(x, P["c1d2_w"], P["c1d2_b"]),
                           P["bn1d2_g"], P["bn1d2_b"], P["bn1d2_m"],
                           P["bn1d2_v"], 1))
    x = jnp.transpose(x, (2, 0, 1))
    out = x
    for layer in range(2):
        fwd = _lstm_ref_dir(out, *P["lstm"][f"l{layer}"])
        bwd = _lstm_ref_dir(out[::-1], *P["lstm"][f"l{layer}_r"])[::-1]
        out = jnp.concatenate([fwd, bwd], axis=-1)
    x = jnp.transpose(out, (1, 2, 0))
    return _conv1d_ref(x, P["out_w"], P["out_b"])


if __name__ == "__main__":
    key = jax.random.PRNGKey(0)
    keys = iter(jax.random.split(key, 48))

    def nrm(shape, scale):
        return jax.random.normal(next(keys), shape, jnp.float32) * scale

    def uni(shape, lo, hi):
        return jax.random.uniform(next(keys), shape, jnp.float32, lo, hi)

    N, Hin, Win, Cin = 2, 32, 32, 3
    C1, C2 = 8, 16               # base_channels=8 -> block channels 8, 16
    HID = C2 // 2                # LSTM hidden size per direction
    NUM_CLASSES = 8

    x = nrm((N, Hin, Win, Cin), 1.0)     # NHWC, as NET_VGG.forward expects

    P = {
        # layers_2d: Conv2d(3,8) + ReLU + MaxPool(2,2)
        "c2d1_w": nrm((C1, Cin, 3, 3), 0.2), "c2d1_b": nrm((C1,), 0.1),
        # create_vgg_block_2d(8, 16, stride=(2,2), norm='none')
        "c2d2_w": nrm((C2, C1, 3, 3), 0.15), "c2d2_b": nrm((C2,), 0.1),
        "c2d3_w": nrm((C2, C2, 3, 3), 0.1), "c2d3_b": nrm((C2,), 0.1),
        # trailing BatchNorm2d(16), inference mode
        "bn2d_g": uni((C2,), 0.5, 1.5), "bn2d_b": nrm((C2,), 0.1),
        "bn2d_m": nrm((C2,), 0.1), "bn2d_v": uni((C2,), 0.5, 1.5),
        # block_1d: [Conv1d + BatchNorm1d + LeakyReLU] x 2
        "c1d1_w": nrm((C2, C2, 3), 0.1), "c1d1_b": nrm((C2,), 0.1),
        "bn1d1_g": uni((C2,), 0.5, 1.5), "bn1d1_b": nrm((C2,), 0.1),
        "bn1d1_m": nrm((C2,), 0.1), "bn1d1_v": uni((C2,), 0.5, 1.5),
        "c1d2_w": nrm((C2, C2, 3), 0.1), "c1d2_b": nrm((C2,), 0.1),
        "bn1d2_g": uni((C2,), 0.5, 1.5), "bn1d2_b": nrm((C2,), 0.1),
        "bn1d2_m": nrm((C2,), 0.1), "bn1d2_v": uni((C2,), 0.5, 1.5),
        # output Conv1d(16, num_classes)
        "out_w": nrm((NUM_CLASSES, C2, 3), 0.1), "out_b": nrm((NUM_CLASSES,), 0.1),
    }
    lstm = {}
    for layer in range(2):
        in_size = C2 if layer == 0 else 2 * HID
        for tag in ("", "_r"):
            lstm[f"l{layer}{tag}"] = (
                nrm((4 * HID, in_size), 0.2),   # w_ih
                nrm((4 * HID, HID), 0.2),       # w_hh
                nrm((4 * HID,), 0.1),           # b_ih
                nrm((4 * HID,), 0.1),           # b_hh
            )
    P["lstm"] = lstm

    fwd = jax.jit(net_vgg_forward)
    out = jax.block_until_ready(fwd(x, P))
    assert out.shape == (N, NUM_CLASSES, Win // 4), out.shape

    ref = jax.block_until_ready(jax.jit(net_vgg_reference)(x, P))
    # Tolerances relaxed for bf16 conv2d operands (accumulation stays f32).
    np.testing.assert_allclose(np.asarray(out), np.asarray(ref),
                               rtol=5e-2, atol=3e-2)
    print("KERNEL_OK")
</pallas_src>

<mosaic_0001>
module attributes {stable_mosaic.version = 11 : i64} {
  func.func @_conv_taps_kernel(%arg0: i32, %arg1: memref<27x2048xbf16, #tpu.memory_space<vmem>>, %arg2: memref<8x27xbf16, #tpu.memory_space<vmem>>, %arg3: memref<8x1xf32, #tpu.memory_space<vmem>>, %arg4: memref<8x2048xf32, #tpu.memory_space<vmem>>) attributes {dimension_semantics = [#tpu.dimension_semantics<parallel>], iteration_bounds = array<i64: 1>, scalar_prefetch = 0 : i64, scratch_operands = 0 : i64, tpu.core_type = #tpu.core_type<tc>, window_params = [{transform_indices = @transform_0, window_bounds = array<i64: 27, 2048>}, {pipeline_mode = #tpu.pipeline_mode<synchronous>, transform_indices = @transform_1, window_bounds = array<i64: 8, 27>}, {pipeline_mode = #tpu.pipeline_mode<synchronous>, transform_indices = @transform_2, window_bounds = array<i64: 8, 1>}, {transform_indices = @transform_3, window_bounds = array<i64: 8, 2048>}]} {
    %c0 = arith.constant 0 : index
    %c0_0 = arith.constant 0 : index
    %0 = vector.load %arg2[%c0, %c0_0] : memref<8x27xbf16, #tpu.memory_space<vmem>>, vector<8x27xbf16>
    %c0_1 = arith.constant 0 : index
    %c0_2 = arith.constant 0 : index
    %1 = vector.load %arg1[%c0_1, %c0_2] : memref<27x2048xbf16, #tpu.memory_space<vmem>>, vector<27x2048xbf16>
    %cst = arith.constant dense<0.000000e+00> : vector<8x2048xf32>
    %2 = tpu.matmul %0, %1, %cst {dimension_numbers = #tpu.dot_dimension_numbers<[1], [0], [0], [1], [0, 0, 1, 1], [], []>} : vector<8x27xbf16>, vector<27x2048xbf16>, vector<8x2048xf32> -> vector<8x2048xf32>
    %c0_3 = arith.constant 0 : index
    %c0_4 = arith.constant 0 : index
    %3 = vector.load %arg3[%c0_3, %c0_4] : memref<8x1xf32, #tpu.memory_space<vmem>>, vector<8x1xf32>
    %4 = vector.broadcast %3 : vector<8x1xf32> to vector<8x2048xf32>
    %5 = arith.addf %2, %4 : vector<8x2048xf32>
    %cst_5 = arith.constant 0.000000e+00 : f32
    %6 = vector.broadcast %cst_5 : f32 to vector<8x2048xf32>
    %7 = arith.maximumf %5, %6 : vector<8x2048xf32>
    %c0_6 = arith.constant 0 : index
    %c0_7 = arith.constant 0 : index
    %8 = vector.load %arg4[%c0_6, %c0_7] : memref<8x2048xf32, #tpu.memory_space<vmem>>, vector<8x2048xf32>
    tpu.vector_store %arg4[%c0_6, %c0_7], %7 {strides = array<i32>} : memref<8x2048xf32, #tpu.memory_space<vmem>>, vector<8x2048xf32>,
    return
  }
  func.func @transform_0(%arg0: i32) -> (i32, i32) {
    %c0_i32 = arith.constant 0 : i32
    %c0_i32_0 = arith.constant 0 : i32
    return %c0_i32, %arg0 : i32, i32
  }
  func.func @transform_1(%arg0: i32) -> (i32, i32) {
    %c0_i32 = arith.constant 0 : i32
    %c0_i32_0 = arith.constant 0 : i32
    %c0_i32_1 = arith.constant 0 : i32
    return %c0_i32, %c0_i32_0 : i32, i32
  }
  func.func @transform_2(%arg0: i32) -> (i32, i32) {
    %c0_i32 = arith.constant 0 : i32
    %c0_i32_0 = arith.constant 0 : i32
    %c0_i32_1 = arith.constant 0 : i32
    return %c0_i32, %c0_i32_0 : i32, i32
  }
  func.func @transform_3(%arg0: i32) -> (i32, i32) {
    %c0_i32 = arith.constant 0 : i32
    %c0_i32_0 = arith.constant 0 : i32
    return %c0_i32, %arg0 : i32, i32
  }
}

module attributes {stable_mosaic.version = 11 : i64} {
  func.func @_conv_taps_kernel(%arg0: i32, %arg1: memref<72x512xbf16, #tpu.memory_space<vmem>>, %arg2: memref<16x72xbf16, #tpu.memory_space<vmem>>, %arg3: memref<16x1xf32, #tpu.memory_space<vmem>>, %arg4: memref<16x512xf32, #tpu.memory_space<vmem>>) attributes {dimension_semantics = [#tpu.dimension_semantics<parallel>], iteration_bounds = array<i64: 1>, scalar_prefetch = 0 : i64, scratch_operands = 0 : i64, tpu.core_type = #tpu.core_type<tc>, window_params = [{transform_indices = @transform_0, window_bounds = array<i64: 72, 512>}, {pipeline_mode = #tpu.pipeline_mode<synchronous>, transform_indices = @transform_1, window_bounds = array<i64: 16, 72>}, {pipeline_mode = #tpu.pipeline_mode<synchronous>, transform_indices = @transform_2, window_bounds = array<i64: 16, 1>}, {transform_indices = @transform_3, window_bounds = array<i64: 16, 512>}]} {
    %c0 = arith.constant 0 : index
    %c0_0 = arith.constant 0 : index
    %0 = vector.load %arg2[%c0, %c0_0] : memref<16x72xbf16, #tpu.memory_space<vmem>>, vector<16x72xbf16>
    %c0_1 = arith.constant 0 : index
    %c0_2 = arith.constant 0 : index
    %1 = vector.load %arg1[%c0_1, %c0_2] : memref<72x512xbf16, #tpu.memory_space<vmem>>, vector<72x512xbf16>
    %cst = arith.constant dense<0.000000e+00> : vector<16x512xf32>
    %2 = tpu.matmul %0, %1, %cst {dimension_numbers = #tpu.dot_dimension_numbers<[1], [0], [0], [1], [0, 0, 1, 1], [], []>} : vector<16x72xbf16>, vector<72x512xbf16>, vector<16x512xf32> -> vector<16x512xf32>
    %c0_3 = arith.constant 0 : index
    %c0_4 = arith.constant 0 : index
    %3 = vector.load %arg3[%c0_3, %c0_4] : memref<16x1xf32, #tpu.memory_space<vmem>>, vector<16x1xf32>
    %4 = vector.broadcast %3 : vector<16x1xf32> to vector<16x512xf32>
    %5 = arith.addf %2, %4 : vector<16x512xf32>
    %cst_5 = arith.constant 0.00999999977 : f32
    %6 = vector.broadcast %cst_5 : f32 to vector<16x512xf32>
    %7 = arith.mulf %6, %5 : vector<16x512xf32>
    %8 = arith.maximumf %5, %7 : vector<16x512xf32>
    %c0_6 = arith.constant 0 : index
    %c0_7 = arith.constant 0 : index
    %9 = vector.load %arg4[%c0_6, %c0_7] : memref<16x512xf32, #tpu.memory_space<vmem>>, vector<16x512xf32>
    tpu.vector_store %arg4[%c0_6, %c0_7], %8 {strides = array<i32>} : memref<16x512xf32, #tpu.memory_space<vmem>>, vector<16x512xf32>,
    return
  }
  func.func @transform_0(%arg0: i32) -> (i32, i32) {
    %c0_i32 = arith.constant 0 : i32
    %c0_i32_0 = arith.constant 0 : i32
    return %c0_i32, %arg0 : i32, i32
  }
  func.func @transform_1(%arg0: i32) -> (i32, i32) {
    %c0_i32 = arith.constant 0 : i32
    %c0_i32_0 = arith.constant 0 : i32
    %c0_i32_1 = arith.constant 0 : i32
    return %c0_i32, %c0_i32_0 : i32, i32
  }
  func.func @transform_2(%arg0: i32) -> (i32, i32) {
    %c0_i32 = arith.constant 0 : i32
    %c0_i32_0 = arith.constant 0 : i32
    %c0_i32_1 = arith.constant 0 : i32
    return %c0_i32, %c0_i32_0 : i32, i32
  }
  func.func @transform_3(%arg0: i32) -> (i32, i32) {
    %c0_i32 = arith.constant 0 : i32
    %c0_i32_0 = arith.constant 0 : i32
    return %c0_i32, %arg0 : i32, i32
  }
}

module attributes {stable_mosaic.version = 11 : i64} {
  func.func @_conv_taps_kernel(%arg0: i32, %arg1: memref<144x512xbf16, #tpu.memory_space<vmem>>, %arg2: memref<16x144xbf16, #tpu.memory_space<vmem>>, %arg3: memref<16x1xf32, #tpu.memory_space<vmem>>, %arg4: memref<16x512xf32, #tpu.memory_space<vmem>>) attributes {dimension_semantics = [#tpu.dimension_semantics<parallel>], iteration_bounds = array<i64: 1>, scalar_prefetch = 0 : i64, scratch_operands = 0 : i64, tpu.core_type = #tpu.core_type<tc>, window_params = [{transform_indices = @transform_0, window_bounds = array<i64: 144, 512>}, {pipeline_mode = #tpu.pipeline_mode<synchronous>, transform_indices = @transform_1, window_bounds = array<i64: 16, 144>}, {pipeline_mode = #tpu.pipeline_mode<synchronous>, transform_indices = @transform_2, window_bounds = array<i64: 16, 1>}, {transform_indices = @transform_3, window_bounds = array<i64: 16, 512>}]} {
    %c0 = arith.constant 0 : index
    %c0_0 = arith.constant 0 : index
    %0 = vector.load %arg2[%c0, %c0_0] : memref<16x144xbf16, #tpu.memory_space<vmem>>, vector<16x144xbf16>
    %c0_1 = arith.constant 0 : index
    %c0_2 = arith.constant 0 : index
    %1 = vector.load %arg1[%c0_1, %c0_2] : memref<144x512xbf16, #tpu.memory_space<vmem>>, vector<144x512xbf16>
    %cst = arith.constant dense<0.000000e+00> : vector<16x512xf32>
    %2 = tpu.matmul %0, %1, %cst {dimension_numbers = #tpu.dot_dimension_numbers<[1], [0], [0], [1], [0, 0, 1, 1], [], []>} : vector<16x144xbf16>, vector<144x512xbf16>, vector<16x512xf32> -> vector<16x512xf32>
    %c0_3 = arith.constant 0 : index
    %c0_4 = arith.constant 0 : index
    %3 = vector.load %arg3[%c0_3, %c0_4] : memref<16x1xf32, #tpu.memory_space<vmem>>, vector<16x1xf32>
    %4 = vector.broadcast %3 : vector<16x1xf32> to vector<16x512xf32>
    %5 = arith.addf %2, %4 : vector<16x512xf32>
    %cst_5 = arith.constant 0.00999999977 : f32
    %6 = vector.broadcast %cst_5 : f32 to vector<16x512xf32>
    %7 = arith.mulf %6, %5 : vector<16x512xf32>
    %8 = arith.maximumf %5, %7 : vector<16x512xf32>
    %c0_6 = arith.constant 0 : index
    %c0_7 = arith.constant 0 : index
    %9 = vector.load %arg4[%c0_6, %c0_7] : memref<16x512xf32, #tpu.memory_space<vmem>>, vector<16x512xf32>
    tpu.vector_store %arg4[%c0_6, %c0_7], %8 {strides = array<i32>} : memref<16x512xf32, #tpu.memory_space<vmem>>, vector<16x512xf32>,
    return
  }
  func.func @transform_0(%arg0: i32) -> (i32, i32) {
    %c0_i32 = arith.constant 0 : i32
    %c0_i32_0 = arith.constant 0 : i32
    return %c0_i32, %arg0 : i32, i32
  }
  func.func @transform_1(%arg0: i32) -> (i32, i32) {
    %c0_i32 = arith.constant 0 : i32
    %c0_i32_0 = arith.constant 0 : i32
    %c0_i32_1 = arith.constant 0 : i32
    return %c0_i32, %c0_i32_0 : i32, i32
  }
  func.func @transform_2(%arg0: i32) -> (i32, i32) {
    %c0_i32 = arith.constant 0 : i32
    %c0_i32_0 = arith.constant 0 : i32
    %c0_i32_1 = arith.constant 0 : i32
    return %c0_i32, %c0_i32_0 : i32, i32
  }
  func.func @transform_3(%arg0: i32) -> (i32, i32) {
    %c0_i32 = arith.constant 0 : i32
    %c0_i32_0 = arith.constant 0 : i32
    return %c0_i32, %arg0 : i32, i32
  }
}

module attributes {stable_mosaic.version = 11 : i64} {
  func.func @_conv_taps_kernel(%arg0: i32, %arg1: memref<48x128xf32, #tpu.memory_space<vmem>>, %arg2: memref<16x48xf32, #tpu.memory_space<vmem>>, %arg3: memref<16x1xf32, #tpu.memory_space<vmem>>, %arg4: memref<16x128xf32, #tpu.memory_space<vmem>>) attributes {dimension_semantics = [#tpu.dimension_semantics<parallel>], iteration_bounds = array<i64: 1>, scalar_prefetch = 0 : i64, scratch_operands = 0 : i64, tpu.core_type = #tpu.core_type<tc>, window_params = [{transform_indices = @transform_0, window_bounds = array<i64: 48, 128>}, {pipeline_mode = #tpu.pipeline_mode<synchronous>, transform_indices = @transform_1, window_bounds = array<i64: 16, 48>}, {pipeline_mode = #tpu.pipeline_mode<synchronous>, transform_indices = @transform_2, window_bounds = array<i64: 16, 1>}, {transform_indices = @transform_3, window_bounds = array<i64: 16, 128>}]} {
    %c0 = arith.constant 0 : index
    %c0_0 = arith.constant 0 : index
    %0 = vector.load %arg2[%c0, %c0_0] : memref<16x48xf32, #tpu.memory_space<vmem>>, vector<16x48xf32>
    %c0_1 = arith.constant 0 : index
    %c0_2 = arith.constant 0 : index
    %1 = vector.load %arg1[%c0_1, %c0_2] : memref<48x128xf32, #tpu.memory_space<vmem>>, vector<48x128xf32>
    %cst = arith.constant dense<0.000000e+00> : vector<16x128xf32>
    %2 = tpu.matmul %0, %1, %cst {dimension_numbers = #tpu.dot_dimension_numbers<[1], [0], [0], [1], [0, 0, 1, 1], [], []>} : vector<16x48xf32>, vector<48x128xf32>, vector<16x128xf32> -> vector<16x128xf32>
    %c0_3 = arith.constant 0 : index
    %c0_4 = arith.constant 0 : index
    %3 = vector.load %arg3[%c0_3, %c0_4] : memref<16x1xf32, #tpu.memory_space<vmem>>, vector<16x1xf32>
    %4 = vector.broadcast %3 : vector<16x1xf32> to vector<16x128xf32>
    %5 = arith.addf %2, %4 : vector<16x128xf32>
    %cst_5 = arith.constant 0.00999999977 : f32
    %6 = vector.broadcast %cst_5 : f32 to vector<16x128xf32>
    %7 = arith.mulf %6, %5 : vector<16x128xf32>
    %8 = arith.maximumf %5, %7 : vector<16x128xf32>
    %c0_6 = arith.constant 0 : index
    %c0_7 = arith.constant 0 : index
    %9 = vector.load %arg4[%c0_6, %c0_7] : memref<16x128xf32, #tpu.memory_space<vmem>>, vector<16x128xf32>
    tpu.vector_store %arg4[%c0_6, %c0_7], %8 {strides = array<i32>} : memref<16x128xf32, #tpu.memory_space<vmem>>, vector<16x128xf32>,
    return
  }
  func.func @transform_0(%arg0: i32) -> (i32, i32) {
    %c0_i32 = arith.constant 0 : i32
    %c0_i32_0 = arith.constant 0 : i32
    return %c0_i32, %arg0 : i32, i32
  }
  func.func @transform_1(%arg0: i32) -> (i32, i32) {
    %c0_i32 = arith.constant 0 : i32
    %c0_i32_0 = arith.constant 0 : i32
    %c0_i32_1 = arith.constant 0 : i32
    return %c0_i32, %c0_i32_0 : i32, i32
  }
  func.func @transform_2(%arg0: i32) -> (i32, i32) {
    %c0_i32 = arith.constant 0 : i32
    %c0_i32_0 = arith.constant 0 : i32
    %c0_i32_1 = arith.constant 0 : i32
    return %c0_i32, %c0_i32_0 : i32, i32
  }
  func.func @transform_3(%arg0: i32) -> (i32, i32) {
    %c0_i32 = arith.constant 0 : i32
    %c0_i32_0 = arith.constant 0 : i32
    return %c0_i32, %arg0 : i32, i32
  }
}

module attributes {stable_mosaic.version = 11 : i64} {
  func.func @_bilstm_kernel(%arg0: i32, %arg1: memref<16x16xf32, #tpu.memory_space<vmem>>, %arg2: memref<4x16x32xf32, #tpu.memory_space<vmem>>, %arg3: memref<4x8x32xf32, #tpu.memory_space<vmem>>, %arg4: memref<4x1x32xf32, #tpu.memory_space<vmem>>, %arg5: memref<16x16xf32, #tpu.memory_space<vmem>>, %arg6: memref<16x8xf32, #tpu.memory_space<vmem>>, %arg7: memref<16x8xf32, #tpu.memory_space<vmem>>, %arg8: memref<16x8xf32, #tpu.memory_space<vmem>>, %arg9: memref<16x8xf32, #tpu.memory_space<vmem>>) attributes {dimension_semantics = [#tpu.dimension_semantics<arbitrary>], iteration_bounds = array<i64: 1>, scalar_prefetch = 0 : i64, scratch_operands = 4 : i64, tpu.core_type = #tpu.core_type<tc>, window_params = [{pipeline_mode = #tpu.pipeline_mode<synchronous>, transform_indices = @transform_0, window_bounds = array<i64: 16, 16>}, {pipeline_mode = #tpu.pipeline_mode<synchronous>, transform_indices = @transform_1, window_bounds = array<i64: 4, 16, 32>}, {pipeline_mode = #tpu.pipeline_mode<synchronous>, transform_indices = @transform_2, window_bounds = array<i64: 4, 8, 32>}, {pipeline_mode = #tpu.pipeline_mode<synchronous>, transform_indices = @transform_3, window_bounds = array<i64: 4, 1, 32>}, {pipeline_mode = #tpu.pipeline_mode<synchronous>, transform_indices = @transform_4, window_bounds = array<i64: 16, 16>}]} {
    %c0 = arith.constant 0 : index
    %c0_0 = arith.constant 0 : index
    %0 = vector.load %arg1[%c0, %c0_0] : memref<16x16xf32, #tpu.memory_space<vmem>>, vector<16x16xf32>
    %c0_1 = arith.constant 0 : index
    %c0_2 = arith.constant 0 : index
    %c0_3 = arith.constant 0 : index
    %1 = vector.load %arg2[%c0_1, %c0_2, %c0_3] : memref<4x16x32xf32, #tpu.memory_space<vmem>>, vector<1x16x32xf32>
    %2 = vector.shape_cast %1 : vector<1x16x32xf32> to vector<16x32xf32>
    %cst = arith.constant dense<0.000000e+00> : vector<16x32xf32>
    %3 = tpu.matmul %0, %2, %cst {dimension_numbers = #tpu.dot_dimension_numbers<[1], [0], [0], [1], [0, 0, 1, 1], [], []>} : vector<16x16xf32>, vector<16x32xf32>, vector<16x32xf32> -> vector<16x32xf32>
    %c0_4 = arith.constant 0 : index
    %c0_5 = arith.constant 0 : index
    %c0_6 = arith.constant 0 : index
    %4 = vector.load %arg4[%c0_4, %c0_5, %c0_6] : memref<4x1x32xf32, #tpu.memory_space<vmem>>, vector<1x1x32xf32>
    %5 = vector.shape_cast %4 : vector<1x1x32xf32> to vector<1x32xf32>
    %6 = vector.broadcast %5 : vector<1x32xf32> to vector<16x32xf32>
    %7 = arith.addf %3, %6 : vector<16x32xf32>
    %c0_7 = arith.constant 0 : index
    %c0_8 = arith.constant 0 : index
    %c0_9 = arith.constant 0 : index
    %8 = vector.load %arg3[%c0_7, %c0_8, %c0_9] : memref<4x8x32xf32, #tpu.memory_space<vmem>>, vector<1x8x32xf32>
    %9 = vector.shape_cast %8 : vector<1x8x32xf32> to vector<8x32xf32>
    %cst_10 = arith.constant 0.000000e+00 : f32
    %10 = vector.broadcast %cst_10 : f32 to vector<2x8xf32>
    %cst_11 = arith.constant 0.000000e+00 : f32
    %11 = vector.broadcast %cst_11 : f32 to vector<2x8xf32>
    %12 = vector.extract_strided_slice %7 {offsets = [0, 0], sizes = [2, 32], strides = [1, 1]} : vector<16x32xf32> to vector<2x32xf32>
    %cst_12 = arith.constant dense<0.000000e+00> : vector<2x32xf32>
    %13 = tpu.matmul %10, %9, %cst_12 {dimension_numbers = #tpu.dot_dimension_numbers<[1], [0], [0], [1], [0, 0, 1, 1], [], []>} : vector<2x8xf32>, vector<8x32xf32>, vector<2x32xf32> -> vector<2x32xf32>
    %14 = arith.addf %12, %13 : vector<2x32xf32>
    %15 = vector.extract_strided_slice %14 {offsets = [0, 0], sizes = [2, 8], strides = [1, 1]} : vector<2x32xf32> to vector<2x8xf32>
    %cst_13 = arith.constant 5.000000e-01 : f32
    %16 = vector.broadcast %cst_13 : f32 to vector<2x8xf32>
    %17 = arith.mulf %16, %15 : vector<2x8xf32>
    %18 = math.tanh %17 : vector<2x8xf32>
    %cst_14 = arith.constant 5.000000e-01 : f32
    %19 = vector.broadcast %cst_14 : f32 to vector<2x8xf32>
    %20 = arith.mulf %19, %18 : vector<2x8xf32>
    %cst_15 = arith.constant 5.000000e-01 : f32
    %21 = vector.broadcast %cst_15 : f32 to vector<2x8xf32>
    %22 = arith.addf %20, %21 : vector<2x8xf32>
    %23 = vector.extract_strided_slice %14 {offsets = [0, 8], sizes = [2, 8], strides = [1, 1]} : vector<2x32xf32> to vector<2x8xf32>
    %cst_16 = arith.constant 5.000000e-01 : f32
    %24 = vector.broadcast %cst_16 : f32 to vector<2x8xf32>
    %25 = arith.mulf %24, %23 : vector<2x8xf32>
    %26 = math.tanh %25 : vector<2x8xf32>
    %cst_17 = arith.constant 5.000000e-01 : f32
    %27 = vector.broadcast %cst_17 : f32 to vector<2x8xf32>
    %28 = arith.mulf %27, %26 : vector<2x8xf32>
    %cst_18 = arith.constant 5.000000e-01 : f32
    %29 = vector.broadcast %cst_18 : f32 to vector<2x8xf32>
    %30 = arith.addf %28, %29 : vector<2x8xf32>
    %31 = vector.extract_strided_slice %14 {offsets = [0, 16], sizes = [2, 8], strides = [1, 1]} : vector<2x32xf32> to vector<2x8xf32>
    %32 = math.tanh %31 : vector<2x8xf32>
    %33 = vector.extract_strided_slice %14 {offsets = [0, 24], sizes = [2, 8], strides = [1, 1]} : vector<2x32xf32> to vector<2x8xf32>
    %cst_19 = arith.constant 5.000000e-01 : f32
    %34 = vector.broadcast %cst_19 : f32 to vector<2x8xf32>
    %35 = arith.mulf %34, %33 : vector<2x8xf32>
    %36 = math.tanh %35 : vector<2x8xf32>
    %cst_20 = arith.constant 5.000000e-01 : f32
    %37 = vector.broadcast %cst_20 : f32 to vector<2x8xf32>
    %38 = arith.mulf %37, %36 : vector<2x8xf32>
    %cst_21 = arith.constant 5.000000e-01 : f32
    %39 = vector.broadcast %cst_21 : f32 to vector<2x8xf32>
    %40 = arith.addf %38, %39 : vector<2x8xf32>
    %41 = arith.mulf %30, %11 : vector<2x8xf32>
    %42 = arith.mulf %22, %32 : vector<2x8xf32>
    %43 = arith.addf %41, %42 : vector<2x8xf32>
    %44 = math.tanh %43 : vector<2x8xf32>
    %45 = arith.mulf %40, %44 : vector<2x8xf32>
    %c0_22 = arith.constant 0 : index
    %c0_23 = arith.constant 0 : index
    %46 = vector.load %arg6[%c0_22, %c0_23] : memref<16x8xf32, #tpu.memory_space<vmem>>, vector<2x8xf32>
    tpu.vector_store %arg6[%c0_22, %c0_23], %45 {strides = array<i32>} : memref<16x8xf32, #tpu.memory_space<vmem>>, vector<2x8xf32>,
    %47 = vector.extract_strided_slice %7 {offsets = [2, 0], sizes = [2, 32], strides = [1, 1]} : vector<16x32xf32> to vector<2x32xf32>
    %cst_24 = arith.constant dense<0.000000e+00> : vector<2x32xf32>
    %48 = tpu.matmul %45, %9, %cst_24 {dimension_numbers = #tpu.dot_dimension_numbers<[1], [0], [0], [1], [0, 0, 1, 1], [], []>} : vector<2x8xf32>, vector<8x32xf32>, vector<2x32xf32> -> vector<2x32xf32>
    %49 = arith.addf %47, %48 : vector<2x32xf32>
    %50 = vector.extract_strided_slice %49 {offsets = [0, 0], sizes = [2, 8], strides = [1, 1]} : vector<2x32xf32> to vector<2x8xf32>
    %cst_25 = arith.constant 5.000000e-01 : f32
    %51 = vector.broadcast %cst_25 : f32 to vector<2x8xf32>
    %52 = arith.mulf %51, %50 : vector<2x8xf32>
    %53 = math.tanh %52 : vector<2x8xf32>
    %cst_26 = arith.constant 5.000000e-01 : f32
    %54 = vector.broadcast %cst_26 : f32 to vector<2x8xf32>
    %55 = arith.mulf %54, %53 : vector<2x8xf32>
    %cst_27 = arith.constant 5.000000e-01 : f32
    %56 = vector.broadcast %cst_27 : f32 to vector<2x8xf32>
    %57 = arith.addf %55, %56 : vector<2x8xf32>
    %58 = vector.extract_strided_slice %49 {offsets = [0, 8], sizes = [2, 8], strides = [1, 1]} : vector<2x32xf32> to vector<2x8xf32>
    %cst_28 = arith.constant 5.000000e-01 : f32
    %59 = vector.broadcast %cst_28 : f32 to vector<2x8xf32>
    %60 = arith.mulf %59, %58 : vector<2x8xf32>
    %61 = math.tanh %60 : vector<2x8xf32>
    %cst_29 = arith.constant 5.000000e-01 : f32
    %62 = vector.broadcast %cst_29 : f32 to vector<2x8xf32>
    %63 = arith.mulf %62, %61 : vector<2x8xf32>
    %cst_30 = arith.constant 5.000000e-01 : f32
    %64 = vector.broadcast %cst_30 : f32 to vector<2x8xf32>
    %65 = arith.addf %63, %64 : vector<2x8xf32>
    %66 = vector.extract_strided_slice %49 {offsets = [0, 16], sizes = [2, 8], strides = [1, 1]} : vector<2x32xf32> to vector<2x8xf32>
    %67 = math.tanh %66 : vector<2x8xf32>
    %68 = vector.extract_strided_slice %49 {offsets = [0, 24], sizes = [2, 8], strides = [1, 1]} : vector<2x32xf32> to vector<2x8xf32>
    %cst_31 = arith.constant 5.000000e-01 : f32
    %69 = vector.broadcast %cst_31 : f32 to vector<2x8xf32>
    %70 = arith.mulf %69, %68 : vector<2x8xf32>
    %71 = math.tanh %70 : vector<2x8xf32>
    %cst_32 = arith.constant 5.000000e-01 : f32
    %72 = vector.broadcast %cst_32 : f32 to vector<2x8xf32>
    %73 = arith.mulf %72, %71 : vector<2x8xf32>
    %cst_33 = arith.constant 5.000000e-01 : f32
    %74 = vector.broadcast %cst_33 : f32 to vector<2x8xf32>
    %75 = arith.addf %73, %74 : vector<2x8xf32>
    %76 = arith.mulf %65, %43 : vector<2x8xf32>
    %77 = arith.mulf %57, %67 : vector<2x8xf32>
    %78 = arith.addf %76, %77 : vector<2x8xf32>
    %79 = math.tanh %78 : vector<2x8xf32>
    %80 = arith.mulf %75, %79 : vector<2x8xf32>
    %c2 = arith.constant 2 : index
    %c0_34 = arith.constant 0 : index
    %81 = vector.load %arg6[%c2, %c0_34] : memref<16x8xf32, #tpu.memory_space<vmem>>, vector<2x8xf32>
    tpu.vector_store %arg6[%c2, %c0_34], %80 {strides = array<i32>} : memref<16x8xf32, #tpu.memory_space<vmem>>, vector<2x8xf32>,
    %82 = vector.extract_strided_slice %7 {offsets = [4, 0], sizes = [2, 32], strides = [1, 1]} : vector<16x32xf32> to vector<2x32xf32>
    %cst_35 = arith.constant dense<0.000000e+00> : vector<2x32xf32>
    %83 = tpu.matmul %80, %9, %cst_35 {dimension_numbers = #tpu.dot_dimension_numbers<[1], [0], [0], [1], [0, 0, 1, 1], [], []>} : vector<2x8xf32>, vector<8x32xf32>, vector<2x32xf32> -> vector<2x32xf32>
    %84 = arith.addf %82, %83 : vector<2x32xf32>
    %85 = vector.extract_strided_slice %84 {offsets = [0, 0], sizes = [2, 8], strides = [1, 1]} : vector<2x32xf32> to vector<2x8xf32>
    %cst_36 = arith.constant 5.000000e-01 : f32
    %86 = vector.broadcast %cst_36 : f32 to vector<2x8xf32>
    %87 = arith.mulf %86, %85 : vector<2x8xf32>
    %88 = math.tanh %87 : vector<2x8xf32>
    %cst_37 = arith.constant 5.000000e-01 : f32
    %89 = vector.broadcast %cst_37 : f32 to vector<2x8xf32>
    %90 = arith.mulf %89, %88 : vector<2x8xf32>
    %cst_38 = arith.constant 5.000000e-01 : f32
    %91 = vector.broadcast %cst_38 : f32 to vector<2x8xf32>
    %92 = arith.addf %90, %91 : vector<2x8xf32>
    %93 = vector.extract_strided_slice %84 {offsets = [0, 8], sizes = [2, 8], strides = [1, 1]} : vector<2x32xf32> to vector<2x8xf32>
    %cst_39 = arith.constant 5.000000e-01 : f32
    %94 = vector.broadcast %cst_39 : f32 to vector<2x8xf32>
    %95 = arith.mulf %94, %93 : vector<2x8xf32>
    %96 = math.tanh %95 : vector<2x8xf32>
    %cst_40 = arith.constant 5.000000e-01 : f32
    %97 = vector.broadcast %cst_40 : f32 to vector<2x8xf32>
    %98 = arith.mulf %97, %96 : vector<2x8xf32>
    %cst_41 = arith.constant 5.000000e-01 : f32
    %99 = vector.broadcast %cst_41 : f32 to vector<2x8xf32>
    %100 = arith.addf %98, %99 : vector<2x8xf32>
    %101 = vector.extract_strided_slice %84 {offsets = [0, 16], sizes = [2, 8], strides = [1, 1]} : vector<2x32xf32> to vector<2x8xf32>
    %102 = math.tanh %101 : vector<2x8xf32>
    %103 = vector.extract_strided_slice %84 {offsets = [0, 24], sizes = [2, 8], strides = [1, 1]} : vector<2x32xf32> to vector<2x8xf32>
    %cst_42 = arith.constant 5.000000e-01 : f32
    %104 = vector.broadcast %cst_42 : f32 to vector<2x8xf32>
    %105 = arith.mulf %104, %103 : vector<2x8xf32>
    %106 = math.tanh %105 : vector<2x8xf32>
    %cst_43 = arith.constant 5.000000e-01 : f32
    %107 = vector.broadcast %cst_43 : f32 to vector<2x8xf32>
    %108 = arith.mulf %107, %106 : vector<2x8xf32>
    %cst_44 = arith.constant 5.000000e-01 : f32
    %109 = vector.broadcast %cst_44 : f32 to vector<2x8xf32>
    %110 = arith.addf %108, %109 : vector<2x8xf32>
    %111 = arith.mulf %100, %78 : vector<2x8xf32>
    %112 = arith.mulf %92, %102 : vector<2x8xf32>
    %113 = arith.addf %111, %112 : vector<2x8xf32>
    %114 = math.tanh %113 : vector<2x8xf32>
    %115 = arith.mulf %110, %114 : vector<2x8xf32>
    %c4 = arith.constant 4 : index
    %c0_45 = arith.constant 0 : index
    %116 = vector.load %arg6[%c4, %c0_45] : memref<16x8xf32, #tpu.memory_space<vmem>>, vector<2x8xf32>
    tpu.vector_store %arg6[%c4, %c0_45], %115 {strides = array<i32>} : memref<16x8xf32, #tpu.memory_space<vmem>>, vector<2x8xf32>,
    %117 = vector.extract_strided_slice %7 {offsets = [6, 0], sizes = [2, 32], strides = [1, 1]} : vector<16x32xf32> to vector<2x32xf32>
    %cst_46 = arith.constant dense<0.000000e+00> : vector<2x32xf32>
    %118 = tpu.matmul %115, %9, %cst_46 {dimension_numbers = #tpu.dot_dimension_numbers<[1], [0], [0], [1], [0, 0, 1, 1], [], []>} : vector<2x8xf32>, vector<8x32xf32>, vector<2x32xf32> -> vector<2x32xf32>
    %119 = arith.addf %117, %118 : vector<2x32xf32>
    %120 = vector.extract_strided_slice %119 {offsets = [0, 0], sizes = [2, 8], strides = [1, 1]} : vector<2x32xf32> to vector<2x8xf32>
    %cst_47 = arith.constant 5.000000e-01 : f32
    %121 = vector.broadcast %cst_47 : f32 to vector<2x8xf32>
    %122 = arith.mulf %121, %120 : vector<2x8xf32>
    %123 = math.tanh %122 : vector<2x8xf32>
    %cst_48 = arith.constant 5.000000e-01 : f32
    %124 = vector.broadcast %cst_48 : f32 to vector<2x8xf32>
    %125 = arith.mulf %124, %123 : vector<2x8xf32>
    %cst_49 = arith.constant 5.000000e-01 : f32
    %126 = vector.broadcast %cst_49 : f32 to vector<2x8xf32>
    %127 = arith.addf %125, %126 : vector<2x8xf32>
    %128 = vector.extract_strided_slice %119 {offsets = [0, 8], sizes = [2, 8], strides = [1, 1]} : vector<2x32xf32> to vector<2x8xf32>
    %cst_50 = arith.constant 5.000000e-01 : f32
    %129 = vector.broadcast %cst_50 : f32 to vector<2x8xf32>
    %130 = arith.mulf %129, %128 : vector<2x8xf32>
    %131 = math.tanh %130 : vector<2x8xf32>
    %cst_51 = arith.constant 5.000000e-01 : f32
    %132 = vector.broadcast %cst_51 : f32 to vector<2x8xf32>
    %133 = arith.mulf %132, %131 : vector<2x8xf32>
    %cst_52 = arith.constant 5.000000e-01 : f32
    %134 = vector.broadcast %cst_52 : f32 to vector<2x8xf32>
    %135 = arith.addf %133, %134 : vector<2x8xf32>
    %136 = vector.extract_strided_slice %119 {offsets = [0, 16], sizes = [2, 8], strides = [1, 1]} : vector<2x32xf32> to vector<2x8xf32>
    %137 = math.tanh %136 : vector<2x8xf32>
    %138 = vector.extract_strided_slice %119 {offsets = [0, 24], sizes = [2, 8], strides = [1, 1]} : vector<2x32xf32> to vector<2x8xf32>
    %cst_53 = arith.constant 5.000000e-01 : f32
    %139 = vector.broadcast %cst_53 : f32 to vector<2x8xf32>
    %140 = arith.mulf %139, %138 : vector<2x8xf32>
    %141 = math.tanh %140 : vector<2x8xf32>
    %cst_54 = arith.constant 5.000000e-01 : f32
    %142 = vector.broadcast %cst_54 : f32 to vector<2x8xf32>
    %143 = arith.mulf %142, %141 : vector<2x8xf32>
    %cst_55 = arith.constant 5.000000e-01 : f32
    %144 = vector.broadcast %cst_55 : f32 to vector<2x8xf32>
    %145 = arith.addf %143, %144 : vector<2x8xf32>
    %146 = arith.mulf %135, %113 : vector<2x8xf32>
    %147 = arith.mulf %127, %137 : vector<2x8xf32>
    %148 = arith.addf %146, %147 : vector<2x8xf32>
    %149 = math.tanh %148 : vector<2x8xf32>
    %150 = arith.mulf %145, %149 : vector<2x8xf32>
    %c6 = arith.constant 6 : index
    %c0_56 = arith.constant 0 : index
    %151 = vector.load %arg6[%c6, %c0_56] : memref<16x8xf32, #tpu.memory_space<vmem>>, vector<2x8xf32>
    tpu.vector_store %arg6[%c6, %c0_56], %150 {strides = array<i32>} : memref<16x8xf32, #tpu.memory_space<vmem>>, vector<2x8xf32>,
    %152 = vector.extract_strided_slice %7 {offsets = [8, 0], sizes = [2, 32], strides = [1, 1]} : vector<16x32xf32> to vector<2x32xf32>
    %cst_57 = arith.constant dense<0.000000e+00> : vector<2x32xf32>
    %153 = tpu.matmul %150, %9, %cst_57 {dimension_numbers = #tpu.dot_dimension_numbers<[1], [0], [0], [1], [0, 0, 1, 1], [], []>} : vector<2x8xf32>, vector<8x32xf32>, vector<2x32xf32> -> vector<2x32xf32>
    %154 = arith.addf %152, %153 : vector<2x32xf32>
    %155 = vector.extract_strided_slice %154 {offsets = [0, 0], sizes = [2, 8], strides = [1, 1]} : vector<2x32xf32> to vector<2x8xf32>
    %cst_58 = arith.constant 5.000000e-01 : f32
    %156 = vector.broadcast %cst_58 : f32 to vector<2x8xf32>
    %157 = arith.mulf %156, %155 : vector<2x8xf32>
    %158 = math.tanh %157 : vector<2x8xf32>
    %cst_59 = arith.constant 5.000000e-01 : f32
    %159 = vector.broadcast %cst_59 : f32 to vector<2x8xf32>
    %160 = arith.mulf %159, %158 : vector<2x8xf32>
    %cst_60 = arith.constant 5.000000e-01 : f32
    %161 = vector.broadcast %cst_60 : f32 to vector<2x8xf32>
    %162 = arith.addf %160, %161 : vector<2x8xf32>
    %163 = vector.extract_strided_slice %154 {offsets = [0, 8], sizes = [2, 8], strides = [1, 1]} : vector<2x32xf32> to vector<2x8xf32>
    %cst_61 = arith.constant 5.000000e-01 : f32
    %164 = vector.broadcast %cst_61 : f32 to vector<2x8xf32>
    %165 = arith.mulf %164, %163 : vector<2x8xf32>
    %166 = math.tanh %165 : vector<2x8xf32>
    %cst_62 = arith.constant 5.000000e-01 : f32
    %167 = vector.broadcast %cst_62 : f32 to vector<2x8xf32>
    %168 = arith.mulf %167, %166 : vector<2x8xf32>
    %cst_63 = arith.constant 5.000000e-01 : f32
    %169 = vector.broadcast %cst_63 : f32 to vector<2x8xf32>
    %170 = arith.addf %168, %169 : vector<2x8xf32>
    %171 = vector.extract_strided_slice %154 {offsets = [0, 16], sizes = [2, 8], strides = [1, 1]} : vector<2x32xf32> to vector<2x8xf32>
    %172 = math.tanh %171 : vector<2x8xf32>
    %173 = vector.extract_strided_slice %154 {offsets = [0, 24], sizes = [2, 8], strides = [1, 1]} : vector<2x32xf32> to vector<2x8xf32>
    %cst_64 = arith.constant 5.000000e-01 : f32
    %174 = vector.broadcast %cst_64 : f32 to vector<2x8xf32>
    %175 = arith.mulf %174, %173 : vector<2x8xf32>
    %176 = math.tanh %175 : vector<2x8xf32>
    %cst_65 = arith.constant 5.000000e-01 : f32
    %177 = vector.broadcast %cst_65 : f32 to vector<2x8xf32>
    %178 = arith.mulf %177, %176 : vector<2x8xf32>
    %cst_66 = arith.constant 5.000000e-01 : f32
    %179 = vector.broadcast %cst_66 : f32 to vector<2x8xf32>
    %180 = arith.addf %178, %179 : vector<2x8xf32>
    %181 = arith.mulf %170, %148 : vector<2x8xf32>
    %182 = arith.mulf %162, %172 : vector<2x8xf32>
    %183 = arith.addf %181, %182 : vector<2x8xf32>
    %184 = math.tanh %183 : vector<2x8xf32>
    %185 = arith.mulf %180, %184 : vector<2x8xf32>
    %c8 = arith.constant 8 : index
    %c0_67 = arith.constant 0 : index
    %186 = vector.load %arg6[%c8, %c0_67] : memref<16x8xf32, #tpu.memory_space<vmem>>, vector<2x8xf32>
    tpu.vector_store %arg6[%c8, %c0_67], %185 {strides = array<i32>} : memref<16x8xf32, #tpu.memory_space<vmem>>, vector<2x8xf32>,
    %187 = vector.extract_strided_slice %7 {offsets = [10, 0], sizes = [2, 32], strides = [1, 1]} : vector<16x32xf32> to vector<2x32xf32>
    %cst_68 = arith.constant dense<0.000000e+00> : vector<2x32xf32>
    %188 = tpu.matmul %185, %9, %cst_68 {dimension_numbers = #tpu.dot_dimension_numbers<[1], [0], [0], [1], [0, 0, 1, 1], [], []>} : vector<2x8xf32>, vector<8x32xf32>, vector<2x32xf32> -> vector<2x32xf32>
    %189 = arith.addf %187, %188 : vector<2x32xf32>
    %190 = vector.extract_strided_slice %189 {offsets = [0, 0], sizes = [2, 8], strides = [1, 1]} : vector<2x32xf32> to vector<2x8xf32>
    %cst_69 = arith.constant 5.000000e-01 : f32
    %191 = vector.broadcast %cst_69 : f32 to vector<2x8xf32>
    %192 = arith.mulf %191, %190 : vector<2x8xf32>
    %193 = math.tanh %192 : vector<2x8xf32>
    %cst_70 = arith.constant 5.000000e-01 : f32
    %194 = vector.broadcast %cst_70 : f32 to vector<2x8xf32>
    %195 = arith.mulf %194, %193 : vector<2x8xf32>
    %cst_71 = arith.constant 5.000000e-01 : f32
    %196 = vector.broadcast %cst_71 : f32 to vector<2x8xf32>
    %197 = arith.addf %195, %196 : vector<2x8xf32>
    %198 = vector.extract_strided_slice %189 {offsets = [0, 8], sizes = [2, 8], strides = [1, 1]} : vector<2x32xf32> to vector<2x8xf32>
    %cst_72 = arith.constant 5.000000e-01 : f32
    %199 = vector.broadcast %cst_72 : f32 to vector<2x8xf32>
    %200 = arith.mulf %199, %198 : vector<2x8xf32>
    %201 = math.tanh %200 : vector<2x8xf32>
    %cst_73 = arith.constant 5.000000e-01 : f32
    %202 = vector.broadcast %cst_73 : f32 to vector<2x8xf32>
    %203 = arith.mulf %202, %201 : vector<2x8xf32>
    %cst_74 = arith.constant 5.000000e-01 : f32
    %204 = vector.broadcast %cst_74 : f32 to vector<2x8xf32>
    %205 = arith.addf %203, %204 : vector<2x8xf32>
    %206 = vector.extract_strided_slice %189 {offsets = [0, 16], sizes = [2, 8], strides = [1, 1]} : vector<2x32xf32> to vector<2x8xf32>
    %207 = math.tanh %206 : vector<2x8xf32>
    %208 = vector.extract_strided_slice %189 {offsets = [0, 24], sizes = [2, 8], strides = [1, 1]} : vector<2x32xf32> to vector<2x8xf32>
    %cst_75 = arith.constant 5.000000e-01 : f32
    %209 = vector.broadcast %cst_75 : f32 to vector<2x8xf32>
    %210 = arith.mulf %209, %208 : vector<2x8xf32>
    %211 = math.tanh %210 : vector<2x8xf32>
    %cst_76 = arith.constant 5.000000e-01 : f32
    %212 = vector.broadcast %cst_76 : f32 to vector<2x8xf32>
    %213 = arith.mulf %212, %211 : vector<2x8xf32>
    %cst_77 = arith.constant 5.000000e-01 : f32
    %214 = vector.broadcast %cst_77 : f32 to vector<2x8xf32>
    %215 = arith.addf %213, %214 : vector<2x8xf32>
    %216 = arith.mulf %205, %183 : vector<2x8xf32>
    %217 = arith.mulf %197, %207 : vector<2x8xf32>
    %218 = arith.addf %216, %217 : vector<2x8xf32>
    %219 = math.tanh %218 : vector<2x8xf32>
    %220 = arith.mulf %215, %219 : vector<2x8xf32>
    %c10 = arith.constant 10 : index
    %c0_78 = arith.constant 0 : index
    %221 = vector.load %arg6[%c10, %c0_78] : memref<16x8xf32, #tpu.memory_space<vmem>>, vector<2x8xf32>
    tpu.vector_store %arg6[%c10, %c0_78], %220 {strides = array<i32>} : memref<16x8xf32, #tpu.memory_space<vmem>>, vector<2x8xf32>,
    %222 = vector.extract_strided_slice %7 {offsets = [12, 0], sizes = [2, 32], strides = [1, 1]} : vector<16x32xf32> to vector<2x32xf32>
    %cst_79 = arith.constant dense<0.000000e+00> : vector<2x32xf32>
    %223 = tpu.matmul %220, %9, %cst_79 {dimension_numbers = #tpu.dot_dimension_numbers<[1], [0], [0], [1], [0, 0, 1, 1], [], []>} : vector<2x8xf32>, vector<8x32xf32>, vector<2x32xf32> -> vector<2x32xf32>
    %224 = arith.addf %222, %223 : vector<2x32xf32>
    %225 = vector.extract_strided_slice %224 {offsets = [0, 0], sizes = [2, 8], strides = [1, 1]} : vector<2x32xf32> to vector<2x8xf32>
    %cst_80 = arith.constant 5.000000e-01 : f32
    %226 = vector.broadcast %cst_80 : f32 to vector<2x8xf32>
    %227 = arith.mulf %226, %225 : vector<2x8xf32>
    %228 = math.tanh %227 : vector<2x8xf32>
    %cst_81 = arith.constant 5.000000e-01 : f32
    %229 = vector.broadcast %cst_81 : f32 to vector<2x8xf32>
    %230 = arith.mulf %229, %228 : vector<2x8xf32>
    %cst_82 = arith.constant 5.000000e-01 : f32
    %231 = vector.broadcast %cst_82 : f32 to vector<2x8xf32>
    %232 = arith.addf %230, %231 : vector<2x8xf32>
    %233 = vector.extract_strided_slice %224 {offsets = [0, 8], sizes = [2, 8], strides = [1, 1]} : vector<2x32xf32> to vector<2x8xf32>
    %cst_83 = arith.constant 5.000000e-01 : f32
    %234 = vector.broadcast %cst_83 : f32 to vector<2x8xf32>
    %235 = arith.mulf %234, %233 : vector<2x8xf32>
    %236 = math.tanh %235 : vector<2x8xf32>
    %cst_84 = arith.constant 5.000000e-01 : f32
    %237 = vector.broadcast %cst_84 : f32 to vector<2x8xf32>
    %238 = arith.mulf %237, %236 : vector<2x8xf32>
    %cst_85 = arith.constant 5.000000e-01 : f32
    %239 = vector.broadcast %cst_85 : f32 to vector<2x8xf32>
    %240 = arith.addf %238, %239 : vector<2x8xf32>
    %241 = vector.extract_strided_slice %224 {offsets = [0, 16], sizes = [2, 8], strides = [1, 1]} : vector<2x32xf32> to vector<2x8xf32>
    %242 = math.tanh %241 : vector<2x8xf32>
    %243 = vector.extract_strided_slice %224 {offsets = [0, 24], sizes = [2, 8], strides = [1, 1]} : vector<2x32xf32> to vector<2x8xf32>
    %cst_86 = arith.constant 5.000000e-01 : f32
    %244 = vector.broadcast %cst_86 : f32 to vector<2x8xf32>
    %245 = arith.mulf %244, %243 : vector<2x8xf32>
    %246 = math.tanh %245 : vector<2x8xf32>
    %cst_87 = arith.constant 5.000000e-01 : f32
    %247 = vector.broadcast %cst_87 : f32 to vector<2x8xf32>
    %248 = arith.mulf %247, %246 : vector<2x8xf32>
    %cst_88 = arith.constant 5.000000e-01 : f32
    %249 = vector.broadcast %cst_88 : f32 to vector<2x8xf32>
    %250 = arith.addf %248, %249 : vector<2x8xf32>
    %251 = arith.mulf %240, %218 : vector<2x8xf32>
    %252 = arith.mulf %232, %242 : vector<2x8xf32>
    %253 = arith.addf %251, %252 : vector<2x8xf32>
    %254 = math.tanh %253 : vector<2x8xf32>
    %255 = arith.mulf %250, %254 : vector<2x8xf32>
    %c12 = arith.constant 12 : index
    %c0_89 = arith.constant 0 : index
    %256 = vector.load %arg6[%c12, %c0_89] : memref<16x8xf32, #tpu.memory_space<vmem>>, vector<2x8xf32>
    tpu.vector_store %arg6[%c12, %c0_89], %255 {strides = array<i32>} : memref<16x8xf32, #tpu.memory_space<vmem>>, vector<2x8xf32>,
    %257 = vector.extract_strided_slice %7 {offsets = [14, 0], sizes = [2, 32], strides = [1, 1]} : vector<16x32xf32> to vector<2x32xf32>
    %cst_90 = arith.constant dense<0.000000e+00> : vector<2x32xf32>
    %258 = tpu.matmul %255, %9, %cst_90 {dimension_numbers = #tpu.dot_dimension_numbers<[1], [0], [0], [1], [0, 0, 1, 1], [], []>} : vector<2x8xf32>, vector<8x32xf32>, vector<2x32xf32> -> vector<2x32xf32>
    %259 = arith.addf %257, %258 : vector<2x32xf32>
    %260 = vector.extract_strided_slice %259 {offsets = [0, 0], sizes = [2, 8], strides = [1, 1]} : vector<2x32xf32> to vector<2x8xf32>
    %cst_91 = arith.constant 5.000000e-01 : f32
    %261 = vector.broadcast %cst_91 : f32 to vector<2x8xf32>
    %262 = arith.mulf %261, %260 : vector<2x8xf32>
    %263 = math.tanh %262 : vector<2x8xf32>
    %cst_92 = arith.constant 5.000000e-01 : f32
    %264 = vector.broadcast %cst_92 : f32 to vector<2x8xf32>
    %265 = arith.mulf %264, %263 : vector<2x8xf32>
    %cst_93 = arith.constant 5.000000e-01 : f32
    %266 = vector.broadcast %cst_93 : f32 to vector<2x8xf32>
    %267 = arith.addf %265, %266 : vector<2x8xf32>
    %268 = vector.extract_strided_slice %259 {offsets = [0, 8], sizes = [2, 8], strides = [1, 1]} : vector<2x32xf32> to vector<2x8xf32>
    %cst_94 = arith.constant 5.000000e-01 : f32
    %269 = vector.broadcast %cst_94 : f32 to vector<2x8xf32>
    %270 = arith.mulf %269, %268 : vector<2x8xf32>
    %271 = math.tanh %270 : vector<2x8xf32>
    %cst_95 = arith.constant 5.000000e-01 : f32
    %272 = vector.broadcast %cst_95 : f32 to vector<2x8xf32>
    %273 = arith.mulf %272, %271 : vector<2x8xf32>
    %cst_96 = arith.constant 5.000000e-01 : f32
    %274 = vector.broadcast %cst_96 : f32 to vector<2x8xf32>
    %275 = arith.addf %273, %274 : vector<2x8xf32>
    %276 = vector.extract_strided_slice %259 {offsets = [0, 16], sizes = [2, 8], strides = [1, 1]} : vector<2x32xf32> to vector<2x8xf32>
    %277 = math.tanh %276 : vector<2x8xf32>
    %278 = vector.extract_strided_slice %259 {offsets = [0, 24], sizes = [2, 8], strides = [1, 1]} : vector<2x32xf32> to vector<2x8xf32>
    %cst_97 = arith.constant 5.000000e-01 : f32
    %279 = vector.broadcast %cst_97 : f32 to vector<2x8xf32>
    %280 = arith.mulf %279, %278 : vector<2x8xf32>
    %281 = math.tanh %280 : vector<2x8xf32>
    %cst_98 = arith.constant 5.000000e-01 : f32
    %282 = vector.broadcast %cst_98 : f32 to vector<2x8xf32>
    %283 = arith.mulf %282, %281 : vector<2x8xf32>
    %cst_99 = arith.constant 5.000000e-01 : f32
    %284 = vector.broadcast %cst_99 : f32 to vector<2x8xf32>
    %285 = arith.addf %283, %284 : vector<2x8xf32>
    %286 = arith.mulf %275, %253 : vector<2x8xf32>
    %287 = arith.mulf %267, %277 : vector<2x8xf32>
    %288 = arith.addf %286, %287 : vector<2x8xf32>
    %289 = math.tanh %288 : vector<2x8xf32>
    %290 = arith.mulf %285, %289 : vector<2x8xf32>
    %c14 = arith.constant 14 : index
    %c0_100 = arith.constant 0 : index
    %291 = vector.load %arg6[%c14, %c0_100] : memref<16x8xf32, #tpu.memory_space<vmem>>, vector<2x8xf32>
    tpu.vector_store %arg6[%c14, %c0_100], %290 {strides = array<i32>} : memref<16x8xf32, #tpu.memory_space<vmem>>, vector<2x8xf32>,
    %c1 = arith.constant 1 : index
    %c0_101 = arith.constant 0 : index
    %c0_102 = arith.constant 0 : index
    %292 = vector.load %arg2[%c1, %c0_101, %c0_102] : memref<4x16x32xf32, #tpu.memory_space<vmem>>, vector<1x16x32xf32>
    %293 = vector.shape_cast %292 : vector<1x16x32xf32> to vector<16x32xf32>
    %cst_103 = arith.constant dense<0.000000e+00> : vector<16x32xf32>
    %294 = tpu.matmul %0, %293, %cst_103 {dimension_numbers = #tpu.dot_dimension_numbers<[1], [0], [0], [1], [0, 0, 1, 1], [], []>} : vector<16x16xf32>, vector<16x32xf32>, vector<16x32xf32> -> vector<16x32xf32>
    %c1_104 = arith.constant 1 : index
    %c0_105 = arith.constant 0 : index
    %c0_106 = arith.constant 0 : index
    %295 = vector.load %arg4[%c1_104, %c0_105, %c0_106] : memref<4x1x32xf32, #tpu.memory_space<vmem>>, vector<1x1x32xf32>
    %296 = vector.shape_cast %295 : vector<1x1x32xf32> to vector<1x32xf32>
    %297 = vector.broadcast %296 : vector<1x32xf32> to vector<16x32xf32>
    %298 = arith.addf %294, %297 : vector<16x32xf32>
    %c1_107 = arith.constant 1 : index
    %c0_108 = arith.constant 0 : index
    %c0_109 = arith.constant 0 : index
    %299 = vector.load %arg3[%c1_107, %c0_108, %c0_109] : memref<4x8x32xf32, #tpu.memory_space<vmem>>, vector<1x8x32xf32>
    %300 = vector.shape_cast %299 : vector<1x8x32xf32> to vector<8x32xf32>
    %cst_110 = arith.constant 0.000000e+00 : f32
    %301 = vector.broadcast %cst_110 : f32 to vector<2x8xf32>
    %cst_111 = arith.constant 0.000000e+00 : f32
    %302 = vector.broadcast %cst_111 : f32 to vector<2x8xf32>
    %303 = vector.extract_strided_slice %298 {offsets = [14, 0], sizes = [2, 32], strides = [1, 1]} : vector<16x32xf32> to vector<2x32xf32>
    %cst_112 = arith.constant dense<0.000000e+00> : vector<2x32xf32>
    %304 = tpu.matmul %301, %300, %cst_112 {dimension_numbers = #tpu.dot_dimension_numbers<[1], [0], [0], [1], [0, 0, 1, 1], [], []>} : vector<2x8xf32>, vector<8x32xf32>, vector<2x32xf32> -> vector<2x32xf32>
    %305 = arith.addf %303, %304 : vector<2x32xf32>
    %306 = vector.extract_strided_slice %305 {offsets = [0, 0], sizes = [2, 8], strides = [1, 1]} : vector<2x32xf32> to vector<2x8xf32>
    %cst_113 = arith.constant 5.000000e-01 : f32
    %307 = vector.broadcast %cst_113 : f32 to vector<2x8xf32>
    %308 = arith.mulf %307, %306 : vector<2x8xf32>
    %309 = math.tanh %308 : vector<2x8xf32>
    %cst_114 = arith.constant 5.000000e-01 : f32
    %310 = vector.broadcast %cst_114 : f32 to vector<2x8xf32>
    %311 = arith.mulf %310, %309 : vector<2x8xf32>
    %cst_115 = arith.constant 5.000000e-01 : f32
    %312 = vector.broadcast %cst_115 : f32 to vector<2x8xf32>
    %313 = arith.addf %311, %312 : vector<2x8xf32>
    %314 = vector.extract_strided_slice %305 {offsets = [0, 8], sizes = [2, 8], strides = [1, 1]} : vector<2x32xf32> to vector<2x8xf32>
    %cst_116 = arith.constant 5.000000e-01 : f32
    %315 = vector.broadcast %cst_116 : f32 to vector<2x8xf32>
    %316 = arith.mulf %315, %314 : vector<2x8xf32>
    %317 = math.tanh %316 : vector<2x8xf32>
    %cst_117 = arith.constant 5.000000e-01 : f32
    %318 = vector.broadcast %cst_117 : f32 to vector<2x8xf32>
    %319 = arith.mulf %318, %317 : vector<2x8xf32>
    %cst_118 = arith.constant 5.000000e-01 : f32
    %320 = vector.broadcast %cst_118 : f32 to vector<2x8xf32>
    %321 = arith.addf %319, %320 : vector<2x8xf32>
    %322 = vector.extract_strided_slice %305 {offsets = [0, 16], sizes = [2, 8], strides = [1, 1]} : vector<2x32xf32> to vector<2x8xf32>
    %323 = math.tanh %322 : vector<2x8xf32>
    %324 = vector.extract_strided_slice %305 {offsets = [0, 24], sizes = [2, 8], strides = [1, 1]} : vector<2x32xf32> to vector<2x8xf32>
    %cst_119 = arith.constant 5.000000e-01 : f32
    %325 = vector.broadcast %cst_119 : f32 to vector<2x8xf32>
    %326 = arith.mulf %325, %324 : vector<2x8xf32>
    %327 = math.tanh %326 : vector<2x8xf32>
    %cst_120 = arith.constant 5.000000e-01 : f32
    %328 = vector.broadcast %cst_120 : f32 to vector<2x8xf32>
    %329 = arith.mulf %328, %327 : vector<2x8xf32>
    %cst_121 = arith.constant 5.000000e-01 : f32
    %330 = vector.broadcast %cst_121 : f32 to vector<2x8xf32>
    %331 = arith.addf %329, %330 : vector<2x8xf32>
    %332 = arith.mulf %321, %302 : vector<2x8xf32>
    %333 = arith.mulf %313, %323 : vector<2x8xf32>
    %334 = arith.addf %332, %333 : vector<2x8xf32>
    %335 = math.tanh %334 : vector<2x8xf32>
    %336 = arith.mulf %331, %335 : vector<2x8xf32>
    %c14_122 = arith.constant 14 : index
    %c0_123 = arith.constant 0 : index
    %337 = vector.load %arg7[%c14_122, %c0_123] : memref<16x8xf32, #tpu.memory_space<vmem>>, vector<2x8xf32>
    tpu.vector_store %arg7[%c14_122, %c0_123], %336 {strides = array<i32>} : memref<16x8xf32, #tpu.memory_space<vmem>>, vector<2x8xf32>,
    %338 = vector.extract_strided_slice %298 {offsets = [12, 0], sizes = [2, 32], strides = [1, 1]} : vector<16x32xf32> to vector<2x32xf32>
    %cst_124 = arith.constant dense<0.000000e+00> : vector<2x32xf32>
    %339 = tpu.matmul %336, %300, %cst_124 {dimension_numbers = #tpu.dot_dimension_numbers<[1], [0], [0], [1], [0, 0, 1, 1], [], []>} : vector<2x8xf32>, vector<8x32xf32>, vector<2x32xf32> -> vector<2x32xf32>
    %340 = arith.addf %338, %339 : vector<2x32xf32>
    %341 = vector.extract_strided_slice %340 {offsets = [0, 0], sizes = [2, 8], strides = [1, 1]} : vector<2x32xf32> to vector<2x8xf32>
    %cst_125 = arith.constant 5.000000e-01 : f32
    %342 = vector.broadcast %cst_125 : f32 to vector<2x8xf32>
    %343 = arith.mulf %342, %341 : vector<2x8xf32>
    %344 = math.tanh %343 : vector<2x8xf32>
    %cst_126 = arith.constant 5.000000e-01 : f32
    %345 = vector.broadcast %cst_126 : f32 to vector<2x8xf32>
    %346 = arith.mulf %345, %344 : vector<2x8xf32>
    %cst_127 = arith.constant 5.000000e-01 : f32
    %347 = vector.broadcast %cst_127 : f32 to vector<2x8xf32>
    %348 = arith.addf %346, %347 : vector<2x8xf32>
    %349 = vector.extract_strided_slice %340 {offsets = [0, 8], sizes = [2, 8], strides = [1, 1]} : vector<2x32xf32> to vector<2x8xf32>
    %cst_128 = arith.constant 5.000000e-01 : f32
    %350 = vector.broadcast %cst_128 : f32 to vector<2x8xf32>
    %351 = arith.mulf %350, %349 : vector<2x8xf32>
    %352 = math.tanh %351 : vector<2x8xf32>
    %cst_129 = arith.constant 5.000000e-01 : f32
    %353 = vector.broadcast %cst_129 : f32 to vector<2x8xf32>
    %354 = arith.mulf %353, %352 : vector<2x8xf32>
    %cst_130 = arith.constant 5.000000e-01 : f32
    %355 = vector.broadcast %cst_130 : f32 to vector<2x8xf32>
    %356 = arith.addf %354, %355 : vector<2x8xf32>
    %357 = vector.extract_strided_slice %340 {offsets = [0, 16], sizes = [2, 8], strides = [1, 1]} : vector<2x32xf32> to vector<2x8xf32>
    %358 = math.tanh %357 : vector<2x8xf32>
    %359 = vector.extract_strided_slice %340 {offsets = [0, 24], sizes = [2, 8], strides = [1, 1]} : vector<2x32xf32> to vector<2x8xf32>
    %cst_131 = arith.constant 5.000000e-01 : f32
    %360 = vector.broadcast %cst_131 : f32 to vector<2x8xf32>
    %361 = arith.mulf %360, %359 : vector<2x8xf32>
    %362 = math.tanh %361 : vector<2x8xf32>
    %cst_132 = arith.constant 5.000000e-01 : f32
    %363 = vector.broadcast %cst_132 : f32 to vector<2x8xf32>
    %364 = arith.mulf %363, %362 : vector<2x8xf32>
    %cst_133 = arith.constant 5.000000e-01 : f32
    %365 = vector.broadcast %cst_133 : f32 to vector<2x8xf32>
    %366 = arith.addf %364, %365 : vector<2x8xf32>
    %367 = arith.mulf %356, %334 : vector<2x8xf32>
    %368 = arith.mulf %348, %358 : vector<2x8xf32>
    %369 = arith.addf %367, %368 : vector<2x8xf32>
    %370 = math.tanh %369 : vector<2x8xf32>
    %371 = arith.mulf %366, %370 : vector<2x8xf32>
    %c12_134 = arith.constant 12 : index
    %c0_135 = arith.constant 0 : index
    %372 = vector.load %arg7[%c12_134, %c0_135] : memref<16x8xf32, #tpu.memory_space<vmem>>, vector<2x8xf32>
    tpu.vector_store %arg7[%c12_134, %c0_135], %371 {strides = array<i32>} : memref<16x8xf32, #tpu.memory_space<vmem>>, vector<2x8xf32>,
    %373 = vector.extract_strided_slice %298 {offsets = [10, 0], sizes = [2, 32], strides = [1, 1]} : vector<16x32xf32> to vector<2x32xf32>
    %cst_136 = arith.constant dense<0.000000e+00> : vector<2x32xf32>
    %374 = tpu.matmul %371, %300, %cst_136 {dimension_numbers = #tpu.dot_dimension_numbers<[1], [0], [0], [1], [0, 0, 1, 1], [], []>} : vector<2x8xf32>, vector<8x32xf32>, vector<2x32xf32> -> vector<2x32xf32>
    %375 = arith.addf %373, %374 : vector<2x32xf32>
    %376 = vector.extract_strided_slice %375 {offsets = [0, 0], sizes = [2, 8], strides = [1, 1]} : vector<2x32xf32> to vector<2x8xf32>
    %cst_137 = arith.constant 5.000000e-01 : f32
    %377 = vector.broadcast %cst_137 : f32 to vector<2x8xf32>
    %378 = arith.mulf %377, %376 : vector<2x8xf32>
    %379 = math.tanh %378 : vector<2x8xf32>
    %cst_138 = arith.constant 5.000000e-01 : f32
    %380 = vector.broadcast %cst_138 : f32 to vector<2x8xf32>
    %381 = arith.mulf %380, %379 : vector<2x8xf32>
    %cst_139 = arith.constant 5.000000e-01 : f32
    %382 = vector.broadcast %cst_139 : f32 to vector<2x8xf32>
    %383 = arith.addf %381, %382 : vector<2x8xf32>
    %384 = vector.extract_strided_slice %375 {offsets = [0, 8], sizes = [2, 8], strides = [1, 1]} : vector<2x32xf32> to vector<2x8xf32>
    %cst_140 = arith.constant 5.000000e-01 : f32
    %385 = vector.broadcast %cst_140 : f32 to vector<2x8xf32>
    %386 = arith.mulf %385, %384 : vector<2x8xf32>
    %387 = math.tanh %386 : vector<2x8xf32>
    %cst_141 = arith.constant 5.000000e-01 : f32
    %388 = vector.broadcast %cst_141 : f32 to vector<2x8xf32>
    %389 = arith.mulf %388, %387 : vector<2x8xf32>
    %cst_142 = arith.constant 5.000000e-01 : f32
    %390 = vector.broadcast %cst_142 : f32 to vector<2x8xf32>
    %391 = arith.addf %389, %390 : vector<2x8xf32>
    %392 = vector.extract_strided_slice %375 {offsets = [0, 16], sizes = [2, 8], strides = [1, 1]} : vector<2x32xf32> to vector<2x8xf32>
    %393 = math.tanh %392 : vector<2x8xf32>
    %394 = vector.extract_strided_slice %375 {offsets = [0, 24], sizes = [2, 8], strides = [1, 1]} : vector<2x32xf32> to vector<2x8xf32>
    %cst_143 = arith.constant 5.000000e-01 : f32
    %395 = vector.broadcast %cst_143 : f32 to vector<2x8xf32>
    %396 = arith.mulf %395, %394 : vector<2x8xf32>
    %397 = math.tanh %396 : vector<2x8xf32>
    %cst_144 = arith.constant 5.000000e-01 : f32
    %398 = vector.broadcast %cst_144 : f32 to vector<2x8xf32>
    %399 = arith.mulf %398, %397 : vector<2x8xf32>
    %cst_145 = arith.constant 5.000000e-01 : f32
    %400 = vector.broadcast %cst_145 : f32 to vector<2x8xf32>
    %401 = arith.addf %399, %400 : vector<2x8xf32>
    %402 = arith.mulf %391, %369 : vector<2x8xf32>
    %403 = arith.mulf %383, %393 : vector<2x8xf32>
    %404 = arith.addf %402, %403 : vector<2x8xf32>
    %405 = math.tanh %404 : vector<2x8xf32>
    %406 = arith.mulf %401, %405 : vector<2x8xf32>
    %c10_146 = arith.constant 10 : index
    %c0_147 = arith.constant 0 : index
    %407 = vector.load %arg7[%c10_146, %c0_147] : memref<16x8xf32, #tpu.memory_space<vmem>>, vector<2x8xf32>
    tpu.vector_store %arg7[%c10_146, %c0_147], %406 {strides = array<i32>} : memref<16x8xf32, #tpu.memory_space<vmem>>, vector<2x8xf32>,
    %408 = vector.extract_strided_slice %298 {offsets = [8, 0], sizes = [2, 32], strides = [1, 1]} : vector<16x32xf32> to vector<2x32xf32>
    %cst_148 = arith.constant dense<0.000000e+00> : vector<2x32xf32>
    %409 = tpu.matmul %406, %300, %cst_148 {dimension_numbers = #tpu.dot_dimension_numbers<[1], [0], [0], [1], [0, 0, 1, 1], [], []>} : vector<2x8xf32>, vector<8x32xf32>, vector<2x32xf32> -> vector<2x32xf32>
    %410 = arith.addf %408, %409 : vector<2x32xf32>
    %411 = vector.extract_strided_slice %410 {offsets = [0, 0], sizes = [2, 8], strides = [1, 1]} : vector<2x32xf32> to vector<2x8xf32>
    %cst_149 = arith.constant 5.000000e-01 : f32
    %412 = vector.broadcast %cst_149 : f32 to vector<2x8xf32>
    %413 = arith.mulf %412, %411 : vector<2x8xf32>
    %414 = math.tanh %413 : vector<2x8xf32>
    %cst_150 = arith.constant 5.000000e-01 : f32
    %415 = vector.broadcast %cst_150 : f32 to vector<2x8xf32>
    %416 = arith.mulf %415, %414 : vector<2x8xf32>
    %cst_151 = arith.constant 5.000000e-01 : f32
    %417 = vector.broadcast %cst_151 : f32 to vector<2x8xf32>
    %418 = arith.addf %416, %417 : vector<2x8xf32>
    %419 = vector.extract_strided_slice %410 {offsets = [0, 8], sizes = [2, 8], strides = [1, 1]} : vector<2x32xf32> to vector<2x8xf32>
    %cst_152 = arith.constant 5.000000e-01 : f32
    %420 = vector.broadcast %cst_152 : f32 to vector<2x8xf32>
    %421 = arith.mulf %420, %419 : vector<2x8xf32>
    %422 = math.tanh %421 : vector<2x8xf32>
    %cst_153 = arith.constant 5.000000e-01 : f32
    %423 = vector.broadcast %cst_153 : f32 to vector<2x8xf32>
    %424 = arith.mulf %423, %422 : vector<2x8xf32>
    %cst_154 = arith.constant 5.000000e-01 : f32
    %425 = vector.broadcast %cst_154 : f32 to vector<2x8xf32>
    %426 = arith.addf %424, %425 : vector<2x8xf32>
    %427 = vector.extract_strided_slice %410 {offsets = [0, 16], sizes = [2, 8], strides = [1, 1]} : vector<2x32xf32> to vector<2x8xf32>
    %428 = math.tanh %427 : vector<2x8xf32>
    %429 = vector.extract_strided_slice %410 {offsets = [0, 24], sizes = [2, 8], strides = [1, 1]} : vector<2x32xf32> to vector<2x8xf32>
    %cst_155 = arith.constant 5.000000e-01 : f32
    %430 = vector.broadcast %cst_155 : f32 to vector<2x8xf32>
    %431 = arith.mulf %430, %429 : vector<2x8xf32>
    %432 = math.tanh %431 : vector<2x8xf32>
    %cst_156 = arith.constant 5.000000e-01 : f32
    %433 = vector.broadcast %cst_156 : f32 to vector<2x8xf32>
    %434 = arith.mulf %433, %432 : vector<2x8xf32>
    %cst_157 = arith.constant 5.000000e-01 : f32
    %435 = vector.broadcast %cst_157 : f32 to vector<2x8xf32>
    %436 = arith.addf %434, %435 : vector<2x8xf32>
    %437 = arith.mulf %426, %404 : vector<2x8xf32>
    %438 = arith.mulf %418, %428 : vector<2x8xf32>
    %439 = arith.addf %437, %438 : vector<2x8xf32>
    %440 = math.tanh %439 : vector<2x8xf32>
    %441 = arith.mulf %436, %440 : vector<2x8xf32>
    %c8_158 = arith.constant 8 : index
    %c0_159 = arith.constant 0 : index
    %442 = vector.load %arg7[%c8_158, %c0_159] : memref<16x8xf32, #tpu.memory_space<vmem>>, vector<2x8xf32>
    tpu.vector_store %arg7[%c8_158, %c0_159], %441 {strides = array<i32>} : memref<16x8xf32, #tpu.memory_space<vmem>>, vector<2x8xf32>,
    %443 = vector.extract_strided_slice %298 {offsets = [6, 0], sizes = [2, 32], strides = [1, 1]} : vector<16x32xf32> to vector<2x32xf32>
    %cst_160 = arith.constant dense<0.000000e+00> : vector<2x32xf32>
    %444 = tpu.matmul %441, %300, %cst_160 {dimension_numbers = #tpu.dot_dimension_numbers<[1], [0], [0], [1], [0, 0, 1, 1], [], []>} : vector<2x8xf32>, vector<8x32xf32>, vector<2x32xf32> -> vector<2x32xf32>
    %445 = arith.addf %443, %444 : vector<2x32xf32>
    %446 = vector.extract_strided_slice %445 {offsets = [0, 0], sizes = [2, 8], strides = [1, 1]} : vector<2x32xf32> to vector<2x8xf32>
    %cst_161 = arith.constant 5.000000e-01 : f32
    %447 = vector.broadcast %cst_161 : f32 to vector<2x8xf32>
    %448 = arith.mulf %447, %446 : vector<2x8xf32>
    %449 = math.tanh %448 : vector<2x8xf32>
    %cst_162 = arith.constant 5.000000e-01 : f32
    %450 = vector.broadcast %cst_162 : f32 to vector<2x8xf32>
    %451 = arith.mulf %450, %449 : vector<2x8xf32>
    %cst_163 = arith.constant 5.000000e-01 : f32
    %452 = vector.broadcast %cst_163 : f32 to vector<2x8xf32>
    %453 = arith.addf %451, %452 : vector<2x8xf32>
    %454 = vector.extract_strided_slice %445 {offsets = [0, 8], sizes = [2, 8], strides = [1, 1]} : vector<2x32xf32> to vector<2x8xf32>
    %cst_164 = arith.constant 5.000000e-01 : f32
    %455 = vector.broadcast %cst_164 : f32 to vector<2x8xf32>
    %456 = arith.mulf %455, %454 : vector<2x8xf32>
    %457 = math.tanh %456 : vector<2x8xf32>
    %cst_165 = arith.constant 5.000000e-01 : f32
    %458 = vector.broadcast %cst_165 : f32 to vector<2x8xf32>
    %459 = arith.mulf %458, %457 : vector<2x8xf32>
    %cst_166 = arith.constant 5.000000e-01 : f32
    %460 = vector.broadcast %cst_166 : f32 to vector<2x8xf32>
    %461 = arith.addf %459, %460 : vector<2x8xf32>
    %462 = vector.extract_strided_slice %445 {offsets = [0, 16], sizes = [2, 8], strides = [1, 1]} : vector<2x32xf32> to vector<2x8xf32>
    %463 = math.tanh %462 : vector<2x8xf32>
    %464 = vector.extract_strided_slice %445 {offsets = [0, 24], sizes = [2, 8], strides = [1, 1]} : vector<2x32xf32> to vector<2x8xf32>
    %cst_167 = arith.constant 5.000000e-01 : f32
    %465 = vector.broadcast %cst_167 : f32 to vector<2x8xf32>
    %466 = arith.mulf %465, %464 : vector<2x8xf32>
    %467 = math.tanh %466 : vector<2x8xf32>
    %cst_168 = arith.constant 5.000000e-01 : f32
    %468 = vector.broadcast %cst_168 : f32 to vector<2x8xf32>
    %469 = arith.mulf %468, %467 : vector<2x8xf32>
    %cst_169 = arith.constant 5.000000e-01 : f32
    %470 = vector.broadcast %cst_169 : f32 to vector<2x8xf32>
    %471 = arith.addf %469, %470 : vector<2x8xf32>
    %472 = arith.mulf %461, %439 : vector<2x8xf32>
    %473 = arith.mulf %453, %463 : vector<2x8xf32>
    %474 = arith.addf %472, %473 : vector<2x8xf32>
    %475 = math.tanh %474 : vector<2x8xf32>
    %476 = arith.mulf %471, %475 : vector<2x8xf32>
    %c6_170 = arith.constant 6 : index
    %c0_171 = arith.constant 0 : index
    %477 = vector.load %arg7[%c6_170, %c0_171] : memref<16x8xf32, #tpu.memory_space<vmem>>, vector<2x8xf32>
    tpu.vector_store %arg7[%c6_170, %c0_171], %476 {strides = array<i32>} : memref<16x8xf32, #tpu.memory_space<vmem>>, vector<2x8xf32>,
    %478 = vector.extract_strided_slice %298 {offsets = [4, 0], sizes = [2, 32], strides = [1, 1]} : vector<16x32xf32> to vector<2x32xf32>
    %cst_172 = arith.constant dense<0.000000e+00> : vector<2x32xf32>
    %479 = tpu.matmul %476, %300, %cst_172 {dimension_numbers = #tpu.dot_dimension_numbers<[1], [0], [0], [1], [0, 0, 1, 1], [], []>} : vector<2x8xf32>, vector<8x32xf32>, vector<2x32xf32> -> vector<2x32xf32>
    %480 = arith.addf %478, %479 : vector<2x32xf32>
    %481 = vector.extract_strided_slice %480 {offsets = [0, 0], sizes = [2, 8], strides = [1, 1]} : vector<2x32xf32> to vector<2x8xf32>
    %cst_173 = arith.constant 5.000000e-01 : f32
    %482 = vector.broadcast %cst_173 : f32 to vector<2x8xf32>
    %483 = arith.mulf %482, %481 : vector<2x8xf32>
    %484 = math.tanh %483 : vector<2x8xf32>
    %cst_174 = arith.constant 5.000000e-01 : f32
    %485 = vector.broadcast %cst_174 : f32 to vector<2x8xf32>
    %486 = arith.mulf %485, %484 : vector<2x8xf32>
    %cst_175 = arith.constant 5.000000e-01 : f32
    %487 = vector.broadcast %cst_175 : f32 to vector<2x8xf32>
    %488 = arith.addf %486, %487 : vector<2x8xf32>
    %489 = vector.extract_strided_slice %480 {offsets = [0, 8], sizes = [2, 8], strides = [1, 1]} : vector<2x32xf32> to vector<2x8xf32>
    %cst_176 = arith.constant 5.000000e-01 : f32
    %490 = vector.broadcast %cst_176 : f32 to vector<2x8xf32>
    %491 = arith.mulf %490, %489 : vector<2x8xf32>
    %492 = math.tanh %491 : vector<2x8xf32>
    %cst_177 = arith.constant 5.000000e-01 : f32
    %493 = vector.broadcast %cst_177 : f32 to vector<2x8xf32>
    %494 = arith.mulf %493, %492 : vector<2x8xf32>
    %cst_178 = arith.constant 5.000000e-01 : f32
    %495 = vector.broadcast %cst_178 : f32 to vector<2x8xf32>
    %496 = arith.addf %494, %495 : vector<2x8xf32>
    %497 = vector.extract_strided_slice %480 {offsets = [0, 16], sizes = [2, 8], strides = [1, 1]} : vector<2x32xf32> to vector<2x8xf32>
    %498 = math.tanh %497 : vector<2x8xf32>
    %499 = vector.extract_strided_slice %480 {offsets = [0, 24], sizes = [2, 8], strides = [1, 1]} : vector<2x32xf32> to vector<2x8xf32>
    %cst_179 = arith.constant 5.000000e-01 : f32
    %500 = vector.broadcast %cst_179 : f32 to vector<2x8xf32>
    %501 = arith.mulf %500, %499 : vector<2x8xf32>
    %502 = math.tanh %501 : vector<2x8xf32>
    %cst_180 = arith.constant 5.000000e-01 : f32
    %503 = vector.broadcast %cst_180 : f32 to vector<2x8xf32>
    %504 = arith.mulf %503, %502 : vector<2x8xf32>
    %cst_181 = arith.constant 5.000000e-01 : f32
    %505 = vector.broadcast %cst_181 : f32 to vector<2x8xf32>
    %506 = arith.addf %504, %505 : vector<2x8xf32>
    %507 = arith.mulf %496, %474 : vector<2x8xf32>
    %508 = arith.mulf %488, %498 : vector<2x8xf32>
    %509 = arith.addf %507, %508 : vector<2x8xf32>
    %510 = math.tanh %509 : vector<2x8xf32>
    %511 = arith.mulf %506, %510 : vector<2x8xf32>
    %c4_182 = arith.constant 4 : index
    %c0_183 = arith.constant 0 : index
    %512 = vector.load %arg7[%c4_182, %c0_183] : memref<16x8xf32, #tpu.memory_space<vmem>>, vector<2x8xf32>
    tpu.vector_store %arg7[%c4_182, %c0_183], %511 {strides = array<i32>} : memref<16x8xf32, #tpu.memory_space<vmem>>, vector<2x8xf32>,
    %513 = vector.extract_strided_slice %298 {offsets = [2, 0], sizes = [2, 32], strides = [1, 1]} : vector<16x32xf32> to vector<2x32xf32>
    %cst_184 = arith.constant dense<0.000000e+00> : vector<2x32xf32>
    %514 = tpu.matmul %511, %300, %cst_184 {dimension_numbers = #tpu.dot_dimension_numbers<[1], [0], [0], [1], [0, 0, 1, 1], [], []>} : vector<2x8xf32>, vector<8x32xf32>, vector<2x32xf32> -> vector<2x32xf32>
    %515 = arith.addf %513, %514 : vector<2x32xf32>
    %516 = vector.extract_strided_slice %515 {offsets = [0, 0], sizes = [2, 8], strides = [1, 1]} : vector<2x32xf32> to vector<2x8xf32>
    %cst_185 = arith.constant 5.000000e-01 : f32
    %517 = vector.broadcast %cst_185 : f32 to vector<2x8xf32>
    %518 = arith.mulf %517, %516 : vector<2x8xf32>
    %519 = math.tanh %518 : vector<2x8xf32>
    %cst_186 = arith.constant 5.000000e-01 : f32
    %520 = vector.broadcast %cst_186 : f32 to vector<2x8xf32>
    %521 = arith.mulf %520, %519 : vector<2x8xf32>
    %cst_187 = arith.constant 5.000000e-01 : f32
    %522 = vector.broadcast %cst_187 : f32 to vector<2x8xf32>
    %523 = arith.addf %521, %522 : vector<2x8xf32>
    %524 = vector.extract_strided_slice %515 {offsets = [0, 8], sizes = [2, 8], strides = [1, 1]} : vector<2x32xf32> to vector<2x8xf32>
    %cst_188 = arith.constant 5.000000e-01 : f32
    %525 = vector.broadcast %cst_188 : f32 to vector<2x8xf32>
    %526 = arith.mulf %525, %524 : vector<2x8xf32>
    %527 = math.tanh %526 : vector<2x8xf32>
    %cst_189 = arith.constant 5.000000e-01 : f32
    %528 = vector.broadcast %cst_189 : f32 to vector<2x8xf32>
    %529 = arith.mulf %528, %527 : vector<2x8xf32>
    %cst_190 = arith.constant 5.000000e-01 : f32
    %530 = vector.broadcast %cst_190 : f32 to vector<2x8xf32>
    %531 = arith.addf %529, %530 : vector<2x8xf32>
    %532 = vector.extract_strided_slice %515 {offsets = [0, 16], sizes = [2, 8], strides = [1, 1]} : vector<2x32xf32> to vector<2x8xf32>
    %533 = math.tanh %532 : vector<2x8xf32>
    %534 = vector.extract_strided_slice %515 {offsets = [0, 24], sizes = [2, 8], strides = [1, 1]} : vector<2x32xf32> to vector<2x8xf32>
    %cst_191 = arith.constant 5.000000e-01 : f32
    %535 = vector.broadcast %cst_191 : f32 to vector<2x8xf32>
    %536 = arith.mulf %535, %534 : vector<2x8xf32>
    %537 = math.tanh %536 : vector<2x8xf32>
    %cst_192 = arith.constant 5.000000e-01 : f32
    %538 = vector.broadcast %cst_192 : f32 to vector<2x8xf32>
    %539 = arith.mulf %538, %537 : vector<2x8xf32>
    %cst_193 = arith.constant 5.000000e-01 : f32
    %540 = vector.broadcast %cst_193 : f32 to vector<2x8xf32>
    %541 = arith.addf %539, %540 : vector<2x8xf32>
    %542 = arith.mulf %531, %509 : vector<2x8xf32>
    %543 = arith.mulf %523, %533 : vector<2x8xf32>
    %544 = arith.addf %542, %543 : vector<2x8xf32>
    %545 = math.tanh %544 : vector<2x8xf32>
    %546 = arith.mulf %541, %545 : vector<2x8xf32>
    %c2_194 = arith.constant 2 : index
    %c0_195 = arith.constant 0 : index
    %547 = vector.load %arg7[%c2_194, %c0_195] : memref<16x8xf32, #tpu.memory_space<vmem>>, vector<2x8xf32>
    tpu.vector_store %arg7[%c2_194, %c0_195], %546 {strides = array<i32>} : memref<16x8xf32, #tpu.memory_space<vmem>>, vector<2x8xf32>,
    %548 = vector.extract_strided_slice %298 {offsets = [0, 0], sizes = [2, 32], strides = [1, 1]} : vector<16x32xf32> to vector<2x32xf32>
    %cst_196 = arith.constant dense<0.000000e+00> : vector<2x32xf32>
    %549 = tpu.matmul %546, %300, %cst_196 {dimension_numbers = #tpu.dot_dimension_numbers<[1], [0], [0], [1], [0, 0, 1, 1], [], []>} : vector<2x8xf32>, vector<8x32xf32>, vector<2x32xf32> -> vector<2x32xf32>
    %550 = arith.addf %548, %549 : vector<2x32xf32>
    %551 = vector.extract_strided_slice %550 {offsets = [0, 0], sizes = [2, 8], strides = [1, 1]} : vector<2x32xf32> to vector<2x8xf32>
    %cst_197 = arith.constant 5.000000e-01 : f32
    %552 = vector.broadcast %cst_197 : f32 to vector<2x8xf32>
    %553 = arith.mulf %552, %551 : vector<2x8xf32>
    %554 = math.tanh %553 : vector<2x8xf32>
    %cst_198 = arith.constant 5.000000e-01 : f32
    %555 = vector.broadcast %cst_198 : f32 to vector<2x8xf32>
    %556 = arith.mulf %555, %554 : vector<2x8xf32>
    %cst_199 = arith.constant 5.000000e-01 : f32
    %557 = vector.broadcast %cst_199 : f32 to vector<2x8xf32>
    %558 = arith.addf %556, %557 : vector<2x8xf32>
    %559 = vector.extract_strided_slice %550 {offsets = [0, 8], sizes = [2, 8], strides = [1, 1]} : vector<2x32xf32> to vector<2x8xf32>
    %cst_200 = arith.constant 5.000000e-01 : f32
    %560 = vector.broadcast %cst_200 : f32 to vector<2x8xf32>
    %561 = arith.mulf %560, %559 : vector<2x8xf32>
    %562 = math.tanh %561 : vector<2x8xf32>
    %cst_201 = arith.constant 5.000000e-01 : f32
    %563 = vector.broadcast %cst_201 : f32 to vector<2x8xf32>
    %564 = arith.mulf %563, %562 : vector<2x8xf32>
    %cst_202 = arith.constant 5.000000e-01 : f32
    %565 = vector.broadcast %cst_202 : f32 to vector<2x8xf32>
    %566 = arith.addf %564, %565 : vector<2x8xf32>
    %567 = vector.extract_strided_slice %550 {offsets = [0, 16], sizes = [2, 8], strides = [1, 1]} : vector<2x32xf32> to vector<2x8xf32>
    %568 = math.tanh %567 : vector<2x8xf32>
    %569 = vector.extract_strided_slice %550 {offsets = [0, 24], sizes = [2, 8], strides = [1, 1]} : vector<2x32xf32> to vector<2x8xf32>
    %cst_203 = arith.constant 5.000000e-01 : f32
    %570 = vector.broadcast %cst_203 : f32 to vector<2x8xf32>
    %571 = arith.mulf %570, %569 : vector<2x8xf32>
    %572 = math.tanh %571 : vector<2x8xf32>
    %cst_204 = arith.constant 5.000000e-01 : f32
    %573 = vector.broadcast %cst_204 : f32 to vector<2x8xf32>
    %574 = arith.mulf %573, %572 : vector<2x8xf32>
    %cst_205 = arith.constant 5.000000e-01 : f32
    %575 = vector.broadcast %cst_205 : f32 to vector<2x8xf32>
    %576 = arith.addf %574, %575 : vector<2x8xf32>
    %577 = arith.mulf %566, %544 : vector<2x8xf32>
    %578 = arith.mulf %558, %568 : vector<2x8xf32>
    %579 = arith.addf %577, %578 : vector<2x8xf32>
    %580 = math.tanh %579 : vector<2x8xf32>
    %581 = arith.mulf %576, %580 : vector<2x8xf32>
    %c0_206 = arith.constant 0 : index
    %c0_207 = arith.constant 0 : index
    %582 = vector.load %arg7[%c0_206, %c0_207] : memref<16x8xf32, #tpu.memory_space<vmem>>, vector<2x8xf32>
    tpu.vector_store %arg7[%c0_206, %c0_207], %581 {strides = array<i32>} : memref<16x8xf32, #tpu.memory_space<vmem>>, vector<2x8xf32>,
    %c0_208 = arith.constant 0 : index
    %c0_209 = arith.constant 0 : index
    %583 = vector.load %arg6[%c0_208, %c0_209] : memref<16x8xf32, #tpu.memory_space<vmem>>, vector<16x8xf32>
    %c0_210 = arith.constant 0 : index
    %c0_211 = arith.constant 0 : index
    %584 = vector.load %arg7[%c0_210, %c0_211] : memref<16x8xf32, #tpu.memory_space<vmem>>, vector<16x8xf32>
    %585 = tpu.concatenate %583, %584 in 1 : vector<16x8xf32>, vector<16x8xf32> -> vector<16x16xf32>
    %c2_212 = arith.constant 2 : index
    %c0_213 = arith.constant 0 : index
    %c0_214 = arith.constant 0 : index
    %586 = vector.load %arg2[%c2_212, %c0_213, %c0_214] : memref<4x16x32xf32, #tpu.memory_space<vmem>>, vector<1x16x32xf32>
    %587 = vector.shape_cast %586 : vector<1x16x32xf32> to vector<16x32xf32>
    %cst_215 = arith.constant dense<0.000000e+00> : vector<16x32xf32>
    %588 = tpu.matmul %585, %587, %cst_215 {dimension_numbers = #tpu.dot_dimension_numbers<[1], [0], [0], [1], [0, 0, 1, 1], [], []>} : vector<16x16xf32>, vector<16x32xf32>, vector<16x32xf32> -> vector<16x32xf32>
    %c2_216 = arith.constant 2 : index
    %c0_217 = arith.constant 0 : index
    %c0_218 = arith.constant 0 : index
    %589 = vector.load %arg4[%c2_216, %c0_217, %c0_218] : memref<4x1x32xf32, #tpu.memory_space<vmem>>, vector<1x1x32xf32>
    %590 = vector.shape_cast %589 : vector<1x1x32xf32> to vector<1x32xf32>
    %591 = vector.broadcast %590 : vector<1x32xf32> to vector<16x32xf32>
    %592 = arith.addf %588, %591 : vector<16x32xf32>
    %c2_219 = arith.constant 2 : index
    %c0_220 = arith.constant 0 : index
    %c0_221 = arith.constant 0 : index
    %593 = vector.load %arg3[%c2_219, %c0_220, %c0_221] : memref<4x8x32xf32, #tpu.memory_space<vmem>>, vector<1x8x32xf32>
    %594 = vector.shape_cast %593 : vector<1x8x32xf32> to vector<8x32xf32>
    %cst_222 = arith.constant 0.000000e+00 : f32
    %595 = vector.broadcast %cst_222 : f32 to vector<2x8xf32>
    %cst_223 = arith.constant 0.000000e+00 : f32
    %596 = vector.broadcast %cst_223 : f32 to vector<2x8xf32>
    %597 = vector.extract_strided_slice %592 {offsets = [0, 0], sizes = [2, 32], strides = [1, 1]} : vector<16x32xf32> to vector<2x32xf32>
    %cst_224 = arith.constant dense<0.000000e+00> : vector<2x32xf32>
    %598 = tpu.matmul %595, %594, %cst_224 {dimension_numbers = #tpu.dot_dimension_numbers<[1], [0], [0], [1], [0, 0, 1, 1], [], []>} : vector<2x8xf32>, vector<8x32xf32>, vector<2x32xf32> -> vector<2x32xf32>
    %599 = arith.addf %597, %598 : vector<2x32xf32>
    %600 = vector.extract_strided_slice %599 {offsets = [0, 0], sizes = [2, 8], strides = [1, 1]} : vector<2x32xf32> to vector<2x8xf32>
    %cst_225 = arith.constant 5.000000e-01 : f32
    %601 = vector.broadcast %cst_225 : f32 to vector<2x8xf32>
    %602 = arith.mulf %601, %600 : vector<2x8xf32>
    %603 = math.tanh %602 : vector<2x8xf32>
    %cst_226 = arith.constant 5.000000e-01 : f32
    %604 = vector.broadcast %cst_226 : f32 to vector<2x8xf32>
    %605 = arith.mulf %604, %603 : vector<2x8xf32>
    %cst_227 = arith.constant 5.000000e-01 : f32
    %606 = vector.broadcast %cst_227 : f32 to vector<2x8xf32>
    %607 = arith.addf %605, %606 : vector<2x8xf32>
    %608 = vector.extract_strided_slice %599 {offsets = [0, 8], sizes = [2, 8], strides = [1, 1]} : vector<2x32xf32> to vector<2x8xf32>
    %cst_228 = arith.constant 5.000000e-01 : f32
    %609 = vector.broadcast %cst_228 : f32 to vector<2x8xf32>
    %610 = arith.mulf %609, %608 : vector<2x8xf32>
    %611 = math.tanh %610 : vector<2x8xf32>
    %cst_229 = arith.constant 5.000000e-01 : f32
    %612 = vector.broadcast %cst_229 : f32 to vector<2x8xf32>
    %613 = arith.mulf %612, %611 : vector<2x8xf32>
    %cst_230 = arith.constant 5.000000e-01 : f32
    %614 = vector.broadcast %cst_230 : f32 to vector<2x8xf32>
    %615 = arith.addf %613, %614 : vector<2x8xf32>
    %616 = vector.extract_strided_slice %599 {offsets = [0, 16], sizes = [2, 8], strides = [1, 1]} : vector<2x32xf32> to vector<2x8xf32>
    %617 = math.tanh %616 : vector<2x8xf32>
    %618 = vector.extract_strided_slice %599 {offsets = [0, 24], sizes = [2, 8], strides = [1, 1]} : vector<2x32xf32> to vector<2x8xf32>
    %cst_231 = arith.constant 5.000000e-01 : f32
    %619 = vector.broadcast %cst_231 : f32 to vector<2x8xf32>
    %620 = arith.mulf %619, %618 : vector<2x8xf32>
    %621 = math.tanh %620 : vector<2x8xf32>
    %cst_232 = arith.constant 5.000000e-01 : f32
    %622 = vector.broadcast %cst_232 : f32 to vector<2x8xf32>
    %623 = arith.mulf %622, %621 : vector<2x8xf32>
    %cst_233 = arith.constant 5.000000e-01 : f32
    %624 = vector.broadcast %cst_233 : f32 to vector<2x8xf32>
    %625 = arith.addf %623, %624 : vector<2x8xf32>
    %626 = arith.mulf %615, %596 : vector<2x8xf32>
    %627 = arith.mulf %607, %617 : vector<2x8xf32>
    %628 = arith.addf %626, %627 : vector<2x8xf32>
    %629 = math.tanh %628 : vector<2x8xf32>
    %630 = arith.mulf %625, %629 : vector<2x8xf32>
    %c0_234 = arith.constant 0 : index
    %c0_235 = arith.constant 0 : index
    %631 = vector.load %arg8[%c0_234, %c0_235] : memref<16x8xf32, #tpu.memory_space<vmem>>, vector<2x8xf32>
    tpu.vector_store %arg8[%c0_234, %c0_235], %630 {strides = array<i32>} : memref<16x8xf32, #tpu.memory_space<vmem>>, vector<2x8xf32>,
    %632 = vector.extract_strided_slice %592 {offsets = [2, 0], sizes = [2, 32], strides = [1, 1]} : vector<16x32xf32> to vector<2x32xf32>
    %cst_236 = arith.constant dense<0.000000e+00> : vector<2x32xf32>
    %633 = tpu.matmul %630, %594, %cst_236 {dimension_numbers = #tpu.dot_dimension_numbers<[1], [0], [0], [1], [0, 0, 1, 1], [], []>} : vector<2x8xf32>, vector<8x32xf32>, vector<2x32xf32> -> vector<2x32xf32>
    %634 = arith.addf %632, %633 : vector<2x32xf32>
    %635 = vector.extract_strided_slice %634 {offsets = [0, 0], sizes = [2, 8], strides = [1, 1]} : vector<2x32xf32> to vector<2x8xf32>
    %cst_237 = arith.constant 5.000000e-01 : f32
    %636 = vector.broadcast %cst_237 : f32 to vector<2x8xf32>
    %637 = arith.mulf %636, %635 : vector<2x8xf32>
    %638 = math.tanh %637 : vector<2x8xf32>
    %cst_238 = arith.constant 5.000000e-01 : f32
    %639 = vector.broadcast %cst_238 : f32 to vector<2x8xf32>
    %640 = arith.mulf %639, %638 : vector<2x8xf32>
    %cst_239 = arith.constant 5.000000e-01 : f32
    %641 = vector.broadcast %cst_239 : f32 to vector<2x8xf32>
    %642 = arith.addf %640, %641 : vector<2x8xf32>
    %643 = vector.extract_strided_slice %634 {offsets = [0, 8], sizes = [2, 8], strides = [1, 1]} : vector<2x32xf32> to vector<2x8xf32>
    %cst_240 = arith.constant 5.000000e-01 : f32
    %644 = vector.broadcast %cst_240 : f32 to vector<2x8xf32>
    %645 = arith.mulf %644, %643 : vector<2x8xf32>
    %646 = math.tanh %645 : vector<2x8xf32>
    %cst_241 = arith.constant 5.000000e-01 : f32
    %647 = vector.broadcast %cst_241 : f32 to vector<2x8xf32>
    %648 = arith.mulf %647, %646 : vector<2x8xf32>
    %cst_242 = arith.constant 5.000000e-01 : f32
    %649 = vector.broadcast %cst_242 : f32 to vector<2x8xf32>
    %650 = arith.addf %648, %649 : vector<2x8xf32>
    %651 = vector.extract_strided_slice %634 {offsets = [0, 16], sizes = [2, 8], strides = [1, 1]} : vector<2x32xf32> to vector<2x8xf32>
    %652 = math.tanh %651 : vector<2x8xf32>
    %653 = vector.extract_strided_slice %634 {offsets = [0, 24], sizes = [2, 8], strides = [1, 1]} : vector<2x32xf32> to vector<2x8xf32>
    %cst_243 = arith.constant 5.000000e-01 : f32
    %654 = vector.broadcast %cst_243 : f32 to vector<2x8xf32>
    %655 = arith.mulf %654, %653 : vector<2x8xf32>
    %656 = math.tanh %655 : vector<2x8xf32>
    %cst_244 = arith.constant 5.000000e-01 : f32
    %657 = vector.broadcast %cst_244 : f32 to vector<2x8xf32>
    %658 = arith.mulf %657, %656 : vector<2x8xf32>
    %cst_245 = arith.constant 5.000000e-01 : f32
    %659 = vector.broadcast %cst_245 : f32 to vector<2x8xf32>
    %660 = arith.addf %658, %659 : vector<2x8xf32>
    %661 = arith.mulf %650, %628 : vector<2x8xf32>
    %662 = arith.mulf %642, %652 : vector<2x8xf32>
    %663 = arith.addf %661, %662 : vector<2x8xf32>
    %664 = math.tanh %663 : vector<2x8xf32>
    %665 = arith.mulf %660, %664 : vector<2x8xf32>
    %c2_246 = arith.constant 2 : index
    %c0_247 = arith.constant 0 : index
    %666 = vector.load %arg8[%c2_246, %c0_247] : memref<16x8xf32, #tpu.memory_space<vmem>>, vector<2x8xf32>
    tpu.vector_store %arg8[%c2_246, %c0_247], %665 {strides = array<i32>} : memref<16x8xf32, #tpu.memory_space<vmem>>, vector<2x8xf32>,
    %667 = vector.extract_strided_slice %592 {offsets = [4, 0], sizes = [2, 32], strides = [1, 1]} : vector<16x32xf32> to vector<2x32xf32>
    %cst_248 = arith.constant dense<0.000000e+00> : vector<2x32xf32>
    %668 = tpu.matmul %665, %594, %cst_248 {dimension_numbers = #tpu.dot_dimension_numbers<[1], [0], [0], [1], [0, 0, 1, 1], [], []>} : vector<2x8xf32>, vector<8x32xf32>, vector<2x32xf32> -> vector<2x32xf32>
    %669 = arith.addf %667, %668 : vector<2x32xf32>
    %670 = vector.extract_strided_slice %669 {offsets = [0, 0], sizes = [2, 8], strides = [1, 1]} : vector<2x32xf32> to vector<2x8xf32>
    %cst_249 = arith.constant 5.000000e-01 : f32
    %671 = vector.broadcast %cst_249 : f32 to vector<2x8xf32>
    %672 = arith.mulf %671, %670 : vector<2x8xf32>
    %673 = math.tanh %672 : vector<2x8xf32>
    %cst_250 = arith.constant 5.000000e-01 : f32
    %674 = vector.broadcast %cst_250 : f32 to vector<2x8xf32>
    %675 = arith.mulf %674, %673 : vector<2x8xf32>
    %cst_251 = arith.constant 5.000000e-01 : f32
    %676 = vector.broadcast %cst_251 : f32 to vector<2x8xf32>
    %677 = arith.addf %675, %676 : vector<2x8xf32>
    %678 = vector.extract_strided_slice %669 {offsets = [0, 8], sizes = [2, 8], strides = [1, 1]} : vector<2x32xf32> to vector<2x8xf32>
    %cst_252 = arith.constant 5.000000e-01 : f32
    %679 = vector.broadcast %cst_252 : f32 to vector<2x8xf32>
    %680 = arith.mulf %679, %678 : vector<2x8xf32>
    %681 = math.tanh %680 : vector<2x8xf32>
    %cst_253 = arith.constant 5.000000e-01 : f32
    %682 = vector.broadcast %cst_253 : f32 to vector<2x8xf32>
    %683 = arith.mulf %682, %681 : vector<2x8xf32>
    %cst_254 = arith.constant 5.000000e-01 : f32
    %684 = vector.broadcast %cst_254 : f32 to vector<2x8xf32>
    %685 = arith.addf %683, %684 : vector<2x8xf32>
    %686 = vector.extract_strided_slice %669 {offsets = [0, 16], sizes = [2, 8], strides = [1, 1]} : vector<2x32xf32> to vector<2x8xf32>
    %687 = math.tanh %686 : vector<2x8xf32>
    %688 = vector.extract_strided_slice %669 {offsets = [0, 24], sizes = [2, 8], strides = [1, 1]} : vector<2x32xf32> to vector<2x8xf32>
    %cst_255 = arith.constant 5.000000e-01 : f32
    %689 = vector.broadcast %cst_255 : f32 to vector<2x8xf32>
    %690 = arith.mulf %689, %688 : vector<2x8xf32>
    %691 = math.tanh %690 : vector<2x8xf32>
    %cst_256 = arith.constant 5.000000e-01 : f32
    %692 = vector.broadcast %cst_256 : f32 to vector<2x8xf32>
    %693 = arith.mulf %692, %691 : vector<2x8xf32>
    %cst_257 = arith.constant 5.000000e-01 : f32
    %694 = vector.broadcast %cst_257 : f32 to vector<2x8xf32>
    %695 = arith.addf %693, %694 : vector<2x8xf32>
    %696 = arith.mulf %685, %663 : vector<2x8xf32>
    %697 = arith.mulf %677, %687 : vector<2x8xf32>
    %698 = arith.addf %696, %697 : vector<2x8xf32>
    %699 = math.tanh %698 : vector<2x8xf32>
    %700 = arith.mulf %695, %699 : vector<2x8xf32>
    %c4_258 = arith.constant 4 : index
    %c0_259 = arith.constant 0 : index
    %701 = vector.load %arg8[%c4_258, %c0_259] : memref<16x8xf32, #tpu.memory_space<vmem>>, vector<2x8xf32>
    tpu.vector_store %arg8[%c4_258, %c0_259], %700 {strides = array<i32>} : memref<16x8xf32, #tpu.memory_space<vmem>>, vector<2x8xf32>,
    %702 = vector.extract_strided_slice %592 {offsets = [6, 0], sizes = [2, 32], strides = [1, 1]} : vector<16x32xf32> to vector<2x32xf32>
    %cst_260 = arith.constant dense<0.000000e+00> : vector<2x32xf32>
    %703 = tpu.matmul %700, %594, %cst_260 {dimension_numbers = #tpu.dot_dimension_numbers<[1], [0], [0], [1], [0, 0, 1, 1], [], []>} : vector<2x8xf32>, vector<8x32xf32>, vector<2x32xf32> -> vector<2x32xf32>
    %704 = arith.addf %702, %703 : vector<2x32xf32>
    %705 = vector.extract_strided_slice %704 {offsets = [0, 0], sizes = [2, 8], strides = [1, 1]} : vector<2x32xf32> to vector<2x8xf32>
    %cst_261 = arith.constant 5.000000e-01 : f32
    %706 = vector.broadcast %cst_261 : f32 to vector<2x8xf32>
    %707 = arith.mulf %706, %705 : vector<2x8xf32>
    %708 = math.tanh %707 : vector<2x8xf32>
    %cst_262 = arith.constant 5.000000e-01 : f32
    %709 = vector.broadcast %cst_262 : f32 to vector<2x8xf32>
    %710 = arith.mulf %709, %708 : vector<2x8xf32>
    %cst_263 = arith.constant 5.000000e-01 : f32
    %711 = vector.broadcast %cst_263 : f32 to vector<2x8xf32>
    %712 = arith.addf %710, %711 : vector<2x8xf32>
    %713 = vector.extract_strided_slice %704 {offsets = [0, 8], sizes = [2, 8], strides = [1, 1]} : vector<2x32xf32> to vector<2x8xf32>
    %cst_264 = arith.constant 5.000000e-01 : f32
    %714 = vector.broadcast %cst_264 : f32 to vector<2x8xf32>
    %715 = arith.mulf %714, %713 : vector<2x8xf32>
    %716 = math.tanh %715 : vector<2x8xf32>
    %cst_265 = arith.constant 5.000000e-01 : f32
    %717 = vector.broadcast %cst_265 : f32 to vector<2x8xf32>
    %718 = arith.mulf %717, %716 : vector<2x8xf32>
    %cst_266 = arith.constant 5.000000e-01 : f32
    %719 = vector.broadcast %cst_266 : f32 to vector<2x8xf32>
    %720 = arith.addf %718, %719 : vector<2x8xf32>
    %721 = vector.extract_strided_slice %704 {offsets = [0, 16], sizes = [2, 8], strides = [1, 1]} : vector<2x32xf32> to vector<2x8xf32>
    %722 = math.tanh %721 : vector<2x8xf32>
    %723 = vector.extract_strided_slice %704 {offsets = [0, 24], sizes = [2, 8], strides = [1, 1]} : vector<2x32xf32> to vector<2x8xf32>
    %cst_267 = arith.constant 5.000000e-01 : f32
    %724 = vector.broadcast %cst_267 : f32 to vector<2x8xf32>
    %725 = arith.mulf %724, %723 : vector<2x8xf32>
    %726 = math.tanh %725 : vector<2x8xf32>
    %cst_268 = arith.constant 5.000000e-01 : f32
    %727 = vector.broadcast %cst_268 : f32 to vector<2x8xf32>
    %728 = arith.mulf %727, %726 : vector<2x8xf32>
    %cst_269 = arith.constant 5.000000e-01 : f32
    %729 = vector.broadcast %cst_269 : f32 to vector<2x8xf32>
    %730 = arith.addf %728, %729 : vector<2x8xf32>
    %731 = arith.mulf %720, %698 : vector<2x8xf32>
    %732 = arith.mulf %712, %722 : vector<2x8xf32>
    %733 = arith.addf %731, %732 : vector<2x8xf32>
    %734 = math.tanh %733 : vector<2x8xf32>
    %735 = arith.mulf %730, %734 : vector<2x8xf32>
    %c6_270 = arith.constant 6 : index
    %c0_271 = arith.constant 0 : index
    %736 = vector.load %arg8[%c6_270, %c0_271] : memref<16x8xf32, #tpu.memory_space<vmem>>, vector<2x8xf32>
    tpu.vector_store %arg8[%c6_270, %c0_271], %735 {strides = array<i32>} : memref<16x8xf32, #tpu.memory_space<vmem>>, vector<2x8xf32>,
    %737 = vector.extract_strided_slice %592 {offsets = [8, 0], sizes = [2, 32], strides = [1, 1]} : vector<16x32xf32> to vector<2x32xf32>
    %cst_272 = arith.constant dense<0.000000e+00> : vector<2x32xf32>
    %738 = tpu.matmul %735, %594, %cst_272 {dimension_numbers = #tpu.dot_dimension_numbers<[1], [0], [0], [1], [0, 0, 1, 1], [], []>} : vector<2x8xf32>, vector<8x32xf32>, vector<2x32xf32> -> vector<2x32xf32>
    %739 = arith.addf %737, %738 : vector<2x32xf32>
    %740 = vector.extract_strided_slice %739 {offsets = [0, 0], sizes = [2, 8], strides = [1, 1]} : vector<2x32xf32> to vector<2x8xf32>
    %cst_273 = arith.constant 5.000000e-01 : f32
    %741 = vector.broadcast %cst_273 : f32 to vector<2x8xf32>
    %742 = arith.mulf %741, %740 : vector<2x8xf32>
    %743 = math.tanh %742 : vector<2x8xf32>
    %cst_274 = arith.constant 5.000000e-01 : f32
    %744 = vector.broadcast %cst_274 : f32 to vector<2x8xf32>
    %745 = arith.mulf %744, %743 : vector<2x8xf32>
    %cst_275 = arith.constant 5.000000e-01 : f32
    %746 = vector.broadcast %cst_275 : f32 to vector<2x8xf32>
    %747 = arith.addf %745, %746 : vector<2x8xf32>
    %748 = vector.extract_strided_slice %739 {offsets = [0, 8], sizes = [2, 8], strides = [1, 1]} : vector<2x32xf32> to vector<2x8xf32>
    %cst_276 = arith.constant 5.000000e-01 : f32
    %749 = vector.broadcast %cst_276 : f32 to vector<2x8xf32>
    %750 = arith.mulf %749, %748 : vector<2x8xf32>
    %751 = math.tanh %750 : vector<2x8xf32>
    %cst_277 = arith.constant 5.000000e-01 : f32
    %752 = vector.broadcast %cst_277 : f32 to vector<2x8xf32>
    %753 = arith.mulf %752, %751 : vector<2x8xf32>
    %cst_278 = arith.constant 5.000000e-01 : f32
    %754 = vector.broadcast %cst_278 : f32 to vector<2x8xf32>
    %755 = arith.addf %753, %754 : vector<2x8xf32>
    %756 = vector.extract_strided_slice %739 {offsets = [0, 16], sizes = [2, 8], strides = [1, 1]} : vector<2x32xf32> to vector<2x8xf32>
    %757 = math.tanh %756 : vector<2x8xf32>
    %758 = vector.extract_strided_slice %739 {offsets = [0, 24], sizes = [2, 8], strides = [1, 1]} : vector<2x32xf32> to vector<2x8xf32>
    %cst_279 = arith.constant 5.000000e-01 : f32
    %759 = vector.broadcast %cst_279 : f32 to vector<2x8xf32>
    %760 = arith.mulf %759, %758 : vector<2x8xf32>
    %761 = math.tanh %760 : vector<2x8xf32>
    %cst_280 = arith.constant 5.000000e-01 : f32
    %762 = vector.broadcast %cst_280 : f32 to vector<2x8xf32>
    %763 = arith.mulf %762, %761 : vector<2x8xf32>
    %cst_281 = arith.constant 5.000000e-01 : f32
    %764 = vector.broadcast %cst_281 : f32 to vector<2x8xf32>
    %765 = arith.addf %763, %764 : vector<2x8xf32>
    %766 = arith.mulf %755, %733 : vector<2x8xf32>
    %767 = arith.mulf %747, %757 : vector<2x8xf32>
    %768 = arith.addf %766, %767 : vector<2x8xf32>
    %769 = math.tanh %768 : vector<2x8xf32>
    %770 = arith.mulf %765, %769 : vector<2x8xf32>
    %c8_282 = arith.constant 8 : index
    %c0_283 = arith.constant 0 : index
    %771 = vector.load %arg8[%c8_282, %c0_283] : memref<16x8xf32, #tpu.memory_space<vmem>>, vector<2x8xf32>
    tpu.vector_store %arg8[%c8_282, %c0_283], %770 {strides = array<i32>} : memref<16x8xf32, #tpu.memory_space<vmem>>, vector<2x8xf32>,
    %772 = vector.extract_strided_slice %592 {offsets = [10, 0], sizes = [2, 32], strides = [1, 1]} : vector<16x32xf32> to vector<2x32xf32>
    %cst_284 = arith.constant dense<0.000000e+00> : vector<2x32xf32>
    %773 = tpu.matmul %770, %594, %cst_284 {dimension_numbers = #tpu.dot_dimension_numbers<[1], [0], [0], [1], [0, 0, 1, 1], [], []>} : vector<2x8xf32>, vector<8x32xf32>, vector<2x32xf32> -> vector<2x32xf32>
    %774 = arith.addf %772, %773 : vector<2x32xf32>
    %775 = vector.extract_strided_slice %774 {offsets = [0, 0], sizes = [2, 8], strides = [1, 1]} : vector<2x32xf32> to vector<2x8xf32>
    %cst_285 = arith.constant 5.000000e-01 : f32
    %776 = vector.broadcast %cst_285 : f32 to vector<2x8xf32>
    %777 = arith.mulf %776, %775 : vector<2x8xf32>
    %778 = math.tanh %777 : vector<2x8xf32>
    %cst_286 = arith.constant 5.000000e-01 : f32
    %779 = vector.broadcast %cst_286 : f32 to vector<2x8xf32>
    %780 = arith.mulf %779, %778 : vector<2x8xf32>
    %cst_287 = arith.constant 5.000000e-01 : f32
    %781 = vector.broadcast %cst_287 : f32 to vector<2x8xf32>
    %782 = arith.addf %780, %781 : vector<2x8xf32>
    %783 = vector.extract_strided_slice %774 {offsets = [0, 8], sizes = [2, 8], strides = [1, 1]} : vector<2x32xf32> to vector<2x8xf32>
    %cst_288 = arith.constant 5.000000e-01 : f32
    %784 = vector.broadcast %cst_288 : f32 to vector<2x8xf32>
    %785 = arith.mulf %784, %783 : vector<2x8xf32>
    %786 = math.tanh %785 : vector<2x8xf32>
    %cst_289 = arith.constant 5.000000e-01 : f32
    %787 = vector.broadcast %cst_289 : f32 to vector<2x8xf32>
    %788 = arith.mulf %787, %786 : vector<2x8xf32>
    %cst_290 = arith.constant 5.000000e-01 : f32
    %789 = vector.broadcast %cst_290 : f32 to vector<2x8xf32>
    %790 = arith.addf %788, %789 : vector<2x8xf32>
    %791 = vector.extract_strided_slice %774 {offsets = [0, 16], sizes = [2, 8], strides = [1, 1]} : vector<2x32xf32> to vector<2x8xf32>
    %792 = math.tanh %791 : vector<2x8xf32>
    %793 = vector.extract_strided_slice %774 {offsets = [0, 24], sizes = [2, 8], strides = [1, 1]} : vector<2x32xf32> to vector<2x8xf32>
    %cst_291 = arith.constant 5.000000e-01 : f32
    %794 = vector.broadcast %cst_291 : f32 to vector<2x8xf32>
    %795 = arith.mulf %794, %793 : vector<2x8xf32>
    %796 = math.tanh %795 : vector<2x8xf32>
    %cst_292 = arith.constant 5.000000e-01 : f32
    %797 = vector.broadcast %cst_292 : f32 to vector<2x8xf32>
    %798 = arith.mulf %797, %796 : vector<2x8xf32>
    %cst_293 = arith.constant 5.000000e-01 : f32
    %799 = vector.broadcast %cst_293 : f32 to vector<2x8xf32>
    %800 = arith.addf %798, %799 : vector<2x8xf32>
    %801 = arith.mulf %790, %768 : vector<2x8xf32>
    %802 = arith.mulf %782, %792 : vector<2x8xf32>
    %803 = arith.addf %801, %802 : vector<2x8xf32>
    %804 = math.tanh %803 : vector<2x8xf32>
    %805 = arith.mulf %800, %804 : vector<2x8xf32>
    %c10_294 = arith.constant 10 : index
    %c0_295 = arith.constant 0 : index
    %806 = vector.load %arg8[%c10_294, %c0_295] : memref<16x8xf32, #tpu.memory_space<vmem>>, vector<2x8xf32>
    tpu.vector_store %arg8[%c10_294, %c0_295], %805 {strides = array<i32>} : memref<16x8xf32, #tpu.memory_space<vmem>>, vector<2x8xf32>,
    %807 = vector.extract_strided_slice %592 {offsets = [12, 0], sizes = [2, 32], strides = [1, 1]} : vector<16x32xf32> to vector<2x32xf32>
    %cst_296 = arith.constant dense<0.000000e+00> : vector<2x32xf32>
    %808 = tpu.matmul %805, %594, %cst_296 {dimension_numbers = #tpu.dot_dimension_numbers<[1], [0], [0], [1], [0, 0, 1, 1], [], []>} : vector<2x8xf32>, vector<8x32xf32>, vector<2x32xf32> -> vector<2x32xf32>
    %809 = arith.addf %807, %808 : vector<2x32xf32>
    %810 = vector.extract_strided_slice %809 {offsets = [0, 0], sizes = [2, 8], strides = [1, 1]} : vector<2x32xf32> to vector<2x8xf32>
    %cst_297 = arith.constant 5.000000e-01 : f32
    %811 = vector.broadcast %cst_297 : f32 to vector<2x8xf32>
    %812 = arith.mulf %811, %810 : vector<2x8xf32>
    %813 = math.tanh %812 : vector<2x8xf32>
    %cst_298 = arith.constant 5.000000e-01 : f32
    %814 = vector.broadcast %cst_298 : f32 to vector<2x8xf32>
    %815 = arith.mulf %814, %813 : vector<2x8xf32>
    %cst_299 = arith.constant 5.000000e-01 : f32
    %816 = vector.broadcast %cst_299 : f32 to vector<2x8xf32>
    %817 = arith.addf %815, %816 : vector<2x8xf32>
    %818 = vector.extract_strided_slice %809 {offsets = [0, 8], sizes = [2, 8], strides = [1, 1]} : vector<2x32xf32> to vector<2x8xf32>
    %cst_300 = arith.constant 5.000000e-01 : f32
    %819 = vector.broadcast %cst_300 : f32 to vector<2x8xf32>
    %820 = arith.mulf %819, %818 : vector<2x8xf32>
    %821 = math.tanh %820 : vector<2x8xf32>
    %cst_301 = arith.constant 5.000000e-01 : f32
    %822 = vector.broadcast %cst_301 : f32 to vector<2x8xf32>
    %823 = arith.mulf %822, %821 : vector<2x8xf32>
    %cst_302 = arith.constant 5.000000e-01 : f32
    %824 = vector.broadcast %cst_302 : f32 to vector<2x8xf32>
    %825 = arith.addf %823, %824 : vector<2x8xf32>
    %826 = vector.extract_strided_slice %809 {offsets = [0, 16], sizes = [2, 8], strides = [1, 1]} : vector<2x32xf32> to vector<2x8xf32>
    %827 = math.tanh %826 : vector<2x8xf32>
    %828 = vector.extract_strided_slice %809 {offsets = [0, 24], sizes = [2, 8], strides = [1, 1]} : vector<2x32xf32> to vector<2x8xf32>
    %cst_303 = arith.constant 5.000000e-01 : f32
    %829 = vector.broadcast %cst_303 : f32 to vector<2x8xf32>
    %830 = arith.mulf %829, %828 : vector<2x8xf32>
    %831 = math.tanh %830 : vector<2x8xf32>
    %cst_304 = arith.constant 5.000000e-01 : f32
    %832 = vector.broadcast %cst_304 : f32 to vector<2x8xf32>
    %833 = arith.mulf %832, %831 : vector<2x8xf32>
    %cst_305 = arith.constant 5.000000e-01 : f32
    %834 = vector.broadcast %cst_305 : f32 to vector<2x8xf32>
    %835 = arith.addf %833, %834 : vector<2x8xf32>
    %836 = arith.mulf %825, %803 : vector<2x8xf32>
    %837 = arith.mulf %817, %827 : vector<2x8xf32>
    %838 = arith.addf %836, %837 : vector<2x8xf32>
    %839 = math.tanh %838 : vector<2x8xf32>
    %840 = arith.mulf %835, %839 : vector<2x8xf32>
    %c12_306 = arith.constant 12 : index
    %c0_307 = arith.constant 0 : index
    %841 = vector.load %arg8[%c12_306, %c0_307] : memref<16x8xf32, #tpu.memory_space<vmem>>, vector<2x8xf32>
    tpu.vector_store %arg8[%c12_306, %c0_307], %840 {strides = array<i32>} : memref<16x8xf32, #tpu.memory_space<vmem>>, vector<2x8xf32>,
    %842 = vector.extract_strided_slice %592 {offsets = [14, 0], sizes = [2, 32], strides = [1, 1]} : vector<16x32xf32> to vector<2x32xf32>
    %cst_308 = arith.constant dense<0.000000e+00> : vector<2x32xf32>
    %843 = tpu.matmul %840, %594, %cst_308 {dimension_numbers = #tpu.dot_dimension_numbers<[1], [0], [0], [1], [0, 0, 1, 1], [], []>} : vector<2x8xf32>, vector<8x32xf32>, vector<2x32xf32> -> vector<2x32xf32>
    %844 = arith.addf %842, %843 : vector<2x32xf32>
    %845 = vector.extract_strided_slice %844 {offsets = [0, 0], sizes = [2, 8], strides = [1, 1]} : vector<2x32xf32> to vector<2x8xf32>
    %cst_309 = arith.constant 5.000000e-01 : f32
    %846 = vector.broadcast %cst_309 : f32 to vector<2x8xf32>
    %847 = arith.mulf %846, %845 : vector<2x8xf32>
    %848 = math.tanh %847 : vector<2x8xf32>
    %cst_310 = arith.constant 5.000000e-01 : f32
    %849 = vector.broadcast %cst_310 : f32 to vector<2x8xf32>
    %850 = arith.mulf %849, %848 : vector<2x8xf32>
    %cst_311 = arith.constant 5.000000e-01 : f32
    %851 = vector.broadcast %cst_311 : f32 to vector<2x8xf32>
    %852 = arith.addf %850, %851 : vector<2x8xf32>
    %853 = vector.extract_strided_slice %844 {offsets = [0, 8], sizes = [2, 8], strides = [1, 1]} : vector<2x32xf32> to vector<2x8xf32>
    %cst_312 = arith.constant 5.000000e-01 : f32
    %854 = vector.broadcast %cst_312 : f32 to vector<2x8xf32>
    %855 = arith.mulf %854, %853 : vector<2x8xf32>
    %856 = math.tanh %855 : vector<2x8xf32>
    %cst_313 = arith.constant 5.000000e-01 : f32
    %857 = vector.broadcast %cst_313 : f32 to vector<2x8xf32>
    %858 = arith.mulf %857, %856 : vector<2x8xf32>
    %cst_314 = arith.constant 5.000000e-01 : f32
    %859 = vector.broadcast %cst_314 : f32 to vector<2x8xf32>
    %860 = arith.addf %858, %859 : vector<2x8xf32>
    %861 = vector.extract_strided_slice %844 {offsets = [0, 16], sizes = [2, 8], strides = [1, 1]} : vector<2x32xf32> to vector<2x8xf32>
    %862 = math.tanh %861 : vector<2x8xf32>
    %863 = vector.extract_strided_slice %844 {offsets = [0, 24], sizes = [2, 8], strides = [1, 1]} : vector<2x32xf32> to vector<2x8xf32>
    %cst_315 = arith.constant 5.000000e-01 : f32
    %864 = vector.broadcast %cst_315 : f32 to vector<2x8xf32>
    %865 = arith.mulf %864, %863 : vector<2x8xf32>
    %866 = math.tanh %865 : vector<2x8xf32>
    %cst_316 = arith.constant 5.000000e-01 : f32
    %867 = vector.broadcast %cst_316 : f32 to vector<2x8xf32>
    %868 = arith.mulf %867, %866 : vector<2x8xf32>
    %cst_317 = arith.constant 5.000000e-01 : f32
    %869 = vector.broadcast %cst_317 : f32 to vector<2x8xf32>
    %870 = arith.addf %868, %869 : vector<2x8xf32>
    %871 = arith.mulf %860, %838 : vector<2x8xf32>
    %872 = arith.mulf %852, %862 : vector<2x8xf32>
    %873 = arith.addf %871, %872 : vector<2x8xf32>
    %874 = math.tanh %873 : vector<2x8xf32>
    %875 = arith.mulf %870, %874 : vector<2x8xf32>
    %c14_318 = arith.constant 14 : index
    %c0_319 = arith.constant 0 : index
    %876 = vector.load %arg8[%c14_318, %c0_319] : memref<16x8xf32, #tpu.memory_space<vmem>>, vector<2x8xf32>
    tpu.vector_store %arg8[%c14_318, %c0_319], %875 {strides = array<i32>} : memref<16x8xf32, #tpu.memory_space<vmem>>, vector<2x8xf32>,
    %c3 = arith.constant 3 : index
    %c0_320 = arith.constant 0 : index
    %c0_321 = arith.constant 0 : index
    %877 = vector.load %arg2[%c3, %c0_320, %c0_321] : memref<4x16x32xf32, #tpu.memory_space<vmem>>, vector<1x16x32xf32>
    %878 = vector.shape_cast %877 : vector<1x16x32xf32> to vector<16x32xf32>
    %cst_322 = arith.constant dense<0.000000e+00> : vector<16x32xf32>
    %879 = tpu.matmul %585, %878, %cst_322 {dimension_numbers = #tpu.dot_dimension_numbers<[1], [0], [0], [1], [0, 0, 1, 1], [], []>} : vector<16x16xf32>, vector<16x32xf32>, vector<16x32xf32> -> vector<16x32xf32>
    %c3_323 = arith.constant 3 : index
    %c0_324 = arith.constant 0 : index
    %c0_325 = arith.constant 0 : index
    %880 = vector.load %arg4[%c3_323, %c0_324, %c0_325] : memref<4x1x32xf32, #tpu.memory_space<vmem>>, vector<1x1x32xf32>
    %881 = vector.shape_cast %880 : vector<1x1x32xf32> to vector<1x32xf32>
    %882 = vector.broadcast %881 : vector<1x32xf32> to vector<16x32xf32>
    %883 = arith.addf %879, %882 : vector<16x32xf32>
    %c3_326 = arith.constant 3 : index
    %c0_327 = arith.constant 0 : index
    %c0_328 = arith.constant 0 : index
    %884 = vector.load %arg3[%c3_326, %c0_327, %c0_328] : memref<4x8x32xf32, #tpu.memory_space<vmem>>, vector<1x8x32xf32>
    %885 = vector.shape_cast %884 : vector<1x8x32xf32> to vector<8x32xf32>
    %cst_329 = arith.constant 0.000000e+00 : f32
    %886 = vector.broadcast %cst_329 : f32 to vector<2x8xf32>
    %cst_330 = arith.constant 0.000000e+00 : f32
    %887 = vector.broadcast %cst_330 : f32 to vector<2x8xf32>
    %888 = vector.extract_strided_slice %883 {offsets = [14, 0], sizes = [2, 32], strides = [1, 1]} : vector<16x32xf32> to vector<2x32xf32>
    %cst_331 = arith.constant dense<0.000000e+00> : vector<2x32xf32>
    %889 = tpu.matmul %886, %885, %cst_331 {dimension_numbers = #tpu.dot_dimension_numbers<[1], [0], [0], [1], [0, 0, 1, 1], [], []>} : vector<2x8xf32>, vector<8x32xf32>, vector<2x32xf32> -> vector<2x32xf32>
    %890 = arith.addf %888, %889 : vector<2x32xf32>
    %891 = vector.extract_strided_slice %890 {offsets = [0, 0], sizes = [2, 8], strides = [1, 1]} : vector<2x32xf32> to vector<2x8xf32>
    %cst_332 = arith.constant 5.000000e-01 : f32
    %892 = vector.broadcast %cst_332 : f32 to vector<2x8xf32>
    %893 = arith.mulf %892, %891 : vector<2x8xf32>
    %894 = math.tanh %893 : vector<2x8xf32>
    %cst_333 = arith.constant 5.000000e-01 : f32
    %895 = vector.broadcast %cst_333 : f32 to vector<2x8xf32>
    %896 = arith.mulf %895, %894 : vector<2x8xf32>
    %cst_334 = arith.constant 5.000000e-01 : f32
    %897 = vector.broadcast %cst_334 : f32 to vector<2x8xf32>
    %898 = arith.addf %896, %897 : vector<2x8xf32>
    %899 = vector.extract_strided_slice %890 {offsets = [0, 8], sizes = [2, 8], strides = [1, 1]} : vector<2x32xf32> to vector<2x8xf32>
    %cst_335 = arith.constant 5.000000e-01 : f32
    %900 = vector.broadcast %cst_335 : f32 to vector<2x8xf32>
    %901 = arith.mulf %900, %899 : vector<2x8xf32>
    %902 = math.tanh %901 : vector<2x8xf32>
    %cst_336 = arith.constant 5.000000e-01 : f32
    %903 = vector.broadcast %cst_336 : f32 to vector<2x8xf32>
    %904 = arith.mulf %903, %902 : vector<2x8xf32>
    %cst_337 = arith.constant 5.000000e-01 : f32
    %905 = vector.broadcast %cst_337 : f32 to vector<2x8xf32>
    %906 = arith.addf %904, %905 : vector<2x8xf32>
    %907 = vector.extract_strided_slice %890 {offsets = [0, 16], sizes = [2, 8], strides = [1, 1]} : vector<2x32xf32> to vector<2x8xf32>
    %908 = math.tanh %907 : vector<2x8xf32>
    %909 = vector.extract_strided_slice %890 {offsets = [0, 24], sizes = [2, 8], strides = [1, 1]} : vector<2x32xf32> to vector<2x8xf32>
    %cst_338 = arith.constant 5.000000e-01 : f32
    %910 = vector.broadcast %cst_338 : f32 to vector<2x8xf32>
    %911 = arith.mulf %910, %909 : vector<2x8xf32>
    %912 = math.tanh %911 : vector<2x8xf32>
    %cst_339 = arith.constant 5.000000e-01 : f32
    %913 = vector.broadcast %cst_339 : f32 to vector<2x8xf32>
    %914 = arith.mulf %913, %912 : vector<2x8xf32>
    %cst_340 = arith.constant 5.000000e-01 : f32
    %915 = vector.broadcast %cst_340 : f32 to vector<2x8xf32>
    %916 = arith.addf %914, %915 : vector<2x8xf32>
    %917 = arith.mulf %906, %887 : vector<2x8xf32>
    %918 = arith.mulf %898, %908 : vector<2x8xf32>
    %919 = arith.addf %917, %918 : vector<2x8xf32>
    %920 = math.tanh %919 : vector<2x8xf32>
    %921 = arith.mulf %916, %920 : vector<2x8xf32>
    %c14_341 = arith.constant 14 : index
    %c0_342 = arith.constant 0 : index
    %922 = vector.load %arg9[%c14_341, %c0_342] : memref<16x8xf32, #tpu.memory_space<vmem>>, vector<2x8xf32>
    tpu.vector_store %arg9[%c14_341, %c0_342], %921 {strides = array<i32>} : memref<16x8xf32, #tpu.memory_space<vmem>>, vector<2x8xf32>,
    %923 = vector.extract_strided_slice %883 {offsets = [12, 0], sizes = [2, 32], strides = [1, 1]} : vector<16x32xf32> to vector<2x32xf32>
    %cst_343 = arith.constant dense<0.000000e+00> : vector<2x32xf32>
    %924 = tpu.matmul %921, %885, %cst_343 {dimension_numbers = #tpu.dot_dimension_numbers<[1], [0], [0], [1], [0, 0, 1, 1], [], []>} : vector<2x8xf32>, vector<8x32xf32>, vector<2x32xf32> -> vector<2x32xf32>
    %925 = arith.addf %923, %924 : vector<2x32xf32>
    %926 = vector.extract_strided_slice %925 {offsets = [0, 0], sizes = [2, 8], strides = [1, 1]} : vector<2x32xf32> to vector<2x8xf32>
    %cst_344 = arith.constant 5.000000e-01 : f32
    %927 = vector.broadcast %cst_344 : f32 to vector<2x8xf32>
    %928 = arith.mulf %927, %926 : vector<2x8xf32>
    %929 = math.tanh %928 : vector<2x8xf32>
    %cst_345 = arith.constant 5.000000e-01 : f32
    %930 = vector.broadcast %cst_345 : f32 to vector<2x8xf32>
    %931 = arith.mulf %930, %929 : vector<2x8xf32>
    %cst_346 = arith.constant 5.000000e-01 : f32
    %932 = vector.broadcast %cst_346 : f32 to vector<2x8xf32>
    %933 = arith.addf %931, %932 : vector<2x8xf32>
    %934 = vector.extract_strided_slice %925 {offsets = [0, 8], sizes = [2, 8], strides = [1, 1]} : vector<2x32xf32> to vector<2x8xf32>
    %cst_347 = arith.constant 5.000000e-01 : f32
    %935 = vector.broadcast %cst_347 : f32 to vector<2x8xf32>
    %936 = arith.mulf %935, %934 : vector<2x8xf32>
    %937 = math.tanh %936 : vector<2x8xf32>
    %cst_348 = arith.constant 5.000000e-01 : f32
    %938 = vector.broadcast %cst_348 : f32 to vector<2x8xf32>
    %939 = arith.mulf %938, %937 : vector<2x8xf32>
    %cst_349 = arith.constant 5.000000e-01 : f32
    %940 = vector.broadcast %cst_349 : f32 to vector<2x8xf32>
    %941 = arith.addf %939, %940 : vector<2x8xf32>
    %942 = vector.extract_strided_slice %925 {offsets = [0, 16], sizes = [2, 8], strides = [1, 1]} : vector<2x32xf32> to vector<2x8xf32>
    %943 = math.tanh %942 : vector<2x8xf32>
    %944 = vector.extract_strided_slice %925 {offsets = [0, 24], sizes = [2, 8], strides = [1, 1]} : vector<2x32xf32> to vector<2x8xf32>
    %cst_350 = arith.constant 5.000000e-01 : f32
    %945 = vector.broadcast %cst_350 : f32 to vector<2x8xf32>
    %946 = arith.mulf %945, %944 : vector<2x8xf32>
    %947 = math.tanh %946 : vector<2x8xf32>
    %cst_351 = arith.constant 5.000000e-01 : f32
    %948 = vector.broadcast %cst_351 : f32 to vector<2x8xf32>
    %949 = arith.mulf %948, %947 : vector<2x8xf32>
    %cst_352 = arith.constant 5.000000e-01 : f32
    %950 = vector.broadcast %cst_352 : f32 to vector<2x8xf32>
    %951 = arith.addf %949, %950 : vector<2x8xf32>
    %952 = arith.mulf %941, %919 : vector<2x8xf32>
    %953 = arith.mulf %933, %943 : vector<2x8xf32>
    %954 = arith.addf %952, %953 : vector<2x8xf32>
    %955 = math.tanh %954 : vector<2x8xf32>
    %956 = arith.mulf %951, %955 : vector<2x8xf32>
    %c12_353 = arith.constant 12 : index
    %c0_354 = arith.constant 0 : index
    %957 = vector.load %arg9[%c12_353, %c0_354] : memref<16x8xf32, #tpu.memory_space<vmem>>, vector<2x8xf32>
    tpu.vector_store %arg9[%c12_353, %c0_354], %956 {strides = array<i32>} : memref<16x8xf32, #tpu.memory_space<vmem>>, vector<2x8xf32>,
    %958 = vector.extract_strided_slice %883 {offsets = [10, 0], sizes = [2, 32], strides = [1, 1]} : vector<16x32xf32> to vector<2x32xf32>
    %cst_355 = arith.constant dense<0.000000e+00> : vector<2x32xf32>
    %959 = tpu.matmul %956, %885, %cst_355 {dimension_numbers = #tpu.dot_dimension_numbers<[1], [0], [0], [1], [0, 0, 1, 1], [], []>} : vector<2x8xf32>, vector<8x32xf32>, vector<2x32xf32> -> vector<2x32xf32>
    %960 = arith.addf %958, %959 : vector<2x32xf32>
    %961 = vector.extract_strided_slice %960 {offsets = [0, 0], sizes = [2, 8], strides = [1, 1]} : vector<2x32xf32> to vector<2x8xf32>
    %cst_356 = arith.constant 5.000000e-01 : f32
    %962 = vector.broadcast %cst_356 : f32 to vector<2x8xf32>
    %963 = arith.mulf %962, %961 : vector<2x8xf32>
    %964 = math.tanh %963 : vector<2x8xf32>
    %cst_357 = arith.constant 5.000000e-01 : f32
    %965 = vector.broadcast %cst_357 : f32 to vector<2x8xf32>
    %966 = arith.mulf %965, %964 : vector<2x8xf32>
    %cst_358 = arith.constant 5.000000e-01 : f32
    %967 = vector.broadcast %cst_358 : f32 to vector<2x8xf32>
    %968 = arith.addf %966, %967 : vector<2x8xf32>
    %969 = vector.extract_strided_slice %960 {offsets = [0, 8], sizes = [2, 8], strides = [1, 1]} : vector<2x32xf32> to vector<2x8xf32>
    %cst_359 = arith.constant 5.000000e-01 : f32
    %970 = vector.broadcast %cst_359 : f32 to vector<2x8xf32>
    %971 = arith.mulf %970, %969 : vector<2x8xf32>
    %972 = math.tanh %971 : vector<2x8xf32>
    %cst_360 = arith.constant 5.000000e-01 : f32
    %973 = vector.broadcast %cst_360 : f32 to vector<2x8xf32>
    %974 = arith.mulf %973, %972 : vector<2x8xf32>
    %cst_361 = arith.constant 5.000000e-01 : f32
    %975 = vector.broadcast %cst_361 : f32 to vector<2x8xf32>
    %976 = arith.addf %974, %975 : vector<2x8xf32>
    %977 = vector.extract_strided_slice %960 {offsets = [0, 16], sizes = [2, 8], strides = [1, 1]} : vector<2x32xf32> to vector<2x8xf32>
    %978 = math.tanh %977 : vector<2x8xf32>
    %979 = vector.extract_strided_slice %960 {offsets = [0, 24], sizes = [2, 8], strides = [1, 1]} : vector<2x32xf32> to vector<2x8xf32>
    %cst_362 = arith.constant 5.000000e-01 : f32
    %980 = vector.broadcast %cst_362 : f32 to vector<2x8xf32>
    %981 = arith.mulf %980, %979 : vector<2x8xf32>
    %982 = math.tanh %981 : vector<2x8xf32>
    %cst_363 = arith.constant 5.000000e-01 : f32
    %983 = vector.broadcast %cst_363 : f32 to vector<2x8xf32>
    %984 = arith.mulf %983, %982 : vector<2x8xf32>
    %cst_364 = arith.constant 5.000000e-01 : f32
    %985 = vector.broadcast %cst_364 : f32 to vector<2x8xf32>
    %986 = arith.addf %984, %985 : vector<2x8xf32>
    %987 = arith.mulf %976, %954 : vector<2x8xf32>
    %988 = arith.mulf %968, %978 : vector<2x8xf32>
    %989 = arith.addf %987, %988 : vector<2x8xf32>
    %990 = math.tanh %989 : vector<2x8xf32>
    %991 = arith.mulf %986, %990 : vector<2x8xf32>
    %c10_365 = arith.constant 10 : index
    %c0_366 = arith.constant 0 : index
    %992 = vector.load %arg9[%c10_365, %c0_366] : memref<16x8xf32, #tpu.memory_space<vmem>>, vector<2x8xf32>
    tpu.vector_store %arg9[%c10_365, %c0_366], %991 {strides = array<i32>} : memref<16x8xf32, #tpu.memory_space<vmem>>, vector<2x8xf32>,
    %993 = vector.extract_strided_slice %883 {offsets = [8, 0], sizes = [2, 32], strides = [1, 1]} : vector<16x32xf32> to vector<2x32xf32>
    %cst_367 = arith.constant dense<0.000000e+00> : vector<2x32xf32>
    %994 = tpu.matmul %991, %885, %cst_367 {dimension_numbers = #tpu.dot_dimension_numbers<[1], [0], [0], [1], [0, 0, 1, 1], [], []>} : vector<2x8xf32>, vector<8x32xf32>, vector<2x32xf32> -> vector<2x32xf32>
    %995 = arith.addf %993, %994 : vector<2x32xf32>
    %996 = vector.extract_strided_slice %995 {offsets = [0, 0], sizes = [2, 8], strides = [1, 1]} : vector<2x32xf32> to vector<2x8xf32>
    %cst_368 = arith.constant 5.000000e-01 : f32
    %997 = vector.broadcast %cst_368 : f32 to vector<2x8xf32>
    %998 = arith.mulf %997, %996 : vector<2x8xf32>
    %999 = math.tanh %998 : vector<2x8xf32>
    %cst_369 = arith.constant 5.000000e-01 : f32
    %1000 = vector.broadcast %cst_369 : f32 to vector<2x8xf32>
    %1001 = arith.mulf %1000, %999 : vector<2x8xf32>
    %cst_370 = arith.constant 5.000000e-01 : f32
    %1002 = vector.broadcast %cst_370 : f32 to vector<2x8xf32>
    %1003 = arith.addf %1001, %1002 : vector<2x8xf32>
    %1004 = vector.extract_strided_slice %995 {offsets = [0, 8], sizes = [2, 8], strides = [1, 1]} : vector<2x32xf32> to vector<2x8xf32>
    %cst_371 = arith.constant 5.000000e-01 : f32
    %1005 = vector.broadcast %cst_371 : f32 to vector<2x8xf32>
    %1006 = arith.mulf %1005, %1004 : vector<2x8xf32>
    %1007 = math.tanh %1006 : vector<2x8xf32>
    %cst_372 = arith.constant 5.000000e-01 : f32
    %1008 = vector.broadcast %cst_372 : f32 to vector<2x8xf32>
    %1009 = arith.mulf %1008, %1007 : vector<2x8xf32>
    %cst_373 = arith.constant 5.000000e-01 : f32
    %1010 = vector.broadcast %cst_373 : f32 to vector<2x8xf32>
    %1011 = arith.addf %1009, %1010 : vector<2x8xf32>
    %1012 = vector.extract_strided_slice %995 {offsets = [0, 16], sizes = [2, 8], strides = [1, 1]} : vector<2x32xf32> to vector<2x8xf32>
    %1013 = math.tanh %1012 : vector<2x8xf32>
    %1014 = vector.extract_strided_slice %995 {offsets = [0, 24], sizes = [2, 8], strides = [1, 1]} : vector<2x32xf32> to vector<2x8xf32>
    %cst_374 = arith.constant 5.000000e-01 : f32
    %1015 = vector.broadcast %cst_374 : f32 to vector<2x8xf32>
    %1016 = arith.mulf %1015, %1014 : vector<2x8xf32>
    %1017 = math.tanh %1016 : vector<2x8xf32>
    %cst_375 = arith.constant 5.000000e-01 : f32
    %1018 = vector.broadcast %cst_375 : f32 to vector<2x8xf32>
    %1019 = arith.mulf %1018, %1017 : vector<2x8xf32>
    %cst_376 = arith.constant 5.000000e-01 : f32
    %1020 = vector.broadcast %cst_376 : f32 to vector<2x8xf32>
    %1021 = arith.addf %1019, %1020 : vector<2x8xf32>
    %1022 = arith.mulf %1011, %989 : vector<2x8xf32>
    %1023 = arith.mulf %1003, %1013 : vector<2x8xf32>
    %1024 = arith.addf %1022, %1023 : vector<2x8xf32>
    %1025 = math.tanh %1024 : vector<2x8xf32>
    %1026 = arith.mulf %1021, %1025 : vector<2x8xf32>
    %c8_377 = arith.constant 8 : index
    %c0_378 = arith.constant 0 : index
    %1027 = vector.load %arg9[%c8_377, %c0_378] : memref<16x8xf32, #tpu.memory_space<vmem>>, vector<2x8xf32>
    tpu.vector_store %arg9[%c8_377, %c0_378], %1026 {strides = array<i32>} : memref<16x8xf32, #tpu.memory_space<vmem>>, vector<2x8xf32>,
    %1028 = vector.extract_strided_slice %883 {offsets = [6, 0], sizes = [2, 32], strides = [1, 1]} : vector<16x32xf32> to vector<2x32xf32>
    %cst_379 = arith.constant dense<0.000000e+00> : vector<2x32xf32>
    %1029 = tpu.matmul %1026, %885, %cst_379 {dimension_numbers = #tpu.dot_dimension_numbers<[1], [0], [0], [1], [0, 0, 1, 1], [], []>} : vector<2x8xf32>, vector<8x32xf32>, vector<2x32xf32> -> vector<2x32xf32>
    %1030 = arith.addf %1028, %1029 : vector<2x32xf32>
    %1031 = vector.extract_strided_slice %1030 {offsets = [0, 0], sizes = [2, 8], strides = [1, 1]} : vector<2x32xf32> to vector<2x8xf32>
    %cst_380 = arith.constant 5.000000e-01 : f32
    %1032 = vector.broadcast %cst_380 : f32 to vector<2x8xf32>
    %1033 = arith.mulf %1032, %1031 : vector<2x8xf32>
    %1034 = math.tanh %1033 : vector<2x8xf32>
    %cst_381 = arith.constant 5.000000e-01 : f32
    %1035 = vector.broadcast %cst_381 : f32 to vector<2x8xf32>
    %1036 = arith.mulf %1035, %1034 : vector<2x8xf32>
    %cst_382 = arith.constant 5.000000e-01 : f32
    %1037 = vector.broadcast %cst_382 : f32 to vector<2x8xf32>
    %1038 = arith.addf %1036, %1037 : vector<2x8xf32>
    %1039 = vector.extract_strided_slice %1030 {offsets = [0, 8], sizes = [2, 8], strides = [1, 1]} : vector<2x32xf32> to vector<2x8xf32>
    %cst_383 = arith.constant 5.000000e-01 : f32
    %1040 = vector.broadcast %cst_383 : f32 to vector<2x8xf32>
    %1041 = arith.mulf %1040, %1039 : vector<2x8xf32>
    %1042 = math.tanh %1041 : vector<2x8xf32>
    %cst_384 = arith.constant 5.000000e-01 : f32
    %1043 = vector.broadcast %cst_384 : f32 to vector<2x8xf32>
    %1044 = arith.mulf %1043, %1042 : vector<2x8xf32>
    %cst_385 = arith.constant 5.000000e-01 : f32
    %1045 = vector.broadcast %cst_385 : f32 to vector<2x8xf32>
    %1046 = arith.addf %1044, %1045 : vector<2x8xf32>
    %1047 = vector.extract_strided_slice %1030 {offsets = [0, 16], sizes = [2, 8], strides = [1, 1]} : vector<2x32xf32> to vector<2x8xf32>
    %1048 = math.tanh %1047 : vector<2x8xf32>
    %1049 = vector.extract_strided_slice %1030 {offsets = [0, 24], sizes = [2, 8], strides = [1, 1]} : vector<2x32xf32> to vector<2x8xf32>
    %cst_386 = arith.constant 5.000000e-01 : f32
    %1050 = vector.broadcast %cst_386 : f32 to vector<2x8xf32>
    %1051 = arith.mulf %1050, %1049 : vector<2x8xf32>
    %1052 = math.tanh %1051 : vector<2x8xf32>
    %cst_387 = arith.constant 5.000000e-01 : f32
    %1053 = vector.broadcast %cst_387 : f32 to vector<2x8xf32>
    %1054 = arith.mulf %1053, %1052 : vector<2x8xf32>
    %cst_388 = arith.constant 5.000000e-01 : f32
    %1055 = vector.broadcast %cst_388 : f32 to vector<2x8xf32>
    %1056 = arith.addf %1054, %1055 : vector<2x8xf32>
    %1057 = arith.mulf %1046, %1024 : vector<2x8xf32>
    %1058 = arith.mulf %1038, %1048 : vector<2x8xf32>
    %1059 = arith.addf %1057, %1058 : vector<2x8xf32>
    %1060 = math.tanh %1059 : vector<2x8xf32>
    %1061 = arith.mulf %1056, %1060 : vector<2x8xf32>
    %c6_389 = arith.constant 6 : index
    %c0_390 = arith.constant 0 : index
    %1062 = vector.load %arg9[%c6_389, %c0_390] : memref<16x8xf32, #tpu.memory_space<vmem>>, vector<2x8xf32>
    tpu.vector_store %arg9[%c6_389, %c0_390], %1061 {strides = array<i32>} : memref<16x8xf32, #tpu.memory_space<vmem>>, vector<2x8xf32>,
    %1063 = vector.extract_strided_slice %883 {offsets = [4, 0], sizes = [2, 32], strides = [1, 1]} : vector<16x32xf32> to vector<2x32xf32>
    %cst_391 = arith.constant dense<0.000000e+00> : vector<2x32xf32>
    %1064 = tpu.matmul %1061, %885, %cst_391 {dimension_numbers = #tpu.dot_dimension_numbers<[1], [0], [0], [1], [0, 0, 1, 1], [], []>} : vector<2x8xf32>, vector<8x32xf32>, vector<2x32xf32> -> vector<2x32xf32>
    %1065 = arith.addf %1063, %1064 : vector<2x32xf32>
    %1066 = vector.extract_strided_slice %1065 {offsets = [0, 0], sizes = [2, 8], strides = [1, 1]} : vector<2x32xf32> to vector<2x8xf32>
    %cst_392 = arith.constant 5.000000e-01 : f32
    %1067 = vector.broadcast %cst_392 : f32 to vector<2x8xf32>
    %1068 = arith.mulf %1067, %1066 : vector<2x8xf32>
    %1069 = math.tanh %1068 : vector<2x8xf32>
    %cst_393 = arith.constant 5.000000e-01 : f32
    %1070 = vector.broadcast %cst_393 : f32 to vector<2x8xf32>
    %1071 = arith.mulf %1070, %1069 : vector<2x8xf32>
    %cst_394 = arith.constant 5.000000e-01 : f32
    %1072 = vector.broadcast %cst_394 : f32 to vector<2x8xf32>
    %1073 = arith.addf %1071, %1072 : vector<2x8xf32>
    %1074 = vector.extract_strided_slice %1065 {offsets = [0, 8], sizes = [2, 8], strides = [1, 1]} : vector<2x32xf32> to vector<2x8xf32>
    %cst_395 = arith.constant 5.000000e-01 : f32
    %1075 = vector.broadcast %cst_395 : f32 to vector<2x8xf32>
    %1076 = arith.mulf %1075, %1074 : vector<2x8xf32>
    %1077 = math.tanh %1076 : vector<2x8xf32>
    %cst_396 = arith.constant 5.000000e-01 : f32
    %1078 = vector.broadcast %cst_396 : f32 to vector<2x8xf32>
    %1079 = arith.mulf %1078, %1077 : vector<2x8xf32>
    %cst_397 = arith.constant 5.000000e-01 : f32
    %1080 = vector.broadcast %cst_397 : f32 to vector<2x8xf32>
    %1081 = arith.addf %1079, %1080 : vector<2x8xf32>
    %1082 = vector.extract_strided_slice %1065 {offsets = [0, 16], sizes = [2, 8], strides = [1, 1]} : vector<2x32xf32> to vector<2x8xf32>
    %1083 = math.tanh %1082 : vector<2x8xf32>
    %1084 = vector.extract_strided_slice %1065 {offsets = [0, 24], sizes = [2, 8], strides = [1, 1]} : vector<2x32xf32> to vector<2x8xf32>
    %cst_398 = arith.constant 5.000000e-01 : f32
    %1085 = vector.broadcast %cst_398 : f32 to vector<2x8xf32>
    %1086 = arith.mulf %1085, %1084 : vector<2x8xf32>
    %1087 = math.tanh %1086 : vector<2x8xf32>
    %cst_399 = arith.constant 5.000000e-01 : f32
    %1088 = vector.broadcast %cst_399 : f32 to vector<2x8xf32>
    %1089 = arith.mulf %1088, %1087 : vector<2x8xf32>
    %cst_400 = arith.constant 5.000000e-01 : f32
    %1090 = vector.broadcast %cst_400 : f32 to vector<2x8xf32>
    %1091 = arith.addf %1089, %1090 : vector<2x8xf32>
    %1092 = arith.mulf %1081, %1059 : vector<2x8xf32>
    %1093 = arith.mulf %1073, %1083 : vector<2x8xf32>
    %1094 = arith.addf %1092, %1093 : vector<2x8xf32>
    %1095 = math.tanh %1094 : vector<2x8xf32>
    %1096 = arith.mulf %1091, %1095 : vector<2x8xf32>
    %c4_401 = arith.constant 4 : index
    %c0_402 = arith.constant 0 : index
    %1097 = vector.load %arg9[%c4_401, %c0_402] : memref<16x8xf32, #tpu.memory_space<vmem>>, vector<2x8xf32>
    tpu.vector_store %arg9[%c4_401, %c0_402], %1096 {strides = array<i32>} : memref<16x8xf32, #tpu.memory_space<vmem>>, vector<2x8xf32>,
    %1098 = vector.extract_strided_slice %883 {offsets = [2, 0], sizes = [2, 32], strides = [1, 1]} : vector<16x32xf32> to vector<2x32xf32>
    %cst_403 = arith.constant dense<0.000000e+00> : vector<2x32xf32>
    %1099 = tpu.matmul %1096, %885, %cst_403 {dimension_numbers = #tpu.dot_dimension_numbers<[1], [0], [0], [1], [0, 0, 1, 1], [], []>} : vector<2x8xf32>, vector<8x32xf32>, vector<2x32xf32> -> vector<2x32xf32>
    %1100 = arith.addf %1098, %1099 : vector<2x32xf32>
    %1101 = vector.extract_strided_slice %1100 {offsets = [0, 0], sizes = [2, 8], strides = [1, 1]} : vector<2x32xf32> to vector<2x8xf32>
    %cst_404 = arith.constant 5.000000e-01 : f32
    %1102 = vector.broadcast %cst_404 : f32 to vector<2x8xf32>
    %1103 = arith.mulf %1102, %1101 : vector<2x8xf32>
    %1104 = math.tanh %1103 : vector<2x8xf32>
    %cst_405 = arith.constant 5.000000e-01 : f32
    %1105 = vector.broadcast %cst_405 : f32 to vector<2x8xf32>
    %1106 = arith.mulf %1105, %1104 : vector<2x8xf32>
    %cst_406 = arith.constant 5.000000e-01 : f32
    %1107 = vector.broadcast %cst_406 : f32 to vector<2x8xf32>
    %1108 = arith.addf %1106, %1107 : vector<2x8xf32>
    %1109 = vector.extract_strided_slice %1100 {offsets = [0, 8], sizes = [2, 8], strides = [1, 1]} : vector<2x32xf32> to vector<2x8xf32>
    %cst_407 = arith.constant 5.000000e-01 : f32
    %1110 = vector.broadcast %cst_407 : f32 to vector<2x8xf32>
    %1111 = arith.mulf %1110, %1109 : vector<2x8xf32>
    %1112 = math.tanh %1111 : vector<2x8xf32>
    %cst_408 = arith.constant 5.000000e-01 : f32
    %1113 = vector.broadcast %cst_408 : f32 to vector<2x8xf32>
    %1114 = arith.mulf %1113, %1112 : vector<2x8xf32>
    %cst_409 = arith.constant 5.000000e-01 : f32
    %1115 = vector.broadcast %cst_409 : f32 to vector<2x8xf32>
    %1116 = arith.addf %1114, %1115 : vector<2x8xf32>
    %1117 = vector.extract_strided_slice %1100 {offsets = [0, 16], sizes = [2, 8], strides = [1, 1]} : vector<2x32xf32> to vector<2x8xf32>
    %1118 = math.tanh %1117 : vector<2x8xf32>
    %1119 = vector.extract_strided_slice %1100 {offsets = [0, 24], sizes = [2, 8], strides = [1, 1]} : vector<2x32xf32> to vector<2x8xf32>
    %cst_410 = arith.constant 5.000000e-01 : f32
    %1120 = vector.broadcast %cst_410 : f32 to vector<2x8xf32>
    %1121 = arith.mulf %1120, %1119 : vector<2x8xf32>
    %1122 = math.tanh %1121 : vector<2x8xf32>
    %cst_411 = arith.constant 5.000000e-01 : f32
    %1123 = vector.broadcast %cst_411 : f32 to vector<2x8xf32>
    %1124 = arith.mulf %1123, %1122 : vector<2x8xf32>
    %cst_412 = arith.constant 5.000000e-01 : f32
    %1125 = vector.broadcast %cst_412 : f32 to vector<2x8xf32>
    %1126 = arith.addf %1124, %1125 : vector<2x8xf32>
    %1127 = arith.mulf %1116, %1094 : vector<2x8xf32>
    %1128 = arith.mulf %1108, %1118 : vector<2x8xf32>
    %1129 = arith.addf %1127, %1128 : vector<2x8xf32>
    %1130 = math.tanh %1129 : vector<2x8xf32>
    %1131 = arith.mulf %1126, %1130 : vector<2x8xf32>
    %c2_413 = arith.constant 2 : index
    %c0_414 = arith.constant 0 : index
    %1132 = vector.load %arg9[%c2_413, %c0_414] : memref<16x8xf32, #tpu.memory_space<vmem>>, vector<2x8xf32>
    tpu.vector_store %arg9[%c2_413, %c0_414], %1131 {strides = array<i32>} : memref<16x8xf32, #tpu.memory_space<vmem>>, vector<2x8xf32>,
    %1133 = vector.extract_strided_slice %883 {offsets = [0, 0], sizes = [2, 32], strides = [1, 1]} : vector<16x32xf32> to vector<2x32xf32>
    %cst_415 = arith.constant dense<0.000000e+00> : vector<2x32xf32>
    %1134 = tpu.matmul %1131, %885, %cst_415 {dimension_numbers = #tpu.dot_dimension_numbers<[1], [0], [0], [1], [0, 0, 1, 1], [], []>} : vector<2x8xf32>, vector<8x32xf32>, vector<2x32xf32> -> vector<2x32xf32>
    %1135 = arith.addf %1133, %1134 : vector<2x32xf32>
    %1136 = vector.extract_strided_slice %1135 {offsets = [0, 0], sizes = [2, 8], strides = [1, 1]} : vector<2x32xf32> to vector<2x8xf32>
    %cst_416 = arith.constant 5.000000e-01 : f32
    %1137 = vector.broadcast %cst_416 : f32 to vector<2x8xf32>
    %1138 = arith.mulf %1137, %1136 : vector<2x8xf32>
    %1139 = math.tanh %1138 : vector<2x8xf32>
    %cst_417 = arith.constant 5.000000e-01 : f32
    %1140 = vector.broadcast %cst_417 : f32 to vector<2x8xf32>
    %1141 = arith.mulf %1140, %1139 : vector<2x8xf32>
    %cst_418 = arith.constant 5.000000e-01 : f32
    %1142 = vector.broadcast %cst_418 : f32 to vector<2x8xf32>
    %1143 = arith.addf %1141, %1142 : vector<2x8xf32>
    %1144 = vector.extract_strided_slice %1135 {offsets = [0, 8], sizes = [2, 8], strides = [1, 1]} : vector<2x32xf32> to vector<2x8xf32>
    %cst_419 = arith.constant 5.000000e-01 : f32
    %1145 = vector.broadcast %cst_419 : f32 to vector<2x8xf32>
    %1146 = arith.mulf %1145, %1144 : vector<2x8xf32>
    %1147 = math.tanh %1146 : vector<2x8xf32>
    %cst_420 = arith.constant 5.000000e-01 : f32
    %1148 = vector.broadcast %cst_420 : f32 to vector<2x8xf32>
    %1149 = arith.mulf %1148, %1147 : vector<2x8xf32>
    %cst_421 = arith.constant 5.000000e-01 : f32
    %1150 = vector.broadcast %cst_421 : f32 to vector<2x8xf32>
    %1151 = arith.addf %1149, %1150 : vector<2x8xf32>
    %1152 = vector.extract_strided_slice %1135 {offsets = [0, 16], sizes = [2, 8], strides = [1, 1]} : vector<2x32xf32> to vector<2x8xf32>
    %1153 = math.tanh %1152 : vector<2x8xf32>
    %1154 = vector.extract_strided_slice %1135 {offsets = [0, 24], sizes = [2, 8], strides = [1, 1]} : vector<2x32xf32> to vector<2x8xf32>
    %cst_422 = arith.constant 5.000000e-01 : f32
    %1155 = vector.broadcast %cst_422 : f32 to vector<2x8xf32>
    %1156 = arith.mulf %1155, %1154 : vector<2x8xf32>
    %1157 = math.tanh %1156 : vector<2x8xf32>
    %cst_423 = arith.constant 5.000000e-01 : f32
    %1158 = vector.broadcast %cst_423 : f32 to vector<2x8xf32>
    %1159 = arith.mulf %1158, %1157 : vector<2x8xf32>
    %cst_424 = arith.constant 5.000000e-01 : f32
    %1160 = vector.broadcast %cst_424 : f32 to vector<2x8xf32>
    %1161 = arith.addf %1159, %1160 : vector<2x8xf32>
    %1162 = arith.mulf %1151, %1129 : vector<2x8xf32>
    %1163 = arith.mulf %1143, %1153 : vector<2x8xf32>
    %1164 = arith.addf %1162, %1163 : vector<2x8xf32>
    %1165 = math.tanh %1164 : vector<2x8xf32>
    %1166 = arith.mulf %1161, %1165 : vector<2x8xf32>
    %c0_425 = arith.constant 0 : index
    %c0_426 = arith.constant 0 : index
    %1167 = vector.load %arg9[%c0_425, %c0_426] : memref<16x8xf32, #tpu.memory_space<vmem>>, vector<2x8xf32>
    tpu.vector_store %arg9[%c0_425, %c0_426], %1166 {strides = array<i32>} : memref<16x8xf32, #tpu.memory_space<vmem>>, vector<2x8xf32>,
    %c0_427 = arith.constant 0 : index
    %c0_428 = arith.constant 0 : index
    %1168 = vector.load %arg8[%c0_427, %c0_428] : memref<16x8xf32, #tpu.memory_space<vmem>>, vector<16x8xf32>
    %c0_429 = arith.constant 0 : index
    %c0_430 = arith.constant 0 : index
    %1169 = vector.load %arg9[%c0_429, %c0_430] : memref<16x8xf32, #tpu.memory_space<vmem>>, vector<16x8xf32>
    %1170 = tpu.concatenate %1168, %1169 in 1 : vector<16x8xf32>, vector<16x8xf32> -> vector<16x16xf32>
    %c0_431 = arith.constant 0 : index
    %c0_432 = arith.constant 0 : index
    %1171 = vector.load %arg5[%c0_431, %c0_432] : memref<16x16xf32, #tpu.memory_space<vmem>>, vector<16x16xf32>
    tpu.vector_store %arg5[%c0_431, %c0_432], %1170 {strides = array<i32>} : memref<16x16xf32, #tpu.memory_space<vmem>>, vector<16x16xf32>,
    return
  }
  func.func @transform_0(%arg0: i32) -> (i32, i32) {
    %c0_i32 = arith.constant 0 : i32
    %c0_i32_0 = arith.constant 0 : i32
    %c0_i32_1 = arith.constant 0 : i32
    return %c0_i32, %c0_i32_0 : i32, i32
  }
  func.func @transform_1(%arg0: i32) -> (i32, i32, i32) {
    %c0_i32 = arith.constant 0 : i32
    %c0_i32_0 = arith.constant 0 : i32
    %c0_i32_1 = arith.constant 0 : i32
    %c0_i32_2 = arith.constant 0 : i32
    return %c0_i32, %c0_i32_0, %c0_i32_1 : i32, i32, i32
  }
  func.func @transform_2(%arg0: i32) -> (i32, i32, i32) {
    %c0_i32 = arith.constant 0 : i32
    %c0_i32_0 = arith.constant 0 : i32
    %c0_i32_1 = arith.constant 0 : i32
    %c0_i32_2 = arith.constant 0 : i32
    return %c0_i32, %c0_i32_0, %c0_i32_1 : i32, i32, i32
  }
  func.func @transform_3(%arg0: i32) -> (i32, i32, i32) {
    %c0_i32 = arith.constant 0 : i32
    %c0_i32_0 = arith.constant 0 : i32
    %c0_i32_1 = arith.constant 0 : i32
    %c0_i32_2 = arith.constant 0 : i32
    return %c0_i32, %c0_i32_0, %c0_i32_1 : i32, i32, i32
  }
  func.func @transform_4(%arg0: i32) -> (i32, i32) {
    %c0_i32 = arith.constant 0 : i32
    %c0_i32_0 = arith.constant 0 : i32
    %c0_i32_1 = arith.constant 0 : i32
    return %c0_i32, %c0_i32_0 : i32, i32
  }
}

module attributes {stable_mosaic.version = 11 : i64} {
  func.func @_conv_taps_kernel(%arg0: i32, %arg1: memref<48x128xf32, #tpu.memory_space<vmem>>, %arg2: memref<8x48xf32, #tpu.memory_space<vmem>>, %arg3: memref<8x1xf32, #tpu.memory_space<vmem>>, %arg4: memref<8x128xf32, #tpu.memory_space<vmem>>) attributes {dimension_semantics = [#tpu.dimension_semantics<parallel>], iteration_bounds = array<i64: 1>, scalar_prefetch = 0 : i64, scratch_operands = 0 : i64, tpu.core_type = #tpu.core_type<tc>, window_params = [{transform_indices = @transform_0, window_bounds = array<i64: 48, 128>}, {pipeline_mode = #tpu.pipeline_mode<synchronous>, transform_indices = @transform_1, window_bounds = array<i64: 8, 48>}, {pipeline_mode = #tpu.pipeline_mode<synchronous>, transform_indices = @transform_2, window_bounds = array<i64: 8, 1>}, {transform_indices = @transform_3, window_bounds = array<i64: 8, 128>}]} {
    %c0 = arith.constant 0 : index
    %c0_0 = arith.constant 0 : index
    %0 = vector.load %arg2[%c0, %c0_0] : memref<8x48xf32, #tpu.memory_space<vmem>>, vector<8x48xf32>
    %c0_1 = arith.constant 0 : index
    %c0_2 = arith.constant 0 : index
    %1 = vector.load %arg1[%c0_1, %c0_2] : memref<48x128xf32, #tpu.memory_space<vmem>>, vector<48x128xf32>
    %cst = arith.constant dense<0.000000e+00> : vector<8x128xf32>
    %2 = tpu.matmul %0, %1, %cst {dimension_numbers = #tpu.dot_dimension_numbers<[1], [0], [0], [1], [0, 0, 1, 1], [], []>} : vector<8x48xf32>, vector<48x128xf32>, vector<8x128xf32> -> vector<8x128xf32>
    %c0_3 = arith.constant 0 : index
    %c0_4 = arith.constant 0 : index
    %3 = vector.load %arg3[%c0_3, %c0_4] : memref<8x1xf32, #tpu.memory_space<vmem>>, vector<8x1xf32>
    %4 = vector.broadcast %3 : vector<8x1xf32> to vector<8x128xf32>
    %5 = arith.addf %2, %4 : vector<8x128xf32>
    %c0_5 = arith.constant 0 : index
    %c0_6 = arith.constant 0 : index
    %6 = vector.load %arg4[%c0_5, %c0_6] : memref<8x128xf32, #tpu.memory_space<vmem>>, vector<8x128xf32>
    tpu.vector_store %arg4[%c0_5, %c0_6], %5 {strides = array<i32>} : memref<8x128xf32, #tpu.memory_space<vmem>>, vector<8x128xf32>,
    return
  }
  func.func @transform_0(%arg0: i32) -> (i32, i32) {
    %c0_i32 = arith.constant 0 : i32
    %c0_i32_0 = arith.constant 0 : i32
    return %c0_i32, %arg0 : i32, i32
  }
  func.func @transform_1(%arg0: i32) -> (i32, i32) {
    %c0_i32 = arith.constant 0 : i32
    %c0_i32_0 = arith.constant 0 : i32
    %c0_i32_1 = arith.constant 0 : i32
    return %c0_i32, %c0_i32_0 : i32, i32
  }
  func.func @transform_2(%arg0: i32) -> (i32, i32) {
    %c0_i32 = arith.constant 0 : i32
    %c0_i32_0 = arith.constant 0 : i32
    %c0_i32_1 = arith.constant 0 : i32
    return %c0_i32, %c0_i32_0 : i32, i32
  }
  func.func @transform_3(%arg0: i32) -> (i32, i32) {
    %c0_i32 = arith.constant 0 : i32
    %c0_i32_0 = arith.constant 0 : i32
    return %c0_i32, %arg0 : i32, i32
  }
}

</mosaic_0001>

<bundles_post_ra>
// kernel: net_vgg_forward.7
= control target key start
LH: loop header
LB: loop body
LE: loop exit
PB: predicated region body
PF: predicated region fallthrough
CT: control target
= control target key end

     0   :  { %vm202_vm0 = vcmask 1044480   ;;  %vm203_vm1 = vcmask 1045504   ;;  %v677_v2 = vmov 65535   ;;  %v678_v8 = vmov 0   ;;  %s1015_s0 = inlined_call_operand.vmem [shape: bf16[27,2048], index: 0, kind: input, shape index: {}]   ;;  %s1016_s2 = inlined_call_operand.vmem [shape: f32[8,1], index: 2, kind: input, shape index: {}]   ;;  %s1017_s1 = inlined_call_operand.vmem [shape: bf16[8,27], index: 1, kind: input, shape index: {}]   ;;  %s1018_s3 = inlined_call_operand.vmem [shape: f32[8,2048], index: 3, kind: output, shape index: {}]  }
   0x1   :  { %v564_v0 = vld [vmem:[%s1015_s0 + $0x80] sm:$0xf]  ;;  %v204_v3 = vsel %vm202_vm0, 4294967295, %v677_v2  ;;  %v658_v6 = vld [vmem:[%s1015_s0 + $0x84] sm:$0xf]  ;;  %676 = vset.pattern.permute.xlu0 %v678_v8  ;;  %vm198_vm2 = vcmask 220160  }
   0x2   :  { %v666_v1 = vld [vmem:[%s1015_s0 + $0xbc] sm:$0x30]  ;;  %v705_v5 = vsel %vm203_vm1, %v204_v3, 0  ;;  %v566_v7 = vld [vmem:[%s1015_s0 + $0xc0] sm:$0x30] }
   0x3   :  { %v565_v4 = vor.u32 %v666_v1, %v564_v0  ;;  %v48_v9 = vld [vmem:[%s1016_s2] sm:$0xff]  ;;  %v569_v10 = vor.u32 %v658_v6, %v566_v7  ;;  %v572_v11 = vld [vmem:[%s1015_s0 + $0x88] sm:$0xf]  ;;  %v659_v13 = vld [vmem:[%s1015_s0 + $0x8c] sm:$0xf] }
   0x4   :  { %v667_v12 = vld [vmem:[%s1015_s0 + $0xc4] sm:$0x30]  ;;  %51 = vperm.xlu0 %676, %v48_v9   ;;  %v574_v16 = vld [vmem:[%s1015_s0 + $0xc8] sm:$0x30]  ;;  %v500_v17 = vld [vmem:[%s1015_s0] sm:$0xf] }
   0x5   :  { %v207_v14 = vand.u32 %v565_v4, %v705_v5  ;;  %v573_v15 = vor.u32 %v667_v12, %v572_v11  ;;  %v650_v18 = vld [vmem:[%s1015_s0 + $0x3c] sm:$0xf0]  ;;  %v210_v19 = vand.u32 %v569_v10, %v705_v5  ;;  %v577_v20 = vor.u32 %v659_v13, %v574_v16  ;;  %v642_v21 = vld [vmem:[%s1015_s0 + $0x4] sm:$0xf]  ;;  %v508_v23 = vld [vmem:[%s1015_s0 + $0x8] sm:$0xf] }
   0x6   :  { %v502_v22 = vld [vmem:[%s1015_s0 + $0x40] sm:$0xf0]  ;;  %v501_v25 = vor.u32 %v650_v18, %v500_v17  ;;  %v651_v26 = vld [vmem:[%s1015_s0 + $0x44] sm:$0xf0]  ;;  %v643_v27 = vld [vmem:[%s1015_s0 + $0xc] sm:$0xf] }
   0x7   :  { %260 = vmatpush.bf16.msra.mxu0 %v207_v14  ;;  %v213_v24 = vand.u32 %v573_v15, %v705_v5  ;;  %v510_v28 = vld [vmem:[%s1015_s0 + $0x48] sm:$0xf0]  ;;  %273 = vmatpush.bf16.msra.mxu1 %v210_v19  ;;  %v216_v29 = vand.u32 %v577_v20, %v705_v5  ;;  %v505_v30 = vor.u32 %v642_v21, %v502_v22  ;;  %v588_v31 = vld [vmem:[%s1015_s0 + $0x98] sm:$0xf]  ;;  %v765_v34 = vld [vmem:[%s1017_s1] sm:$0xf] }
   0x8   :  { %v669_v32 = vld [vmem:[%s1015_s0 + $0xd4] sm:$0x30]  ;;  %v509_v33 = vor.u32 %v651_v26, %v508_v23  ;;  %v661_v36 = vld [vmem:[%s1015_s0 + $0x9c] sm:$0xf]  ;;  %v580_v38 = vld [vmem:[%s1015_s0 + $0x90] sm:$0xf]  ;;  %v513_v39 = vor.u32 %v643_v27, %v510_v28 }
   0x9   :  { %286 = vmatpush.bf16.msra.mxu2 %v213_v24  ;;  %v589_v35 = vor.u32 %v669_v32, %v588_v31  ;;  %v590_v37 = vld [vmem:[%s1015_s0 + $0xd8] sm:$0x30]  ;;  %299 = vmatpush.bf16.msra.mxu3 %v216_v29  ;;  %v668_v41 = vld [vmem:[%s1015_s0 + $0xcc] sm:$0x30]  ;;  %v660_v42 = vld [vmem:[%s1015_s0 + $0x94] sm:$0xf] }
   0xa   :  { %v593_v40 = vor.u32 %v661_v36, %v590_v37  ;;  %v582_v43 = vld [vmem:[%s1015_s0 + $0xd0] sm:$0x30]  ;;  %v581_v45 = vor.u32 %v668_v41, %v580_v38  ;;  %v524_v47 = vld [vmem:[%s1015_s0 + $0x18] sm:$0xf]  ;;  %v645_v49 = vld [vmem:[%s1015_s0 + $0x1c] sm:$0xf] }
   0xb   :  { %261 = vmatpush.bf16.msra.mxu0 %v501_v25  ;;  %v225_v44 = vand.u32 %v589_v35, %v705_v5  ;;  %v585_v46 = vor.u32 %v660_v42, %v582_v43  ;;  %v653_v48 = vld [vmem:[%s1015_s0 + $0x54] sm:$0xf0]  ;;  %274 = vmatpush.bf16.msra.mxu1 %v505_v30  ;;  %v526_v51 = vld [vmem:[%s1015_s0 + $0x58] sm:$0xf0]  ;;  %v516_v52 = vld [vmem:[%s1015_s0 + $0x10] sm:$0xf] }
   0xc   :  { %v228_v50 = vand.u32 %v593_v40, %v705_v5  ;;  %v652_v53 = vld [vmem:[%s1015_s0 + $0x4c] sm:$0xf0]  ;;  %v219_v54 = vand.u32 %v581_v45, %v705_v5  ;;  %v644_v55 = vld [vmem:[%s1015_s0 + $0x14] sm:$0xf]  ;;  %v604_v57 = vld [vmem:[%s1015_s0 + $0xa8] sm:$0xf]  ;;  %v525_v62 = vor.u32 %v653_v48, %v524_v47  ;;  %v529_v4 = vor.u32 %v645_v49, %v526_v51 }
   0xd   :  { %287 = vmatpush.bf16.msra.mxu2 %v509_v33  ;;  %v518_v56 = vld [vmem:[%s1015_s0 + $0x50] sm:$0xf0]  ;;  %300 = vmatpush.bf16.msra.mxu3 %v513_v39  ;;  %v222_v58 = vand.u32 %v585_v46, %v705_v5  ;;  %v671_v59 = vld [vmem:[%s1015_s0 + $0xe4] sm:$0x30]  ;;  %v663_v60 = vld [vmem:[%s1015_s0 + $0xac] sm:$0xf]  ;;  %v517_v6 = vor.u32 %v652_v53, %v516_v52 }
   0xe   :  { %626 = vmatmul.msk.bf16.vlgmr.msra.gmra.mxu0 %vm198_vm2, %v765_v34  ;;  %v606_v61 = vld [vmem:[%s1015_s0 + $0xe8] sm:$0x30]  ;;  %627 = vmatmul.msk.bf16.vlgmr.msra.gmra.mxu1 %vm198_vm2, %v765_v34  ;;  %v605_v63 = vor.u32 %v671_v59, %v604_v57  ;;  %v596_v1 = vld [vmem:[%s1015_s0 + $0xa0] sm:$0xf]  ;;  %v662_v3 = vld [vmem:[%s1015_s0 + $0xa4] sm:$0xf]  ;;  %v521_v14 = vor.u32 %v644_v55, %v518_v56 }
   0xf   :  { %v609_v0 = vor.u32 %v663_v60, %v606_v61  ;;  %v670_v2 = vld [vmem:[%s1015_s0 + $0xdc] sm:$0x30]  ;;  %v598_v8 = vld [vmem:[%s1015_s0 + $0xe0] sm:$0x30]  ;;  %312 = vmatpush.bf16.msrb.mxu0 %v219_v54  ;;  %v540_v12 = vld [vmem:[%s1015_s0 + $0x28] sm:$0xf]  ;;  %325 = vmatpush.bf16.msrb.mxu1 %v222_v58 }
  0x10   :  { %628 = vmatmul.msk.bf16.vlgmr.msra.gmra.mxu2 %vm198_vm2, %v765_v34  ;;  %v597_v7 = vor.u32 %v670_v2, %v596_v1  ;;  %629 = vmatmul.msk.bf16.vlgmr.msra.gmra.mxu3 %vm198_vm2, %v765_v34  ;;  %v237_v9 = vand.u32 %v605_v63, %v705_v5  ;;  %v601_v11 = vor.u32 %v662_v3, %v598_v8  ;;  %v655_v13 = vld [vmem:[%s1015_s0 + $0x64] sm:$0xf0]  ;;  %v647_v16 = vld [vmem:[%s1015_s0 + $0x2c] sm:$0xf]  ;;  %v532_v19 = vld [vmem:[%s1015_s0 + $0x20] sm:$0xf] }
  0x11   :  { %338 = vmatpush.bf16.msrb.mxu2 %v225_v44  ;;  %351 = vmatpush.bf16.msrb.mxu3 %v228_v50  ;;  %v240_v10 = vand.u32 %v609_v0, %v705_v5  ;;  %v542_v17 = vld [vmem:[%s1015_s0 + $0x68] sm:$0xf0]  ;;  %v654_v20 = vld [vmem:[%s1015_s0 + $0x5c] sm:$0xf0]  ;;  %v646_v21 = vld [vmem:[%s1015_s0 + $0x24] sm:$0xf]  ;;  %v541_v22 = vor.u32 %v655_v13, %v540_v12 }
  0x12   :  { %v231_v15 = vand.u32 %v597_v7, %v705_v5  ;;  %v234_v18 = vand.u32 %v601_v11, %v705_v5  ;;  %v534_v23 = vld [vmem:[%s1015_s0 + $0x60] sm:$0xf0]  ;;  %v612_v24 = vld [vmem:[%s1015_s0 + $0xb0] sm:$0xf]  ;;  %v545_v26 = vor.u32 %v647_v16, %v542_v17  ;;  %v664_v27 = vld [vmem:[%s1015_s0 + $0xb4] sm:$0xf]  ;;  %v533_v29 = vor.u32 %v654_v20, %v532_v19 }
  0x13   :  { %v672_v25 = vld [vmem:[%s1015_s0 + $0xec] sm:$0x30]  ;;  %313 = vmatpush.bf16.msrb.mxu0 %v517_v6  ;;  %v614_v28 = vld [vmem:[%s1015_s0 + $0xf0] sm:$0x30]  ;;  %326 = vmatpush.bf16.msrb.mxu1 %v521_v14  ;;  %v620_v30 = vld [vmem:[%s1015_s0 + $0xb8] sm:$0xf]  ;;  %v537_v32 = vor.u32 %v646_v21, %v534_v23 }
  0x14   :  { %v673_v31 = vld [vmem:[%s1015_s0 + $0xf4] sm:$0x30]  ;;  %v665_v33 = vld [vmem:[%s1015_s0 + $0xbc] sm:$0xf]  ;;  %v613_v36 = vor.u32 %v672_v25, %v612_v24  ;;  %v617_v37 = vor.u32 %v664_v27, %v614_v28  ;;  %v548_v42 = vld [vmem:[%s1015_s0 + $0x30] sm:$0xf] }
  0x15   :  { %339 = vmatpush.bf16.msrb.mxu2 %v525_v62  ;;  %352 = vmatpush.bf16.msrb.mxu3 %v529_v4  ;;  %v622_v35 = vld [vmem:[%s1015_s0 + $0xf8] sm:$0x30]  ;;  %v621_v38 = vor.u32 %v673_v31, %v620_v30  ;;  %v656_v43 = vld [vmem:[%s1015_s0 + $0x6c] sm:$0xf0]  ;;  %v648_v45 = vld [vmem:[%s1015_s0 + $0x34] sm:$0xf] }
  0x16   :  { %v625_v39 = vor.u32 %v665_v33, %v622_v35  ;;  %v243_v40 = vand.u32 %v613_v36, %v705_v5  ;;  %v246_v41 = vand.u32 %v617_v37, %v705_v5  ;;  %v550_v46 = vld [vmem:[%s1015_s0 + $0x70] sm:$0xf0]  ;;  %v556_v48 = vld [vmem:[%s1015_s0 + $0x38] sm:$0xf]  ;;  %v649_v50 = vld [vmem:[%s1015_s0 + $0x3c] sm:$0xf]  ;;  %v549_v51 = vor.u32 %v656_v43, %v548_v42 }
  0x17   :  { %364 = vmatpush.bf16.msra.mxu0 %v231_v15  ;;  %377 = vmatpush.bf16.msra.mxu1 %v234_v18  ;;  %v249_v44 = vand.u32 %v621_v38, %v705_v5  ;;  %v657_v49 = vld [vmem:[%s1015_s0 + $0x74] sm:$0xf0]  ;;  %v553_v52 = vor.u32 %v648_v45, %v550_v46 }
  0x18   :  { %v252_v47 = vand.u32 %v625_v39, %v705_v5  ;;  %v558_v5 = vld [vmem:[%s1015_s0 + $0x78] sm:$0xf0]  ;;  %v557_v53 = vor.u32 %v657_v49, %v556_v48 }
  0x19   :  { %390 = vmatpush.bf16.msra.mxu2 %v237_v9  ;;  %403 = vmatpush.bf16.msra.mxu3 %v240_v10  ;;  %v561_v54 = vor.u32 %v649_v50, %v558_v5 }
  0x1b   :  { %365 = vmatpush.bf16.msra.mxu0 %v533_v29  ;;  %378 = vmatpush.bf16.msra.mxu1 %v537_v32 }
  0x1d   :  { %391 = vmatpush.bf16.msra.mxu2 %v541_v22  ;;  %404 = vmatpush.bf16.msra.mxu3 %v545_v26 }
  0x1e   :  { %630 = vmatmul.msk.bf16.vlgmr.msrb.gmra.mxu0 %vm198_vm2, %v765_v34  ;;  %631 = vmatmul.msk.bf16.vlgmr.msrb.gmra.mxu1 %vm198_vm2, %v765_v34 }
  0x1f   :  { %416 = vmatpush.bf16.msrb.mxu0 %v243_v40  ;;  %429 = vmatpush.bf16.msrb.mxu1 %v246_v41 }
  0x20   :  { %632 = vmatmul.msk.bf16.vlgmr.msrb.gmra.mxu2 %vm198_vm2, %v765_v34  ;;  %633 = vmatmul.msk.bf16.vlgmr.msrb.gmra.mxu3 %vm198_vm2, %v765_v34 }
  0x21   :  { %442 = vmatpush.bf16.msrb.mxu2 %v249_v44  ;;  %455 = vmatpush.bf16.msrb.mxu3 %v252_v47 }
  0x23   :  { %417 = vmatpush.bf16.msrb.mxu0 %v549_v51  ;;  %430 = vmatpush.bf16.msrb.mxu1 %v553_v52 }
  0x25   :  { %443 = vmatpush.bf16.msrb.mxu2 %v557_v53  ;;  %456 = vmatpush.bf16.msrb.mxu3 %v561_v54 }
  0x2e   :  { %634 = vmatmul.msk.bf16.vlgmr.msra.gmra.mxu0 %vm198_vm2, %v765_v34  ;;  %635 = vmatmul.msk.bf16.vlgmr.msra.gmra.mxu1 %vm198_vm2, %v765_v34 }
  0x30   :  { %636 = vmatmul.msk.bf16.vlgmr.msra.gmra.mxu2 %vm198_vm2, %v765_v34  ;;  %637 = vmatmul.msk.bf16.vlgmr.msra.gmra.mxu3 %vm198_vm2, %v765_v34 }
  0x3e   :  { %638 = vmatmul.msk.bf16.vlgmr.msrb.gmra.mxu0 %vm198_vm2, %v765_v34  ;;  %639 = vmatmul.msk.bf16.vlgmr.msrb.gmra.mxu1 %vm198_vm2, %v765_v34 }
  0x40   :  { %640 = vmatmul.msk.bf16.vlgmr.msrb.gmra.mxu2 %vm198_vm2, %v765_v34  ;;  %641 = vmatmul.msk.bf16.vlgmr.msrb.gmra.mxu3 %vm198_vm2, %v765_v34 }
  0x76   :  { %v949_v55 = vpop.permute.xlu0 %51 }
  0x8b   :  { %v263_v56 = vpop.f32.mrf.mxu0  ;;  %v276_v57 = vpop.f32.mrf.mxu1 }
  0x8c   :  { %v264_v58 = vadd.f32 %v263_v56, %v949_v55  ;;  %v277_v59 = vadd.f32 %v276_v57, %v949_v55 }
  0x8e   :  { %v462_v60 = vmax.f32 %v264_v58, 0.0  ;;  %v463_v61 = vmax.f32 %v277_v59, 0.0 }
  0x90   :  { %478 = vst [vmem:[%s1018_s3] sm:$0xff] %v462_v60 }
  0x91   :  { %479 = vst [vmem:[%s1018_s3 + $0x8] sm:$0xff] %v463_v61 }
  0x93   :  { %v289_v62 = vpop.f32.mrf.mxu2  ;;  %v265_v34 = vpop.f32.mrf.mxu0 }
  0x94   :  { %v290_v63 = vadd.f32 %v289_v62, %v949_v55  ;;  %v302_v0 = vpop.f32.mrf.mxu3  ;;  %v278_v1 = vpop.f32.mrf.mxu1 }
  0x95   :  { %v303_v2 = vadd.f32 %v302_v0, %v949_v55 }
  0x96   :  { %v464_v3 = vmax.f32 %v290_v63, 0.0 }
  0x97   :  { %v465_v4 = vmax.f32 %v303_v2, 0.0 }
  0x98   :  { %480 = vst [vmem:[%s1018_s3 + $0x10] sm:$0xff] %v464_v3 }
  0x99   :  { %481 = vst [vmem:[%s1018_s3 + $0x18] sm:$0xff] %v465_v4 }
  0x9b   :  { %v291_v6 = vpop.f32.mrf.mxu2  ;;  %v315_v7 = vpop.f32.mrf.mxu0 }
  0x9c   :  { %v304_v8 = vpop.f32.mrf.mxu3  ;;  %v316_v9 = vadd.f32 %v315_v7, %v949_v55  ;;  %v328_v10 = vpop.f32.mrf.mxu1 }
  0x9d   :  { %v329_v11 = vadd.f32 %v328_v10, %v949_v55 }
  0x9e   :  { %v466_v12 = vmax.f32 %v316_v9, 0.0 }
  0x9f   :  { %v467_v13 = vmax.f32 %v329_v11, 0.0 }
  0xa0   :  { %482 = vst [vmem:[%s1018_s3 + $0x20] sm:$0xff] %v466_v12 }
  0xa1   :  { %483 = vst [vmem:[%s1018_s3 + $0x28] sm:$0xff] %v467_v13 }
  0xa3   :  { %v341_v14 = vpop.f32.mrf.mxu2  ;;  %v317_v15 = vpop.f32.mrf.mxu0 }
  0xa4   :  { %v342_v16 = vadd.f32 %v341_v14, %v949_v55  ;;  %v354_v17 = vpop.f32.mrf.mxu3  ;;  %v330_v18 = vpop.f32.mrf.mxu1 }
  0xa5   :  { %v355_v19 = vadd.f32 %v354_v17, %v949_v55 }
  0xa6   :  { %v468_v20 = vmax.f32 %v342_v16, 0.0 }
  0xa7   :  { %v469_v21 = vmax.f32 %v355_v19, 0.0 }
  0xa8   :  { %484 = vst [vmem:[%s1018_s3 + $0x30] sm:$0xff] %v468_v20 }
  0xa9   :  { %485 = vst [vmem:[%s1018_s3 + $0x38] sm:$0xff] %v469_v21 }
  0xab   :  { %v343_v22 = vpop.f32.mrf.mxu2  ;;  %v367_v23 = vpop.f32.mrf.mxu0 }
  0xac   :  { %v356_v24 = vpop.f32.mrf.mxu3  ;;  %v368_v25 = vadd.f32 %v367_v23, %v949_v55  ;;  %v380_v26 = vpop.f32.mrf.mxu1 }
  0xad   :  { %v381_v27 = vadd.f32 %v380_v26, %v949_v55 }
  0xae   :  { %v470_v28 = vmax.f32 %v368_v25, 0.0 }
  0xaf   :  { %v471_v29 = vmax.f32 %v381_v27, 0.0 }
  0xb0   :  { %486 = vst [vmem:[%s1018_s3 + $0x40] sm:$0xff] %v470_v28 }
  0xb1   :  { %487 = vst [vmem:[%s1018_s3 + $0x48] sm:$0xff] %v471_v29 }
  0xb3   :  { %v393_v30 = vpop.f32.mrf.mxu2  ;;  %v369_v31 = vpop.f32.mrf.mxu0 }
  0xb4   :  { %v394_v32 = vadd.f32 %v393_v30, %v949_v55  ;;  %v406_v33 = vpop.f32.mrf.mxu3  ;;  %v382_v35 = vpop.f32.mrf.mxu1 }
  0xb5   :  { %v407_v36 = vadd.f32 %v406_v33, %v949_v55 }
  0xb6   :  { %v472_v37 = vmax.f32 %v394_v32, 0.0 }
  0xb7   :  { %v473_v38 = vmax.f32 %v407_v36, 0.0 }
  0xb8   :  { %488 = vst [vmem:[%s1018_s3 + $0x50] sm:$0xff] %v472_v37 }
  0xb9   :  { %489 = vst [vmem:[%s1018_s3 + $0x58] sm:$0xff] %v473_v38 }
  0xbb   :  { %v395_v39 = vpop.f32.mrf.mxu2  ;;  %v419_v40 = vpop.f32.mrf.mxu0 }
  0xbc   :  { %v408_v41 = vpop.f32.mrf.mxu3  ;;  %v420_v42 = vadd.f32 %v419_v40, %v949_v55  ;;  %v432_v43 = vpop.f32.mrf.mxu1 }
  0xbd   :  { %v433_v44 = vadd.f32 %v432_v43, %v949_v55 }
  0xbe   :  { %v474_v45 = vmax.f32 %v420_v42, 0.0 }
  0xbf   :  { %v475_v46 = vmax.f32 %v433_v44, 0.0 }
  0xc0   :  { %490 = vst [vmem:[%s1018_s3 + $0x60] sm:$0xff] %v474_v45 }
  0xc1   :  { %491 = vst [vmem:[%s1018_s3 + $0x68] sm:$0xff] %v475_v46 }
  0xc3   :  { %v445_v47 = vpop.f32.mrf.mxu2  ;;  %v421_v48 = vpop.f32.mrf.mxu0 }
  0xc4   :  { %v446_v49 = vadd.f32 %v445_v47, %v949_v55  ;;  %v458_v50 = vpop.f32.mrf.mxu3  ;;  %v434_v5 = vpop.f32.mrf.mxu1 }
  0xc5   :  { %v459_v51 = vadd.f32 %v458_v50, %v949_v55 }
  0xc6   :  { %v476_v52 = vmax.f32 %v446_v49, 0.0 }
  0xc7   :  { %v477_v53 = vmax.f32 %v459_v51, 0.0 }
  0xc8   :  { %492 = vst [vmem:[%s1018_s3 + $0x70] sm:$0xff] %v476_v52 }
  0xc9   :  { %493 = vst [vmem:[%s1018_s3 + $0x78] sm:$0xff] %v477_v53 }
  0xcb   :  { %v447_v54 = vpop.f32.mrf.mxu2 }
  0xcc   :  { %v460_v56 = vpop.f32.mrf.mxu3 }

// kernel: net_vgg_forward.8
= control target key start
LH: loop header
LB: loop body
LE: loop exit
PB: predicated region body
PF: predicated region fallthrough
CT: control target
= control target key end

     0   :  { %v334_v2 = vmov 0   ;;  %vm146_vm0 = vcmask 1043456   ;;  %vm142_vm1 = vcmask 588800   ;;  %s494_s0 = inlined_call_operand.vmem [shape: bf16[72,512], index: 0, kind: input, shape index: {}]   ;;  %s495_s2 = inlined_call_operand.vmem [shape: f32[16,1], index: 2, kind: input, shape index: {}]   ;;  %s496_s1 = inlined_call_operand.vmem [shape: bf16[16,72], index: 1, kind: input, shape index: {}]   ;;  %s497_s3 = inlined_call_operand.vmem [shape: f32[16,512], index: 3, kind: output, shape index: {}]  }
   0x1   :  { %v33_v0 = vld [vmem:[%s494_s0 + $0x80] sm:$0xff]  ;;  %v34_v1 = vld [vmem:[%s494_s0 + $0x88] sm:$0xff]  ;;  %333 = vset.pattern.permute.xlu0 %v334_v2  ;;  %v330_v8 = vld [vmem:[%s494_s0 + $0x6c] sm:$0xf0] }
   0x2   :  { %v102_v3 = vunpack.c.l.b16 %v33_v0  ;;  %v103_v4 = vunpack.c.h.b16 %v33_v0  ;;  %v104_v5 = vunpack.c.l.b16 %v34_v1  ;;  %v105_v6 = vunpack.c.h.b16 %v34_v1  ;;  %v297_v7 = vld [vmem:[%s494_s0 + $0x60] sm:$0xf]  ;;  %v328_v13 = vld [vmem:[%s494_s0 + $0x64] sm:$0xf]  ;;  %v299_v14 = vld [vmem:[%s494_s0 + $0x70] sm:$0xf0] }
   0x3   :  { %v305_v15 = vld [vmem:[%s494_s0 + $0x68] sm:$0xf]  ;;  %v331_v16 = vld [vmem:[%s494_s0 + $0x74] sm:$0xf0]  ;;  %v329_v17 = vld [vmem:[%s494_s0 + $0x6c] sm:$0xf]  ;;  %v298_v23 = vor.u32 %v330_v8, %v297_v7  ;;  %v302_v24 = vor.u32 %v328_v13, %v299_v14 }
   0x4   :  { %v122_v9 = vpack.c.b16 %v102_v3, %v102_v3  ;;  %v123_v10 = vpack.c.b16 %v103_v4, %v103_v4  ;;  %v124_v11 = vpack.c.b16 %v104_v5, %v104_v5  ;;  %v125_v12 = vpack.c.b16 %v105_v6, %v105_v6  ;;  %v307_v18 = vld [vmem:[%s494_s0 + $0x78] sm:$0xf0]  ;;  %v281_v25 = vld [vmem:[%s494_s0 + $0x40] sm:$0xf]  ;;  %v326_v26 = vld [vmem:[%s494_s0 + $0x4c] sm:$0xf0] }
   0x5   :  { %v306_v27 = vor.u32 %v331_v16, %v305_v15  ;;  %v310_v28 = vor.u32 %v329_v17, %v307_v18  ;;  %v324_v29 = vld [vmem:[%s494_s0 + $0x44] sm:$0xf]  ;;  %v283_v30 = vld [vmem:[%s494_s0 + $0x50] sm:$0xf0]  ;;  %v289_v31 = vld [vmem:[%s494_s0 + $0x48] sm:$0xf]  ;;  %v282_v35 = vor.u32 %v326_v26, %v281_v25 }
   0x6   :  { %v148_v19 = vsel %vm146_vm0, %v122_v9, 0  ;;  %v151_v20 = vsel %vm146_vm0, %v123_v10, 0  ;;  %v154_v21 = vsel %vm146_vm0, %v124_v11, 0  ;;  %v157_v22 = vsel %vm146_vm0, %v125_v12, 0  ;;  %v327_v32 = vld [vmem:[%s494_s0 + $0x54] sm:$0xf0] }
   0x7   :  { %162 = vmatpush.bf16.msra.mxu0 %v148_v19  ;;  %176 = vmatpush.bf16.msra.mxu1 %v151_v20  ;;  %v325_v33 = vld [vmem:[%s494_s0 + $0x4c] sm:$0xf]  ;;  %v291_v34 = vld [vmem:[%s494_s0 + $0x58] sm:$0xf0]  ;;  %v286_v36 = vor.u32 %v324_v29, %v283_v30  ;;  %v265_v37 = vld [vmem:[%s494_s0 + $0x20] sm:$0xf]  ;;  %v290_v40 = vor.u32 %v327_v32, %v289_v31 }
   0x8   :  { %190 = vmatpush.bf16.msra.mxu2 %v154_v21  ;;  %204 = vmatpush.bf16.msra.mxu3 %v157_v22  ;;  %v322_v38 = vld [vmem:[%s494_s0 + $0x2c] sm:$0xf0]  ;;  %v320_v39 = vld [vmem:[%s494_s0 + $0x24] sm:$0xf]  ;;  %v294_v41 = vor.u32 %v325_v33, %v291_v34  ;;  %v267_v42 = vld [vmem:[%s494_s0 + $0x30] sm:$0xf0] }
   0x9   :  { %v273_v43 = vld [vmem:[%s494_s0 + $0x28] sm:$0xf]  ;;  %v323_v44 = vld [vmem:[%s494_s0 + $0x34] sm:$0xf0]  ;;  %v321_v45 = vld [vmem:[%s494_s0 + $0x2c] sm:$0xf]  ;;  %v266_v48 = vor.u32 %v322_v38, %v265_v37  ;;  %v270_v49 = vor.u32 %v320_v39, %v267_v42 }
   0xa   :  { %v275_v46 = vld [vmem:[%s494_s0 + $0x38] sm:$0xf0]  ;;  %v35_v47 = vld [vmem:[%s495_s2] sm:$0xff]  ;;  %v318_v51 = vld [vmem:[%s494_s0 + $0xc] sm:$0xf0]  ;;  %v274_v52 = vor.u32 %v323_v44, %v273_v43 }
   0xb   :  { %163 = vmatpush.bf16.msra.mxu0 %v298_v23  ;;  %177 = vmatpush.bf16.msra.mxu1 %v302_v24  ;;  %v249_v50 = vld [vmem:[%s494_s0] sm:$0xf]  ;;  %v278_v53 = vor.u32 %v321_v45, %v275_v46  ;;  %v316_v54 = vld [vmem:[%s494_s0 + $0x4] sm:$0xf]  ;;  %v251_v55 = vld [vmem:[%s494_s0 + $0x10] sm:$0xf0] }
   0xc   :  { %191 = vmatpush.bf16.msra.mxu2 %v306_v27  ;;  %205 = vmatpush.bf16.msra.mxu3 %v310_v28  ;;  %v257_v56 = vld [vmem:[%s494_s0 + $0x8] sm:$0xf]  ;;  %v319_v57 = vld [vmem:[%s494_s0 + $0x14] sm:$0xf0]  ;;  %v317_v58 = vld [vmem:[%s494_s0 + $0xc] sm:$0xf]  ;;  %v250_v60 = vor.u32 %v318_v51, %v249_v50  ;;  %v254_v61 = vor.u32 %v316_v54, %v251_v55 }
   0xd   :  { %39 = vperm.xlu0 %333, %v35_v47   ;;  %v259_v59 = vld [vmem:[%s494_s0 + $0x18] sm:$0xf0]  ;;  %v36_v62 = vld [vmem:[%s495_s2 + $0x8] sm:$0xff]  ;;  %v258_v63 = vor.u32 %v319_v57, %v257_v56  ;;  %v315_v1 = vld [vmem:[%s496_s1] sm:$0xff] }
   0xe   :  { %v262_v0 = vor.u32 %v317_v58, %v259_v59 }
   0xf   :  { %164 = vmatpush.bf16.msra.mxu0 %v282_v35  ;;  %178 = vmatpush.bf16.msra.mxu1 %v286_v36 }
  0x10   :  { %192 = vmatpush.bf16.msra.mxu2 %v290_v40  ;;  %206 = vmatpush.bf16.msra.mxu3 %v294_v41 }
  0x13   :  { %165 = vmatpush.bf16.msra.mxu0 %v266_v48  ;;  %179 = vmatpush.bf16.msra.mxu1 %v270_v49 }
  0x14   :  { %193 = vmatpush.bf16.msra.mxu2 %v274_v52  ;;  %207 = vmatpush.bf16.msra.mxu3 %v278_v53 }
  0x15   :  { %44 = vperm.xlu0 %333, %v36_v62  }
  0x17   :  { %166 = vmatpush.bf16.msra.mxu0 %v250_v60  ;;  %180 = vmatpush.bf16.msra.mxu1 %v254_v61 }
  0x18   :  { %194 = vmatpush.bf16.msra.mxu2 %v258_v63  ;;  %208 = vmatpush.bf16.msra.mxu3 %v262_v0 }
  0x1a   :  { %311 = vmatmul.msk.bf16.vlgmr.msra.gmra.mxu0 %vm142_vm1, %v315_v1  ;;  %312 = vmatmul.msk.bf16.vlgmr.msra.gmra.mxu1 %vm142_vm1, %v315_v1 }
  0x1b   :  { %313 = vmatmul.msk.bf16.vlgmr.msra.gmra.mxu2 %vm142_vm1, %v315_v1  ;;  %314 = vmatmul.msk.bf16.vlgmr.msra.gmra.mxu3 %vm142_vm1, %v315_v1 }
  0x7f   :  { %v40_v2 = vpop.permute.xlu0 %39 }
  0x87   :  { %v45_v11 = vpop.permute.xlu0 %44 }
  0x97   :  { %v168_v3 = vpop.f32.mrf.mxu0  ;;  %v182_v4 = vpop.f32.mrf.mxu1 }
  0x98   :  { %v169_v5 = vadd.f32 %v168_v3, %v40_v2  ;;  %v183_v6 = vadd.f32 %v182_v4, %v40_v2 }
  0x9a   :  { %v215_v7 = vmul.f32 0.01, %v169_v5  ;;  %v216_v8 = vmul.f32 0.01, %v183_v6 }
  0x9c   :  { %v223_v9 = vmax.f32 %v169_v5, %v215_v7  ;;  %v224_v10 = vmax.f32 %v183_v6, %v216_v8 }
  0x9e   :  { %231 = vst [vmem:[%s497_s3] sm:$0xff] %v223_v9  ;;  %v196_v12 = vpop.f32.mrf.mxu2  ;;  %v210_v13 = vpop.f32.mrf.mxu3 }
  0x9f   :  { %232 = vst [vmem:[%s497_s3 + $0x8] sm:$0xff] %v224_v10  ;;  %v197_v14 = vadd.f32 %v196_v12, %v40_v2  ;;  %v211_v15 = vadd.f32 %v210_v13, %v40_v2  ;;  %v170_v16 = vpop.f32.mrf.mxu0  ;;  %v184_v17 = vpop.f32.mrf.mxu1 }
  0xa0   :  { %v171_v18 = vadd.f32 %v170_v16, %v45_v11  ;;  %v185_v19 = vadd.f32 %v184_v17, %v45_v11 }
  0xa1   :  { %v217_v20 = vmul.f32 0.01, %v197_v14  ;;  %v218_v21 = vmul.f32 0.01, %v211_v15 }
  0xa2   :  { %v219_v22 = vmul.f32 0.01, %v171_v18  ;;  %v220_v23 = vmul.f32 0.01, %v185_v19 }
  0xa3   :  { %v225_v24 = vmax.f32 %v197_v14, %v217_v20  ;;  %v226_v25 = vmax.f32 %v211_v15, %v218_v21 }
  0xa4   :  { %v227_v26 = vmax.f32 %v171_v18, %v219_v22  ;;  %v228_v27 = vmax.f32 %v185_v19, %v220_v23 }
  0xa5   :  { %233 = vst [vmem:[%s497_s3 + $0x10] sm:$0xff] %v225_v24 }
  0xa6   :  { %234 = vst [vmem:[%s497_s3 + $0x18] sm:$0xff] %v226_v25  ;;  %v198_v28 = vpop.f32.mrf.mxu2  ;;  %v212_v29 = vpop.f32.mrf.mxu3 }
  0xa7   :  { %235 = vst [vmem:[%s497_s3 + $0x20] sm:$0xff] %v227_v26  ;;  %v199_v30 = vadd.f32 %v198_v28, %v45_v11  ;;  %v213_v31 = vadd.f32 %v212_v29, %v45_v11 }
  0xa8   :  { %236 = vst [vmem:[%s497_s3 + $0x28] sm:$0xff] %v228_v27 }
  0xa9   :  { %v221_v32 = vmul.f32 0.01, %v199_v30  ;;  %v222_v33 = vmul.f32 0.01, %v213_v31 }
  0xab   :  { %v229_v34 = vmax.f32 %v199_v30, %v221_v32  ;;  %v230_v35 = vmax.f32 %v213_v31, %v222_v33 }
  0xad   :  { %237 = vst [vmem:[%s497_s3 + $0x30] sm:$0xff] %v229_v34 }
  0xae   :  { %238 = vst [vmem:[%s497_s3 + $0x38] sm:$0xff] %v230_v35 }

// kernel: net_vgg_forward.9
= control target key start
LH: loop header
LB: loop body
LE: loop exit
PB: predicated region body
PF: predicated region fallthrough
CT: control target
= control target key end

     0   :  { %vm254_vm0 = vcmask 130048   ;;  %s883_s0 = inlined_call_operand.vmem [shape: bf16[144,512], index: 0, kind: input, shape index: {}]   ;;  %s884_s1 = inlined_call_operand.vmem [shape: bf16[16,144], index: 1, kind: input, shape index: {}]   ;;  %s885_s2 = inlined_call_operand.vmem [shape: f32[16,1], index: 2, kind: input, shape index: {}]   ;;  %s886_s3 = inlined_call_operand.vmem [shape: f32[16,512], index: 3, kind: output, shape index: {}]  }
   0x1   :  { %v520_v0 = vld [vmem:[%s883_s0 + $0xe0] sm:$0xf]  ;;  %v586_v1 = vld [vmem:[%s883_s0 + $0xec] sm:$0xf0]  ;;  %v584_v5 = vld [vmem:[%s883_s0 + $0xe4] sm:$0xf] }
   0x2   :  { %v536_v2 = vld [vmem:[%s883_s0 + $0x100] sm:$0xf]  ;;  %v521_v3 = vor.u32 %v586_v1, %v520_v0  ;;  %v590_v4 = vld [vmem:[%s883_s0 + $0x10c] sm:$0xf0]  ;;  %v522_v6 = vld [vmem:[%s883_s0 + $0xf0] sm:$0xf0] }
   0x3   :  { %v537_v7 = vor.u32 %v590_v4, %v536_v2  ;;  %v525_v8 = vor.u32 %v584_v5, %v522_v6  ;;  %v528_v9 = vld [vmem:[%s883_s0 + $0xe8] sm:$0xf]  ;;  %v587_v10 = vld [vmem:[%s883_s0 + $0xf4] sm:$0xf0]  ;;  %v504_v11 = vld [vmem:[%s883_s0 + $0xc0] sm:$0xf] }
   0x4   :  { %258 = vmatpush.bf16.msra.mxu0 %v521_v3  ;;  %v529_v12 = vor.u32 %v587_v10, %v528_v9  ;;  %v582_v13 = vld [vmem:[%s883_s0 + $0xcc] sm:$0xf0]  ;;  %v580_v14 = vld [vmem:[%s883_s0 + $0xc4] sm:$0xf]  ;;  %v506_v15 = vld [vmem:[%s883_s0 + $0xd0] sm:$0xf0] }
   0x5   :  { %279 = vmatpush.bf16.msra.mxu1 %v537_v7  ;;  %286 = vmatpush.bf16.msra.mxu2 %v525_v8  ;;  %v505_v16 = vor.u32 %v582_v13, %v504_v11  ;;  %v509_v17 = vor.u32 %v580_v14, %v506_v15  ;;  %v512_v18 = vld [vmem:[%s883_s0 + $0xc8] sm:$0xf]  ;;  %v583_v19 = vld [vmem:[%s883_s0 + $0xd4] sm:$0xf0]  ;;  %v585_v23 = vld [vmem:[%s883_s0 + $0xec] sm:$0xf] }
   0x6   :  { %v544_v20 = vld [vmem:[%s883_s0 + $0x108] sm:$0xf]  ;;  %v513_v21 = vor.u32 %v583_v19, %v512_v18  ;;  %v591_v22 = vld [vmem:[%s883_s0 + $0x114] sm:$0xf0]  ;;  %v530_v24 = vld [vmem:[%s883_s0 + $0xf8] sm:$0xf0] }
   0x7   :  { %v545_v25 = vor.u32 %v591_v22, %v544_v20  ;;  %v533_v26 = vor.u32 %v585_v23, %v530_v24  ;;  %v488_v27 = vld [vmem:[%s883_s0 + $0xa0] sm:$0xf]  ;;  %v578_v28 = vld [vmem:[%s883_s0 + $0xac] sm:$0xf0]  ;;  %v576_v29 = vld [vmem:[%s883_s0 + $0xa4] sm:$0xf] }
   0x8   :  { %259 = vmatpush.bf16.msra.mxu0 %v505_v16  ;;  %v489_v30 = vor.u32 %v578_v28, %v488_v27  ;;  %v490_v31 = vld [vmem:[%s883_s0 + $0xb0] sm:$0xf0]  ;;  %v496_v32 = vld [vmem:[%s883_s0 + $0xa8] sm:$0xf]  ;;  %v579_v33 = vld [vmem:[%s883_s0 + $0xb4] sm:$0xf0] }
   0x9   :  { %314 = vmatpush.bf16.msrb.mxu1 %v529_v12  ;;  %287 = vmatpush.bf16.msra.mxu2 %v509_v17  ;;  %v493_v34 = vor.u32 %v576_v29, %v490_v31  ;;  %v581_v35 = vld [vmem:[%s883_s0 + $0xcc] sm:$0xf]  ;;  %v514_v36 = vld [vmem:[%s883_s0 + $0xd8] sm:$0xf0]  ;;  %v472_v37 = vld [vmem:[%s883_s0 + $0x80] sm:$0xf]  ;;  %v497_v38 = vor.u32 %v579_v33, %v496_v32 }
   0xa   :  { %335 = vmatpush.bf16.msra.mxu3 %v545_v25  ;;  %v517_v39 = vor.u32 %v581_v35, %v514_v36  ;;  %v574_v40 = vld [vmem:[%s883_s0 + $0x8c] sm:$0xf0]  ;;  %v572_v41 = vld [vmem:[%s883_s0 + $0x84] sm:$0xf]  ;;  %v474_v42 = vld [vmem:[%s883_s0 + $0x90] sm:$0xf0] }
   0xb   :  { %v480_v43 = vld [vmem:[%s883_s0 + $0x88] sm:$0xf]  ;;  %v575_v44 = vld [vmem:[%s883_s0 + $0x94] sm:$0xf0]  ;;  %v577_v45 = vld [vmem:[%s883_s0 + $0xac] sm:$0xf]  ;;  %v473_v46 = vor.u32 %v574_v40, %v472_v37  ;;  %v477_v49 = vor.u32 %v572_v41, %v474_v42 }
   0xc   :  { %260 = vmatpush.bf16.msra.mxu0 %v489_v30  ;;  %v498_v47 = vld [vmem:[%s883_s0 + $0xb8] sm:$0xf0]  ;;  %v456_v48 = vld [vmem:[%s883_s0 + $0x60] sm:$0xf]  ;;  %v570_v50 = vld [vmem:[%s883_s0 + $0x6c] sm:$0xf0]  ;;  %v481_v53 = vor.u32 %v575_v44, %v480_v43 }
   0xd   :  { %315 = vmatpush.bf16.msrb.mxu1 %v513_v21  ;;  %288 = vmatpush.bf16.msra.mxu2 %v493_v34  ;;  %v554_v51 = vld [vmem:[%s884_s1 + $0x4] sm:$0xf]  ;;  %v402_v52 = vld [vmem:[%s884_s1 + $0x8] sm:$0xf0]  ;;  %v501_v54 = vor.u32 %v577_v45, %v498_v47  ;;  %v458_v57 = vld [vmem:[%s883_s0 + $0x70] sm:$0xf0]  ;;  %v457_v62 = vor.u32 %v570_v50, %v456_v48 }
   0xe   :  { %342 = vmatpush.bf16.msrb.mxu3 %v533_v26  ;;  %v729_v55 = vor.u32 %v554_v51, %v402_v52  ;;  %v568_v56 = vld [vmem:[%s883_s0 + $0x64] sm:$0xf]  ;;  %v464_v58 = vld [vmem:[%s883_s0 + $0x68] sm:$0xf]  ;;  %v571_v59 = vld [vmem:[%s883_s0 + $0x74] sm:$0xf0] }
   0xf   :  { %v573_v60 = vld [vmem:[%s883_s0 + $0x8c] sm:$0xf]  ;;  %v482_v61 = vld [vmem:[%s883_s0 + $0x98] sm:$0xf0]  ;;  %v461_v63 = vor.u32 %v568_v56, %v458_v57  ;;  %v440_v0 = vld [vmem:[%s883_s0 + $0x40] sm:$0xf]  ;;  %v465_v2 = vor.u32 %v571_v59, %v464_v58 }
  0x10   :  { %261 = vmatpush.bf16.msra.mxu0 %v473_v46  ;;  %550 = vmatmul.msk.bf16.vlgmr.msra.gmra.mxu1 %vm254_vm0, %v729_v55  ;;  %v566_v1 = vld [vmem:[%s883_s0 + $0x4c] sm:$0xf0]  ;;  %v485_v3 = vor.u32 %v573_v60, %v482_v61  ;;  %v564_v4 = vld [vmem:[%s883_s0 + $0x44] sm:$0xf]  ;;  %v442_v5 = vld [vmem:[%s883_s0 + $0x50] sm:$0xf0] }
  0x11   :  { %316 = vmatpush.bf16.msrb.mxu1 %v497_v38  ;;  %289 = vmatpush.bf16.msra.mxu2 %v477_v49  ;;  %v448_v6 = vld [vmem:[%s883_s0 + $0x48] sm:$0xf]  ;;  %v567_v7 = vld [vmem:[%s883_s0 + $0x54] sm:$0xf0]  ;;  %v569_v8 = vld [vmem:[%s883_s0 + $0x6c] sm:$0xf]  ;;  %v441_v10 = vor.u32 %v566_v1, %v440_v0  ;;  %v445_v11 = vor.u32 %v564_v4, %v442_v5 }
  0x12   :  { %343 = vmatpush.bf16.msrb.mxu3 %v517_v39  ;;  %v466_v9 = vld [vmem:[%s883_s0 + $0x78] sm:$0xf0]  ;;  %v424_v12 = vld [vmem:[%s883_s0 + $0x20] sm:$0xf]  ;;  %v562_v13 = vld [vmem:[%s883_s0 + $0x2c] sm:$0xf0]  ;;  %v449_v14 = vor.u32 %v567_v7, %v448_v6 }
  0x13   :  { %552 = vmatmul.msk.bf16.vlgmr.msra.gmra.mxu3 %vm254_vm0, %v729_v55  ;;  %v469_v15 = vor.u32 %v569_v8, %v466_v9  ;;  %v560_v16 = vld [vmem:[%s883_s0 + $0x24] sm:$0xf]  ;;  %v426_v17 = vld [vmem:[%s883_s0 + $0x30] sm:$0xf0]  ;;  %v432_v18 = vld [vmem:[%s883_s0 + $0x28] sm:$0xf]  ;;  %v425_v22 = vor.u32 %v562_v13, %v424_v12 }
  0x14   :  { %262 = vmatpush.bf16.msra.mxu0 %v457_v62  ;;  %v563_v19 = vld [vmem:[%s883_s0 + $0x34] sm:$0xf0]  ;;  %v565_v20 = vld [vmem:[%s883_s0 + $0x4c] sm:$0xf]  ;;  %v450_v21 = vld [vmem:[%s883_s0 + $0x58] sm:$0xf0]  ;;  %v429_v26 = vor.u32 %v560_v16, %v426_v17 }
  0x15   :  { %317 = vmatpush.bf16.msrb.mxu1 %v481_v53  ;;  %290 = vmatpush.bf16.msra.mxu2 %v461_v63  ;;  %v408_v23 = vld [vmem:[%s883_s0] sm:$0xf]  ;;  %v558_v24 = vld [vmem:[%s883_s0 + $0xc] sm:$0xf0]  ;;  %v556_v25 = vld [vmem:[%s883_s0 + $0x4] sm:$0xf]  ;;  %v433_v30 = vor.u32 %v563_v19, %v432_v18  ;;  %v453_v31 = vor.u32 %v565_v20, %v450_v21 }
  0x16   :  { %344 = vmatpush.bf16.msrb.mxu3 %v501_v54  ;;  %v410_v27 = vld [vmem:[%s883_s0 + $0x10] sm:$0xf0]  ;;  %v416_v28 = vld [vmem:[%s883_s0 + $0x8] sm:$0xf]  ;;  %v559_v29 = vld [vmem:[%s883_s0 + $0x14] sm:$0xf0]  ;;  %v409_v39 = vor.u32 %v558_v24, %v408_v23 }
  0x17   :  { %v589_v32 = vld [vmem:[%s883_s0 + $0x10c] sm:$0xf]  ;;  %v546_v33 = vld [vmem:[%s883_s0 + $0x118] sm:$0xf0]  ;;  %v53_v34 = vld [vmem:[%s885_s2] sm:$0xff]  ;;  %v594_v38 = vmov 0   ;;  %v413_v43 = vor.u32 %v556_v25, %v410_v27  ;;  %v417_v45 = vor.u32 %v559_v29, %v416_v28 }
  0x18   :  { %263 = vmatpush.bf16.msra.mxu0 %v441_v10  ;;  %v561_v35 = vld [vmem:[%s883_s0 + $0x2c] sm:$0xf]  ;;  %v434_v36 = vld [vmem:[%s883_s0 + $0x38] sm:$0xf0]  ;;  %v400_v37 = vld [vmem:[%s884_s1] sm:$0xf]  ;;  %593 = vset.pattern.permute.xlu0 %v594_v38  ;;  %v549_v44 = vor.u32 %v589_v32, %v546_v33 }
  0x19   :  { %318 = vmatpush.bf16.msrb.mxu1 %v465_v2  ;;  %291 = vmatpush.bf16.msra.mxu2 %v445_v11  ;;  %v555_v40 = vld [vmem:[%s884_s1 + $0x4] sm:$0xf0]  ;;  %v588_v41 = vld [vmem:[%s883_s0 + $0x104] sm:$0xf]  ;;  %v538_v42 = vld [vmem:[%s883_s0 + $0x110] sm:$0xf0]  ;;  %v437_v46 = vor.u32 %v561_v35, %v434_v36 }
  0x1a   :  { %345 = vmatpush.bf16.msrb.mxu3 %v485_v3  ;;  %57 = vperm.xlu0 %593, %v53_v34   ;;  %v401_v47 = vor.u32 %v555_v40, %v400_v37  ;;  %v541_v48 = vor.u32 %v588_v41, %v538_v42  ;;  %v557_v49 = vld [vmem:[%s883_s0 + $0xc] sm:$0xf]  ;;  %v418_v50 = vld [vmem:[%s883_s0 + $0x18] sm:$0xf0] }
  0x1b   :  { %v54_v51 = vld [vmem:[%s885_s2 + $0x8] sm:$0xff]  ;;  %v421_v52 = vor.u32 %v557_v49, %v418_v50 }
  0x1c   :  { %264 = vmatpush.bf16.msra.mxu0 %v425_v22 }
  0x1d   :  { %319 = vmatpush.bf16.msrb.mxu1 %v449_v14  ;;  %292 = vmatpush.bf16.msra.mxu2 %v429_v26 }
  0x1e   :  { %346 = vmatpush.bf16.msrb.mxu3 %v469_v15 }
  0x20   :  { %265 = vmatpush.bf16.msra.mxu0 %v409_v39 }
  0x21   :  { %320 = vmatpush.bf16.msrb.mxu1 %v433_v30  ;;  %293 = vmatpush.bf16.msra.mxu2 %v413_v43 }
  0x22   :  { %347 = vmatpush.bf16.msrb.mxu3 %v453_v31  ;;  %62 = vperm.xlu0 %593, %v54_v51  }
  0x23   :  { %266 = vmatmul.bf16.vlgmr.msra.gmra.mxu0 %v401_v47 }
  0x24   :  { %363 = vmatpush.bf16.msrb.mxu0 %v549_v44  ;;  %294 = vmatmul.bf16.vlgmr.msra.gmra.mxu2 %v401_v47 }
  0x25   :  { %321 = vmatpush.bf16.msrb.mxu1 %v417_v45  ;;  %307 = vmatpush.bf16.msrb.mxu2 %v541_v48 }
  0x26   :  { %348 = vmatpush.bf16.msrb.mxu3 %v437_v46 }
  0x28   :  { %322 = vmatmul.bf16.vlgmr.msrb.gmra.mxu1 %v401_v47 }
  0x2a   :  { %349 = vmatpush.bf16.msrb.mxu3 %v421_v52 }
  0x2d   :  { %350 = vmatmul.bf16.vlgmr.msrb.gmra.mxu3 %v401_v47 }
  0x33   :  { %553 = vmatmul.msk.bf16.vlgmr.msrb.gmra.mxu0 %vm254_vm0, %v729_v55 }
  0x34   :  { %551 = vmatmul.msk.bf16.vlgmr.msrb.gmra.mxu2 %vm254_vm0, %v729_v55 }
  0x8c   :  { %v58_v57 = vpop.permute.xlu0 %57 }
  0x8d   :  { %v281_v53 = vpop.f32.mrf.mxu1 }
  0x94   :  { %v63_v2 = vpop.permute.xlu0 %62 }
  0x95   :  { %v283_v54 = vpop.f32.mrf.mxu1 }
  0x96   :  { %v337_v56 = vpop.f32.mrf.mxu3 }
  0x9e   :  { %v339_v61 = vpop.f32.mrf.mxu3 }
  0xa0   :  { %v267_v58 = vpop.f32.mrf.mxu0 }
  0xa1   :  { %v268_v59 = vadd.f32 %v267_v58, %v58_v57 }
  0xa3   :  { %v282_v62 = vadd.f32 %v281_v53, %v268_v59 }
  0xa5   :  { %v323_v60 = vpop.f32.mrf.mxu1  ;;  %v370_v0 = vmul.f32 0.01, %v282_v62 }
  0xa6   :  { %v324_v63 = vadd.f32 %v323_v60, %v58_v57 }
  0xa7   :  { %v378_v3 = vmax.f32 %v282_v62, %v370_v0  ;;  %v295_v5 = vpop.f32.mrf.mxu2 }
  0xa8   :  { %v338_v1 = vadd.f32 %v337_v56, %v324_v63  ;;  %v269_v6 = vpop.f32.mrf.mxu0  ;;  %v296_v24 = vadd.f32 %v295_v5, %v58_v57 }
  0xa9   :  { %386 = vst [vmem:[%s886_s3] sm:$0xff] %v378_v3  ;;  %v270_v7 = vadd.f32 %v269_v6, %v63_v2 }
  0xaa   :  { %v372_v4 = vmul.f32 0.01, %v338_v1 }
  0xab   :  { %v284_v9 = vadd.f32 %v283_v54, %v270_v7 }
  0xac   :  { %v380_v55 = vmax.f32 %v338_v1, %v372_v4 }
  0xad   :  { %v325_v8 = vpop.f32.mrf.mxu1  ;;  %v374_v12 = vmul.f32 0.01, %v284_v9 }
  0xae   :  { %388 = vst [vmem:[%s886_s3 + $0x10] sm:$0xff] %v380_v55  ;;  %v326_v10 = vadd.f32 %v325_v8, %v63_v2 }
  0xaf   :  { %v382_v15 = vmax.f32 %v284_v9, %v374_v12  ;;  %v297_v17 = vpop.f32.mrf.mxu2 }
  0xb0   :  { %v351_v11 = vpop.f32.mrf.mxu3  ;;  %v340_v13 = vadd.f32 %v339_v61, %v326_v10  ;;  %v365_v18 = vpop.f32.mrf.mxu0  ;;  %v298_v34 = vadd.f32 %v297_v17, %v63_v2 }
  0xb1   :  { %v352_v14 = vadd.f32 %v351_v11, %v58_v57  ;;  %390 = vst [vmem:[%s886_s3 + $0x20] sm:$0xff] %v382_v15 }
  0xb2   :  { %v376_v16 = vmul.f32 0.01, %v340_v13 }
  0xb3   :  { %v366_v20 = vadd.f32 %v365_v18, %v352_v14 }
  0xb4   :  { %v384_v19 = vmax.f32 %v340_v13, %v376_v16 }
  0xb5   :  { %v373_v21 = vmul.f32 0.01, %v366_v20 }
  0xb6   :  { %392 = vst [vmem:[%s886_s3 + $0x30] sm:$0xff] %v384_v19 }
  0xb7   :  { %v381_v23 = vmax.f32 %v366_v20, %v373_v21  ;;  %v309_v26 = vpop.f32.mrf.mxu2 }
  0xb8   :  { %v353_v22 = vpop.f32.mrf.mxu3  ;;  %v310_v27 = vadd.f32 %v309_v26, %v296_v24  ;;  %v367_v28 = vpop.f32.mrf.mxu0 }
  0xb9   :  { %389 = vst [vmem:[%s886_s3 + $0x18] sm:$0xff] %v381_v23  ;;  %v354_v25 = vadd.f32 %v353_v22, %v63_v2 }
  0xba   :  { %v371_v30 = vmul.f32 0.01, %v310_v27 }
  0xbb   :  { %v368_v29 = vadd.f32 %v367_v28, %v354_v25 }
  0xbc   :  { %v379_v32 = vmax.f32 %v310_v27, %v371_v30 }
  0xbd   :  { %v377_v31 = vmul.f32 0.01, %v368_v29 }
  0xbe   :  { %387 = vst [vmem:[%s886_s3 + $0x8] sm:$0xff] %v379_v32 }
  0xbf   :  { %v385_v33 = vmax.f32 %v368_v29, %v377_v31  ;;  %v311_v35 = vpop.f32.mrf.mxu2 }
  0xc0   :  { %v312_v36 = vadd.f32 %v311_v35, %v298_v34 }
  0xc1   :  { %393 = vst [vmem:[%s886_s3 + $0x38] sm:$0xff] %v385_v33 }
  0xc2   :  { %v375_v37 = vmul.f32 0.01, %v312_v36 }
  0xc4   :  { %v383_v38 = vmax.f32 %v312_v36, %v375_v37 }
  0xc6   :  { %391 = vst [vmem:[%s886_s3 + $0x28] sm:$0xff] %v383_v38 }

// kernel: net_vgg_forward.10
= control target key start
LH: loop header
LB: loop body
LE: loop exit
PB: predicated region body
PF: predicated region fallthrough
CT: control target
= control target key end

     0   :  { %v84_v2 = vmov 0   ;;  %vm34_vm0 = vcmask 392192   ;;  %s141_s0 = inlined_call_operand.vmem [shape: f32[48,128], index: 0, kind: input, shape index: {}]   ;;  %s142_s2 = inlined_call_operand.vmem [shape: f32[16,1], index: 2, kind: input, shape index: {}]   ;;  %s143_s1 = inlined_call_operand.vmem [shape: f32[16,48], index: 1, kind: input, shape index: {}]   ;;  %s144_s3 = inlined_call_operand.vmem [shape: f32[16,128], index: 3, kind: output, shape index: {}]  }
   0x1   :  { %v21_v0 = vld [vmem:[%s141_s0 + $0x28] sm:$0xff]  ;;  %v20_v1 = vld [vmem:[%s141_s0 + $0x20] sm:$0xff]  ;;  %83 = vset.pattern.permute.xlu0 %v84_v2  ;;  %v19_v4 = vld [vmem:[%s141_s0 + $0x18] sm:$0xff] }
   0x2   :  { %51 = vmatpush.msra.mxu0 %v21_v0  ;;  %76 = vmatpush.msra.mxu1 %v21_v0  ;;  %v22_v3 = vld [vmem:[%s142_s2] sm:$0xff]  ;;  %v18_v5 = vld [vmem:[%s141_s0 + $0x10] sm:$0xff]  ;;  %v17_v6 = vld [vmem:[%s141_s0 + $0x8] sm:$0xff] }
   0x3   :  { %26 = vperm.xlu0 %83, %v22_v3   ;;  %v23_v7 = vld [vmem:[%s142_s2 + $0x8] sm:$0xff]  ;;  %v16_v8 = vld [vmem:[%s141_s0] sm:$0xff] }
   0x4   :  { %52 = vmatpush.msra.mxu0 %v20_v1  ;;  %77 = vmatpush.msra.mxu1 %v20_v1  ;;  %v14_v9 = vld [vmem:[%s143_s1] sm:$0xff]  ;;  %v15_v10 = vld [vmem:[%s143_s1 + $0x8] sm:$0xff] }
   0x6   :  { %53 = vmatpush.msra.mxu0 %v19_v4  ;;  %78 = vmatpush.msra.mxu1 %v19_v4 }
   0x8   :  { %54 = vmatpush.msra.mxu0 %v18_v5  ;;  %79 = vmatpush.msra.mxu1 %v18_v5 }
   0xa   :  { %55 = vmatpush.msra.mxu0 %v17_v6  ;;  %80 = vmatpush.msra.mxu1 %v17_v6 }
   0xb   :  { %31 = vperm.xlu0 %83, %v23_v7  }
   0xc   :  { %56 = vmatpush.msra.mxu0 %v16_v8  ;;  %81 = vmatpush.msra.mxu1 %v16_v8 }
   0xd   :  { %74 = vmatmul.msk.f32.vlgmr.msra.gmra.mxu0 %vm34_vm0, %v14_v9  ;;  %75 = vmatmul.msk.f32.vlgmr.msra.gmra.mxu1 %vm34_vm0, %v15_v10 }
  0x75   :  { %v27_v11 = vpop.permute.xlu0 %26 }
  0x7d   :  { %v32_v12 = vpop.permute.xlu0 %31 }
  0x8a   :  { %v58_v13 = vpop.f32.mrf.mxu0  ;;  %v61_v14 = vpop.f32.mrf.mxu1 }
  0x8b   :  { %v59_v15 = vadd.f32 %v58_v13, %v27_v11  ;;  %v62_v16 = vadd.f32 %v61_v14, %v32_v12 }
  0x8d   :  { %v64_v17 = vmul.f32 0.01, %v59_v15  ;;  %v65_v18 = vmul.f32 0.01, %v62_v16 }
  0x8f   :  { %v66_v19 = vmax.f32 %v59_v15, %v64_v17  ;;  %v67_v20 = vmax.f32 %v62_v16, %v65_v18 }
  0x91   :  { %68 = vst [vmem:[%s144_s3] sm:$0xff] %v66_v19 }
  0x92   :  { %69 = vst [vmem:[%s144_s3 + $0x8] sm:$0xff] %v67_v20 }

// kernel: net_vgg_forward.13
= control target key start
LH: loop header
LB: loop body
LE: loop exit
PB: predicated region body
PF: predicated region fallthrough
CT: control target
= control target key end

     0   :  { %v59_v2 = vmov 0   ;;  %vm27_vm0 = vcmask 392192   ;;  %s107_s0 = inlined_call_operand.vmem [shape: f32[48,128], index: 0, kind: input, shape index: {}]   ;;  %s108_s2 = inlined_call_operand.vmem [shape: f32[8,1], index: 2, kind: input, shape index: {}]   ;;  %s109_s1 = inlined_call_operand.vmem [shape: f32[8,48], index: 1, kind: input, shape index: {}]   ;;  %s110_s3 = inlined_call_operand.vmem [shape: f32[8,128], index: 3, kind: output, shape index: {}]  }
   0x1   :  { %v20_v0 = vld [vmem:[%s107_s0 + $0x28] sm:$0xff]  ;;  %v19_v1 = vld [vmem:[%s107_s0 + $0x20] sm:$0xff]  ;;  %58 = vset.pattern.permute.xlu0 %v59_v2  ;;  %v18_v3 = vld [vmem:[%s107_s0 + $0x18] sm:$0xff] }
   0x2   :  { %41 = vmatpush.msra.mxu0 %v20_v0  ;;  %v21_v4 = vld [vmem:[%s108_s2] sm:$0xff]  ;;  %v17_v5 = vld [vmem:[%s107_s0 + $0x10] sm:$0xff]  ;;  %v16_v6 = vld [vmem:[%s107_s0 + $0x8] sm:$0xff] }
   0x3   :  { %24 = vperm.xlu0 %58, %v21_v4   ;;  %v15_v7 = vld [vmem:[%s107_s0] sm:$0xff] }
   0x4   :  { %42 = vmatpush.msra.mxu0 %v19_v1  ;;  %v14_v8 = vld [vmem:[%s109_s1] sm:$0xff] }
   0x6   :  { %43 = vmatpush.msra.mxu0 %v18_v3 }
   0x8   :  { %44 = vmatpush.msra.mxu0 %v17_v5 }
   0xa   :  { %45 = vmatpush.msra.mxu0 %v16_v6 }
   0xc   :  { %46 = vmatpush.msra.mxu0 %v15_v7 }
   0xd   :  { %56 = vmatmul.msk.f32.vlgmr.msra.gmra.mxu0 %vm27_vm0, %v14_v8 }
  0x75   :  { %v25_v9 = vpop.permute.xlu0 %24 }
  0x8a   :  { %v48_v10 = vpop.f32.mrf.mxu0 }
  0x8b   :  { %v49_v11 = vadd.f32 %v48_v10, %v25_v9 }
  0x8d   :  { %51 = vst [vmem:[%s110_s3] sm:$0xff] %v49_v11 }

// kernel: net_vgg_forward.12
= control target key start
LH: loop header
LB: loop body
LE: loop exit
PB: predicated region body
PF: predicated region fallthrough
CT: control target
= control target key end

     0   :  { %vm25_vm0 = vcmask 130048   ;;  %v2266_v4 = vmov 0.0   ;;  %s2267_s25 = smov 112   ;;  %s2268_s26 = smov 8   ;;  %vm107_vm1 = vcmask 58368   ;;  %vm56_vm2 = vcmask 64512   ;;  %s2762_s1 = inlined_call_operand.vmem [shape: f32[4,16,32], index: 1, kind: input, shape index: {}]   ;;  %s2763_s0 = inlined_call_operand.vmem [shape: f32[16,16], index: 0, kind: input, shape index: {}]   ;;  %s2764_s2 = inlined_call_operand.vmem [shape: f32[4,8,32], index: 2, kind: input, shape index: {}]   ;;  %s2765_s3 = inlined_call_operand.vmem [shape: f32[4,1,32], index: 3, kind: input, shape index: {}]   ;;  %s2766_s4 = inlined_call_operand.vmem [shape: f32[16,16], index: 4, kind: output, shape index: {}]  }
   0x1   :  { %v20_v0 = vld [vmem:[%s2762_s1 + $0x8] sm:$0xff]  ;;  %v19_v1 = vld [vmem:[%s2762_s1] sm:$0xff]  ;;  %s2269_s27 = smov 16   ;;  %s2270_s28 = smov 104   ;;  %vm284_vm3 = vcmask 64518   ;;  %vm224_vm4 = vcmask 62468  }
   0x2   :  { %46 = vmatpush.msra.mxu0 %v20_v0  ;;  %v2305_v2 = vld [vmem:[%s2763_s0] sm:$0xff]  ;;  %vm164_vm5 = vcmask 60418  }
   0x3   :  { %v55_v3 = vld [vmem:[%s2764_s2] sm:$0xff] }
   0x4   :  { %75 = vmatpush.msra.mxu1 %v55_v3  ;;  %126 = vmatpush.msra.mxu2 %v55_v3  ;;  %v2316_v5 = vld [vmem:[%s2765_s3] ss:$0 sm:$0xff] }
   0x5   :  { %47 = vmatpush.msra.mxu0 %v19_v1  ;;  %76 = vmatmul.f32.vlgmr.msra.gmra.mxu1 %v2266_v4 }
   0x6   :  { %2017 = vmatmul.msk.f32.vlgmr.msra.gmra.mxu0 %vm25_vm0, %v2305_v2  ;;  %186 = vmatpush.msra.mxu3 %v55_v3 }
   0x7   :  { %246 = vmatpush.msrb.mxu1 %v55_v3  ;;  %306 = vmatpush.msrb.mxu2 %v55_v3 }
   0x8   :  { %359 = vmatpush.msrb.mxu3 %v55_v3 }
   0x9   :  { %418 = vmatpush.msra.mxu1 %v55_v3 }
  0x82   :  { %v77_v7 = vpop.f32.mrf.mxu1 }
  0x83   :  { %v49_v6 = vpop.f32.mrf.mxu0 }
  0x84   :  { %v2319_v8 = vadd.f32 %v2316_v5, %v49_v6 }
  0x86   :  { %v80_v9 = vadd.f32 %v77_v7, %v2319_v8 }
  0x88   :  { %2074 = vtanh.f32 %v80_v9  ;;  %v81_v11 = vmul.f32 0.5, %v80_v9 }
  0x8a   :  { %2076 = vtanh.f32 %v81_v11 }
  0x8e   :  { %v2075_v10 = vpop.eup %2074 }
  0x8f   :  { %88 = vrot.lane.b32.xlu0 %v2075_v10, %s2267_s25 }
  0x90   :  { %v2077_v12 = vpop.eup %2076 }
  0x91   :  { %v83_v13 = vmul.f32 0.5, %v2077_v12 }
  0x93   :  { %v84_v14 = vadd.f32 0.5, %v83_v13 }
  0x95   :  { %v86_v17 = vmul.f32 0.0, %v84_v14 }
 0x101   :  { %v89_v15 = vpop.permute.xlu0 %88 }
 0x102   :  { %v91_v16 = vmul.f32 %v89_v15, %v84_v14 }
 0x104   :  { %93 = vrot.lane.b32.xlu0 %v91_v16, %s2268_s26 }
 0x176   :  { %v94_v18 = vpop.permute.xlu0 %93 }
 0x177   :  { %v96_v19 = vadd.f32 %v94_v18, %v86_v17 }
 0x179   :  { %2078 = vtanh.f32 %v96_v19  ;;  %v141_v34 = vrot.slane %v96_v19, 6  ;;  %v18_v19 = vld [vmem:[%s2763_s0 + $0x8] sm:$0xff] }
 0x17a   :  { %2018 = vmatmul.msk.f32.gmra.mxu0 %vm25_vm0, %v18_v19 }
 0x17f   :  { %v2079_v20 = vpop.eup %2078 }
 0x180   :  { %99 = vrot.lane.b32.xlu1 %v2079_v20, %s2269_s27 }
 0x1f2   :  { %v100_v21 = vpop.permute.xlu1 %99 }
 0x1f3   :  { %v102_v22 = vmul.f32 %v100_v21, %v84_v14 }
 0x1f5   :  { %104 = vrot.lane.b32.xlu1 %v102_v22, %s2270_s28 }
 0x1f7   :  { %v52_v21 = vpop.f32.mrf.mxu0 }
 0x1f8   :  { %v2360_v22 = vadd.f32 %v2316_v5, %v52_v21 }
 0x267   :  { %v105_v23 = vpop.permute.xlu1 %104 }
 0x268   :  { %108 = vst.msk [vmem:[#allocation2] sm:$0x3] %vm107_vm1, %v105_v23  ;;  %2019 = vmatmul.msk.f32.vlgmr.msra.gmra.mxu2 %vm56_vm2, %v105_v23 }
 0x269   :  { %477 = vmatpush.msra.mxu2 %v55_v3 }
 0x2eb   :  { %v128_v24 = vpop.f32.mrf.mxu2 }
 0x2ec   :  { %v132_v25 = vrot.slane %v128_v24, 6 }
 0x2ee   :  { %v134_v26 = vadd.f32 %v132_v25, %v2319_v8 }
 0x2f0   :  { %2080 = vtanh.f32 %v134_v26  ;;  %v135_v28 = vmul.f32 0.5, %v134_v26 }
 0x2f2   :  { %2082 = vtanh.f32 %v135_v28 }
 0x2f6   :  { %v2081_v27 = vpop.eup %2080 }
 0x2f7   :  { %145 = vrot.lane.b32.xlu2 %v2081_v27, %s2267_s25 }
 0x2f8   :  { %v2083_v29 = vpop.eup %2082 }
 0x2f9   :  { %v137_v30 = vmul.f32 0.5, %v2083_v29 }
 0x2fb   :  { %v138_v31 = vadd.f32 0.5, %v137_v30 }
 0x2fd   :  { %v143_v35 = vmul.f32 %v141_v34, %v138_v31 }
 0x351   :  { %v146_v32 = vpop.permute.xlu2 %145 }
 0x352   :  { %v148_v33 = vmul.f32 %v146_v32, %v138_v31 }
 0x354   :  { %150 = vrot.lane.b32.xlu2 %v148_v33, %s2268_s26 }
 0x3ae   :  { %v151_v36 = vpop.permute.xlu2 %150 }
 0x3af   :  { %v153_v37 = vadd.f32 %v151_v36, %v143_v35 }
 0x3b1   :  { %2084 = vtanh.f32 %v153_v37  ;;  %v201_v53 = vrot.slane %v153_v37, 6 }
 0x3b7   :  { %v2085_v38 = vpop.eup %2084 }
 0x3b8   :  { %156 = vrot.lane.b32.xlu0 %v2085_v38, %s2269_s27  ;;  %v2027_v38 = vld [vmem:[%s2762_s1 + $0x18] sm:$0xff] }
 0x42a   :  { %v157_v39 = vpop.permute.xlu0 %156 }
 0x42b   :  { %v2332_v40 = vmul.f32 %v157_v39, %v138_v31  ;;  %v2026_v39 = vld [vmem:[%s2762_s1 + $0x10] sm:$0xff] }
 0x42d   :  { %v166_v41 = vrot.slane %v2332_v40, 2 }
 0x42f   :  { %167 = vrot.lane.b32.xlu1 %v166_v41, %s2270_s28  ;;  %v2376_v41 = vld [vmem:[%s2764_s2 + $0x8] sm:$0xff] }
 0x430   :  { %564 = vmatpush.msrb.mxu0 %v2376_v41 }
 0x431   :  { %565 = vmatmul.f32.vlgmr.msrb.gmra.mxu0 %v2266_v4 }
 0x432   :  { %738 = vmatpush.msra.mxu0 %v2376_v41 }
 0x434   :  { %968 = vmatpush.msrb.mxu0 %v2376_v41 }
 0x4a1   :  { %v168_v42 = vpop.permute.xlu1 %167 }
 0x4a2   :  { %2020 = vmatmul.msk.f32.vlgmr.msra.gmra.mxu3 %vm56_vm2, %v168_v42 }
 0x4a3   :  { %538 = vmatpush.msra.mxu3 %v2027_v38 }
 0x4a5   :  { %539 = vmatpush.msra.mxu3 %v2026_v39 }
 0x525   :  { %v188_v43 = vpop.f32.mrf.mxu3 }
 0x526   :  { %v192_v44 = vrot.slane %v188_v43, 4 }
 0x528   :  { %v194_v45 = vadd.f32 %v192_v44, %v2319_v8 }
 0x52a   :  { %2086 = vtanh.f32 %v194_v45  ;;  %v195_v47 = vmul.f32 0.5, %v194_v45 }
 0x52c   :  { %2088 = vtanh.f32 %v195_v47 }
 0x530   :  { %v2087_v46 = vpop.eup %2086 }
 0x531   :  { %205 = vrot.lane.b32.xlu2 %v2087_v46, %s2267_s25  ;;  %v2071_v46 = vld [vmem:[%s2765_s3 + $0x1] ss:$0 sm:$0xff] }
 0x532   :  { %v2089_v48 = vpop.eup %2088 }
 0x533   :  { %v197_v49 = vmul.f32 0.5, %v2089_v48 }
 0x535   :  { %v198_v50 = vadd.f32 0.5, %v197_v49 }
 0x537   :  { %v203_v54 = vmul.f32 %v201_v53, %v198_v50 }
 0x58b   :  { %v206_v51 = vpop.permute.xlu2 %205 }
 0x58c   :  { %v208_v52 = vmul.f32 %v206_v51, %v198_v50 }
 0x58e   :  { %210 = vrot.lane.b32.xlu0 %v208_v52, %s2268_s26 }
 0x600   :  { %v211_v55 = vpop.permute.xlu0 %210 }
 0x601   :  { %v213_v56 = vadd.f32 %v211_v55, %v203_v54 }
 0x603   :  { %2090 = vtanh.f32 %v213_v56  ;;  %v261_v12 = vrot.slane %v213_v56, 6 }
 0x609   :  { %v2091_v57 = vpop.eup %2090 }
 0x60a   :  { %216 = vrot.lane.b32.xlu1 %v2091_v57, %s2269_s27 }
 0x67c   :  { %v217_v58 = vpop.permute.xlu1 %216 }
 0x67d   :  { %v2341_v59 = vmul.f32 %v217_v58, %v198_v50  ;;  %v566_v50 = vpop.f32.mrf.mxu0 }
 0x67e   :  { %v570_v51 = vrot.slane %v566_v50, 2 }
 0x67f   :  { %v226_v60 = vrot.slane %v2341_v59, 4 }
 0x681   :  { %227 = vrot.lane.b32.xlu2 %v226_v60, %s2270_s28 }
 0x6db   :  { %v228_v61 = vpop.permute.xlu2 %227 }
 0x6dc   :  { %2021 = vmatmul.msk.f32.vlgmr.msrb.gmra.mxu1 %vm56_vm2, %v228_v61 }
 0x6dd   :  { %620 = vmatpush.msrb.mxu1 %v2376_v41 }
 0x759   :  { %v248_v62 = vpop.f32.mrf.mxu1 }
 0x75a   :  { %v252_v63 = vrot.slane %v248_v62, 2 }
 0x75c   :  { %v254_v0 = vadd.f32 %v252_v63, %v2319_v8 }
 0x75e   :  { %2092 = vtanh.f32 %v254_v0  ;;  %v255_v3 = vmul.f32 0.5, %v254_v0 }
 0x760   :  { %2094 = vtanh.f32 %v255_v3 }
 0x764   :  { %v2093_v1 = vpop.eup %2092 }
 0x765   :  { %265 = vrot.lane.b32.xlu0 %v2093_v1, %s2267_s25 }
 0x766   :  { %v2095_v6 = vpop.eup %2094 }
 0x767   :  { %v257_v7 = vmul.f32 0.5, %v2095_v6 }
 0x769   :  { %v258_v9 = vadd.f32 0.5, %v257_v7 }
 0x76b   :  { %v263_v13 = vmul.f32 %v261_v12, %v258_v9 }
 0x7d7   :  { %v266_v10 = vpop.permute.xlu0 %265 }
 0x7d8   :  { %v268_v11 = vmul.f32 %v266_v10, %v258_v9 }
 0x7da   :  { %270 = vrot.lane.b32.xlu1 %v268_v11, %s2268_s26 }
 0x84c   :  { %v271_v14 = vpop.permute.xlu1 %270 }
 0x84d   :  { %v273_v15 = vadd.f32 %v271_v14, %v263_v13 }
 0x84f   :  { %2096 = vtanh.f32 %v273_v15  ;;  %v318_v32 = vrot.slane %v273_v15, 6 }
 0x855   :  { %v2097_v16 = vpop.eup %2096 }
 0x856   :  { %276 = vrot.lane.b32.xlu2 %v2097_v16, %s2269_s27 }
 0x8b0   :  { %v277_v8 = vpop.permute.xlu2 %276 }
 0x8b1   :  { %v2350_v17 = vmul.f32 %v277_v8, %v258_v9 }
 0x8b3   :  { %v286_v18 = vrot.slane %v2350_v17, 6 }
 0x8b5   :  { %287 = vrot.lane.b32.xlu0 %v286_v18, %s2270_s28 }
 0x927   :  { %v288_v20 = vpop.permute.xlu0 %287 }
 0x928   :  { %2022 = vmatmul.msk.f32.vlgmr.msrb.gmra.mxu2 %vm56_vm2, %v288_v20 }
 0x929   :  { %679 = vmatpush.msrb.mxu2 %v2376_v41 }
 0x9ab   :  { %v308_v23 = vpop.f32.mrf.mxu2 }
 0x9ac   :  { %v311_v24 = vadd.f32 %v308_v23, %v2360_v22 }
 0x9ae   :  { %2098 = vtanh.f32 %v311_v24  ;;  %v312_v26 = vmul.f32 0.5, %v311_v24 }
 0x9b0   :  { %2100 = vtanh.f32 %v312_v26 }
 0x9b4   :  { %v2099_v25 = vpop.eup %2098 }
 0x9b5   :  { %322 = vrot.lane.b32.xlu1 %v2099_v25, %s2267_s25 }
 0x9b6   :  { %v2101_v27 = vpop.eup %2100 }
 0x9b7   :  { %v314_v28 = vmul.f32 0.5, %v2101_v27 }
 0x9b9   :  { %v315_v29 = vadd.f32 0.5, %v314_v28 }
 0x9bb   :  { %v320_v33 = vmul.f32 %v318_v32, %v315_v29 }
 0xa27   :  { %v323_v30 = vpop.permute.xlu1 %322 }
 0xa28   :  { %v325_v31 = vmul.f32 %v323_v30, %v315_v29 }
 0xa2a   :  { %327 = vrot.lane.b32.xlu2 %v325_v31, %s2268_s26 }
 0xa84   :  { %v328_v5 = vpop.permute.xlu2 %327 }
 0xa85   :  { %v330_v34 = vadd.f32 %v328_v5, %v320_v33 }
 0xa87   :  { %2102 = vtanh.f32 %v330_v34  ;;  %v374_v7 = vrot.slane %v330_v34, 6 }
 0xa8d   :  { %v2103_v35 = vpop.eup %2102 }
 0xa8e   :  { %333 = vrot.lane.b32.xlu0 %v2103_v35, %s2269_s27 }
 0xb00   :  { %v334_v36 = vpop.permute.xlu0 %333 }
 0xb01   :  { %v336_v37 = vmul.f32 %v334_v36, %v315_v29 }
 0xb03   :  { %338 = vrot.lane.b32.xlu1 %v336_v37, %s2270_s28 }
 0xb75   :  { %v339_v42 = vpop.permute.xlu1 %338 }
 0xb76   :  { %341 = vst.msk [vmem:[#allocation2 + $0x8] sm:$0x3] %vm107_vm1, %v339_v42  ;;  %2023 = vmatmul.msk.f32.vlgmr.msrb.gmra.mxu3 %vm56_vm2, %v339_v42 }
 0xb77   :  { %909 = vmatpush.msrb.mxu3 %v2376_v41 }
 0xb7e   :  { %2029 = vmatmul.msk.f32.vlgmr.msra.gmra.mxu3 %vm25_vm0, %v2305_v2 }
 0xb86   :  { %2030 = vmatmul.msk.f32.gmra.mxu3 %vm25_vm0, %v18_v19 }
 0xbf9   :  { %v361_v43 = vpop.f32.mrf.mxu3 }
 0xbfa   :  { %v365_v44 = vrot.slane %v361_v43, 6 }
 0xbfc   :  { %v367_v45 = vadd.f32 %v365_v44, %v2360_v22 }
 0xbfe   :  { %2104 = vtanh.f32 %v367_v45  ;;  %v368_v55 = vmul.f32 0.5, %v367_v45 }
 0xc01   :  { %v541_v47 = vpop.f32.mrf.mxu3 }
 0xc02   :  { %v2394_v48 = vadd.f32 %v2071_v46, %v541_v47 }
 0xc04   :  { %v2105_v49 = vpop.eup %2104 }
 0xc05   :  { %378 = vrot.lane.b32.xlu2 %v2105_v49, %s2267_s25 }
 0xc09   :  { %v544_v2 = vpop.f32.mrf.mxu3 }
 0xc0a   :  { %v2397_v52 = vadd.f32 %v2071_v46, %v544_v2 }
 0xc0c   :  { %v572_v53 = vadd.f32 %v570_v51, %v2397_v52 }
 0xc0e   :  { %2106 = vtanh.f32 %v572_v53  ;;  %v573_v62 = vmul.f32 0.5, %v572_v53 }
 0xc0f   :  { %2108 = vtanh.f32 %v368_v55 }
 0xc10   :  { %2110 = vtanh.f32 %v573_v62 }
 0xc14   :  { %v2107_v54 = vpop.eup %2106 }
 0xc15   :  { %580 = vrot.lane.b32.xlu0 %v2107_v54, %s2267_s25  ;;  %v2109_v56 = vpop.eup %2108 }
 0xc16   :  { %v370_v57 = vmul.f32 0.5, %v2109_v56  ;;  %v2111_v63 = vpop.eup %2110 }
 0xc17   :  { %v575_v0 = vmul.f32 0.5, %v2111_v63 }
 0xc18   :  { %v371_v58 = vadd.f32 0.5, %v370_v57 }
 0xc19   :  { %v576_v1 = vadd.f32 0.5, %v575_v0 }
 0xc1a   :  { %v376_v9 = vmul.f32 %v374_v7, %v371_v58 }
 0xc1b   :  { %v578_v13 = vmul.f32 0.0, %v576_v1 }
 0xc5f   :  { %v379_v60 = vpop.permute.xlu2 %378 }
 0xc60   :  { %v381_v61 = vmul.f32 %v379_v60, %v371_v58 }
 0xc62   :  { %383 = vrot.lane.b32.xlu1 %v381_v61, %s2268_s26 }
 0xc87   :  { %v581_v3 = vpop.permute.xlu0 %580 }
 0xc88   :  { %v583_v6 = vmul.f32 %v581_v3, %v576_v1 }
 0xc8a   :  { %585 = vrot.lane.b32.xlu2 %v583_v6, %s2268_s26 }
 0xcd4   :  { %v384_v10 = vpop.permute.xlu1 %383 }
 0xcd5   :  { %v386_v11 = vadd.f32 %v384_v10, %v376_v9 }
 0xcd7   :  { %2112 = vtanh.f32 %v386_v11  ;;  %v433_v47 = vrot.slane %v386_v11, 6 }
 0xcdd   :  { %v2113_v12 = vpop.eup %2112 }
 0xcde   :  { %389 = vrot.lane.b32.xlu0 %v2113_v12, %s2269_s27 }
 0xce4   :  { %v586_v14 = vpop.permute.xlu2 %585 }
 0xce5   :  { %v588_v15 = vadd.f32 %v586_v14, %v578_v13 }
 0xce7   :  { %2114 = vtanh.f32 %v588_v15  ;;  %v635_v53 = vrot.slane %v588_v15, 2 }
 0xced   :  { %v2115_v16 = vpop.eup %2114 }
 0xcee   :  { %591 = vrot.lane.b32.xlu1 %v2115_v16, %s2269_s27 }
 0xd50   :  { %v390_v8 = vpop.permute.xlu0 %389 }
 0xd51   :  { %v2405_v18 = vmul.f32 %v390_v8, %v371_v58 }
 0xd53   :  { %v398_v19 = vrot.slane %v2405_v18, 2 }
 0xd55   :  { %399 = vrot.lane.b32.xlu2 %v398_v19, %s2270_s28 }
 0xd60   :  { %v592_v20 = vpop.permute.xlu1 %591 }
 0xd61   :  { %v2409_v21 = vmul.f32 %v592_v20, %v576_v1 }
 0xd63   :  { %v600_v23 = vrot.slane %v2409_v21, 6 }
 0xd65   :  { %601 = vrot.lane.b32.xlu0 %v600_v23, %s2270_s28 }
 0xdaf   :  { %v400_v24 = vpop.permute.xlu2 %399 }
 0xdb0   :  { %2024 = vmatmul.msk.f32.vlgmr.msra.gmra.mxu1 %vm56_vm2, %v400_v24 }
 0xdb1   :  { %791 = vmatpush.msra.mxu1 %v2376_v41 }
 0xdd7   :  { %v602_v25 = vpop.permute.xlu0 %601 }
 0xdd8   :  { %2032 = vmatmul.msk.f32.vlgmr.msrb.gmra.mxu1 %vm56_vm2, %v602_v25 }
 0xe2d   :  { %v420_v26 = vpop.f32.mrf.mxu1 }
 0xe2e   :  { %v424_v27 = vrot.slane %v420_v26, 4 }
 0xe30   :  { %v426_v28 = vadd.f32 %v424_v27, %v2360_v22 }
 0xe32   :  { %2116 = vtanh.f32 %v426_v28  ;;  %v427_v5 = vmul.f32 0.5, %v426_v28 }
 0xe38   :  { %v2117_v29 = vpop.eup %2116 }
 0xe39   :  { %437 = vrot.lane.b32.xlu1 %v2117_v29, %s2267_s25 }
 0xe55   :  { %v622_v30 = vpop.f32.mrf.mxu1 }
 0xe56   :  { %v626_v31 = vrot.slane %v622_v30, 4 }
 0xe58   :  { %v628_v32 = vadd.f32 %v626_v31, %v2397_v52 }
 0xe5a   :  { %2118 = vtanh.f32 %v628_v32  ;;  %v629_v36 = vmul.f32 0.5, %v628_v32 }
 0xe5b   :  { %2120 = vtanh.f32 %v427_v5 }
 0xe5c   :  { %2122 = vtanh.f32 %v629_v36 }
 0xe60   :  { %v2119_v33 = vpop.eup %2118 }
 0xe61   :  { %639 = vrot.lane.b32.xlu2 %v2119_v33, %s2267_s25  ;;  %v2121_v34 = vpop.eup %2120 }
 0xe62   :  { %v429_v35 = vmul.f32 0.5, %v2121_v34  ;;  %v2123_v42 = vpop.eup %2122 }
 0xe63   :  { %v631_v43 = vmul.f32 0.5, %v2123_v42 }
 0xe64   :  { %v430_v37 = vadd.f32 0.5, %v429_v35 }
 0xe65   :  { %v632_v44 = vadd.f32 0.5, %v631_v43 }
 0xe66   :  { %v435_v49 = vmul.f32 %v433_v47, %v430_v37 }
 0xe67   :  { %v637_v54 = vmul.f32 %v635_v53, %v632_v44 }
 0xeab   :  { %v438_v38 = vpop.permute.xlu1 %437 }
 0xeac   :  { %v440_v39 = vmul.f32 %v438_v38, %v430_v37 }
 0xeae   :  { %442 = vrot.lane.b32.xlu0 %v440_v39, %s2268_s26 }
 0xebb   :  { %v640_v45 = vpop.permute.xlu2 %639 }
 0xebc   :  { %v642_v46 = vmul.f32 %v640_v45, %v632_v44 }
 0xebe   :  { %644 = vrot.lane.b32.xlu1 %v642_v46, %s2268_s26 }
 0xf20   :  { %v443_v50 = vpop.permute.xlu0 %442 }
 0xf21   :  { %v2422_v51 = vadd.f32 %v443_v50, %v435_v49 }
 0xf23   :  { %2124 = vtanh.f32 %v2422_v51 }
 0xf29   :  { %v2125_v2 = vpop.eup %2124 }
 0xf2a   :  { %448 = vrot.lane.b32.xlu2 %v2125_v2, %s2269_s27 }
 0xf30   :  { %v645_v55 = vpop.permute.xlu1 %644 }
 0xf31   :  { %v647_v56 = vadd.f32 %v645_v55, %v637_v54 }
 0xf33   :  { %2126 = vtanh.f32 %v647_v56  ;;  %v694_v8 = vrot.slane %v647_v56, 2 }
 0xf39   :  { %v2127_v57 = vpop.eup %2126 }
 0xf3a   :  { %650 = vrot.lane.b32.xlu0 %v2127_v57, %s2269_s27 }
 0xf84   :  { %v449_v58 = vpop.permute.xlu2 %448 }
 0xf85   :  { %v2427_v60 = vmul.f32 %v449_v58, %v430_v37 }
 0xf87   :  { %v457_v61 = vrot.slane %v2427_v60, 4 }
 0xf89   :  { %458 = vrot.lane.b32.xlu1 %v457_v61, %s2270_s28 }
 0xfac   :  { %v651_v62 = vpop.permute.xlu0 %650 }
 0xfad   :  { %v2431_v63 = vmul.f32 %v651_v62, %v632_v44 }
 0xfaf   :  { %v659_v0 = vrot.slane %v2431_v63, 4 }
 0xfb1   :  { %660 = vrot.lane.b32.xlu2 %v659_v0, %s2270_s28 }
 0xffb   :  { %v459_v1 = vpop.permute.xlu1 %458 }
 0xffc   :  { %2025 = vmatmul.msk.f32.vlgmr.msra.gmra.mxu2 %vm56_vm2, %v459_v1 }
 0xffd   :  { %850 = vmatpush.msra.mxu2 %v2376_v41 }
0x100b   :  { %v661_v3 = vpop.permute.xlu2 %660 }
0x100c   :  { %2033 = vmatmul.msk.f32.vlgmr.msrb.gmra.mxu2 %vm56_vm2, %v661_v3 }
0x107f   :  { %v2438_v6 = vpop.f32.mrf.mxu2 }
0x108f   :  { %v681_v7 = vpop.f32.mrf.mxu2 }
0x1090   :  { %v685_v9 = vrot.slane %v681_v7, 6 }
0x1092   :  { %v687_v10 = vadd.f32 %v685_v9, %v2397_v52 }
0x1094   :  { %2128 = vtanh.f32 %v687_v10  ;;  %v688_v12 = vmul.f32 0.5, %v687_v10 }
0x1096   :  { %2130 = vtanh.f32 %v688_v12 }
0x109a   :  { %v2129_v11 = vpop.eup %2128 }
0x109b   :  { %698 = vrot.lane.b32.xlu0 %v2129_v11, %s2267_s25 }
0x109c   :  { %v2131_v13 = vpop.eup %2130 }
0x109d   :  { %v690_v14 = vmul.f32 0.5, %v2131_v13 }
0x109f   :  { %v691_v15 = vadd.f32 0.5, %v690_v14 }
0x10a1   :  { %v696_v19 = vmul.f32 %v694_v8, %v691_v15 }
0x110d   :  { %v699_v16 = vpop.permute.xlu0 %698 }
0x110e   :  { %v701_v41 = vmul.f32 %v699_v16, %v691_v15 }
0x1110   :  { %703 = vrot.lane.b32.xlu1 %v701_v41, %s2268_s26 }
0x1182   :  { %v704_v20 = vpop.permute.xlu1 %703 }
0x1183   :  { %v706_v23 = vadd.f32 %v704_v20, %v696_v19 }
0x1185   :  { %2132 = vtanh.f32 %v706_v23  ;;  %v750_v37 = vrot.slane %v706_v23, 2 }
0x118b   :  { %v2133_v24 = vpop.eup %2132 }
0x118c   :  { %709 = vrot.lane.b32.xlu2 %v2133_v24, %s2269_s27 }
0x11e6   :  { %v710_v25 = vpop.permute.xlu2 %709 }
0x11e7   :  { %v2444_v26 = vmul.f32 %v710_v25, %v691_v15 }
0x11e9   :  { %v718_v27 = vrot.slane %v2444_v26, 2 }
0x11eb   :  { %719 = vrot.lane.b32.xlu0 %v718_v27, %s2270_s28 }
0x125d   :  { %v720_v28 = vpop.permute.xlu0 %719 }
0x125e   :  { %2034 = vmatmul.msk.f32.vlgmr.msra.gmra.mxu0 %vm56_vm2, %v720_v28 }
0x12db   :  { %v740_v29 = vpop.f32.mrf.mxu0 }
0x12dc   :  { %v743_v30 = vadd.f32 %v740_v29, %v2397_v52 }
0x12de   :  { %2134 = vtanh.f32 %v743_v30  ;;  %v744_v32 = vmul.f32 0.5, %v743_v30 }
0x12e0   :  { %2136 = vtanh.f32 %v744_v32 }
0x12e4   :  { %v2135_v31 = vpop.eup %2134 }
0x12e5   :  { %754 = vrot.lane.b32.xlu1 %v2135_v31, %s2267_s25 }
0x12e6   :  { %v2137_v33 = vpop.eup %2136 }
0x12e7   :  { %v746_v5 = vmul.f32 0.5, %v2137_v33 }
0x12e9   :  { %v747_v34 = vadd.f32 0.5, %v746_v5 }
0x12eb   :  { %v752_v38 = vmul.f32 %v750_v37, %v747_v34 }
0x1357   :  { %v755_v35 = vpop.permute.xlu1 %754 }
0x1358   :  { %v757_v36 = vmul.f32 %v755_v35, %v747_v34 }
0x135a   :  { %759 = vrot.lane.b32.xlu2 %v757_v36, %s2268_s26 }
0x13b4   :  { %v760_v39 = vpop.permute.xlu2 %759 }
0x13b5   :  { %v762_v42 = vadd.f32 %v760_v39, %v752_v38 }
0x13b7   :  { %2138 = vtanh.f32 %v762_v42  ;;  %v806_v58 = vrot.slane %v762_v42, 2 }
0x13bd   :  { %v2139_v43 = vpop.eup %2138 }
0x13be   :  { %765 = vrot.lane.b32.xlu0 %v2139_v43, %s2269_s27 }
0x1430   :  { %v766_v52 = vpop.permute.xlu0 %765 }
0x1431   :  { %v768_v44 = vmul.f32 %v766_v52, %v747_v34 }
0x1433   :  { %770 = vrot.lane.b32.xlu1 %v768_v44, %s2270_s28 }
0x14a5   :  { %v771_v45 = vpop.permute.xlu1 %770 }
0x14a6   :  { %773 = vst.msk [vmem:[#allocation3 + $0x8] sm:$0x3] %vm107_vm1, %v771_v45  ;;  %2035 = vmatmul.msk.f32.vlgmr.msra.gmra.mxu1 %vm56_vm2, %v771_v45 }
0x1523   :  { %v793_v46 = vpop.f32.mrf.mxu1 }
0x1524   :  { %v797_v47 = vrot.slane %v793_v46, 2 }
0x1526   :  { %v799_v49 = vadd.f32 %v797_v47, %v2394_v48 }
0x1528   :  { %2140 = vtanh.f32 %v799_v49  ;;  %v800_v2 = vmul.f32 0.5, %v799_v49 }
0x152a   :  { %2142 = vtanh.f32 %v800_v2 }
0x152e   :  { %v2141_v50 = vpop.eup %2140 }
0x152f   :  { %810 = vrot.lane.b32.xlu2 %v2141_v50, %s2267_s25 }
0x1530   :  { %v2143_v53 = vpop.eup %2142 }
0x1531   :  { %v802_v54 = vmul.f32 0.5, %v2143_v53 }
0x1533   :  { %v803_v55 = vadd.f32 0.5, %v802_v54 }
0x1535   :  { %v808_v61 = vmul.f32 %v806_v58, %v803_v55 }
0x1589   :  { %v811_v56 = vpop.permute.xlu2 %810 }
0x158a   :  { %v813_v57 = vmul.f32 %v811_v56, %v803_v55 }
0x158c   :  { %815 = vrot.lane.b32.xlu0 %v813_v57, %s2268_s26 }
0x15fe   :  { %v816_v62 = vpop.permute.xlu0 %815 }
0x15ff   :  { %v818_v0 = vadd.f32 %v816_v62, %v808_v61 }
0x1601   :  { %2144 = vtanh.f32 %v818_v0  ;;  %v865_v23 = vrot.slane %v818_v0, 2 }
0x1607   :  { %v2145_v1 = vpop.eup %2144 }
0x1608   :  { %821 = vrot.lane.b32.xlu1 %v2145_v1, %s2269_s27 }
0x167a   :  { %v822_v3 = vpop.permute.xlu1 %821 }
0x167b   :  { %v2460_v7 = vmul.f32 %v822_v3, %v803_v55 }
0x167d   :  { %v830_v9 = vrot.slane %v2460_v7, 6 }
0x167f   :  { %831 = vrot.lane.b32.xlu2 %v830_v9, %s2270_s28 }
0x16d9   :  { %v832_v10 = vpop.permute.xlu2 %831 }
0x16da   :  { %2036 = vmatmul.msk.f32.vlgmr.msra.gmra.mxu2 %vm56_vm2, %v832_v10 }
0x175d   :  { %v852_v11 = vpop.f32.mrf.mxu2 }
0x175e   :  { %v856_v12 = vrot.slane %v852_v11, 4 }
0x1760   :  { %v858_v13 = vadd.f32 %v856_v12, %v2394_v48 }
0x1762   :  { %2146 = vtanh.f32 %v858_v13  ;;  %v859_v15 = vmul.f32 0.5, %v858_v13 }
0x1764   :  { %2148 = vtanh.f32 %v859_v15 }
0x1768   :  { %v2147_v14 = vpop.eup %2146 }
0x1769   :  { %869 = vrot.lane.b32.xlu0 %v2147_v14, %s2267_s25 }
0x176a   :  { %v2149_v16 = vpop.eup %2148 }
0x176b   :  { %v861_v41 = vmul.f32 0.5, %v2149_v16 }
0x176d   :  { %v862_v8 = vadd.f32 0.5, %v861_v41  ;;  %v2044_v41 = vld [vmem:[%s2764_s2 + $0x10] sm:$0xff] }
0x176e   :  { %1072 = vmatpush.msrb.mxu2 %v2044_v41  ;;  %1122 = vmatpush.msra.mxu3 %v2044_v41 }
0x176f   :  { %v867_v24 = vmul.f32 %v865_v23, %v862_v8  ;;  %1073 = vmatmul.f32.vlgmr.msrb.gmra.mxu2 %v2266_v4  ;;  %1181 = vmatpush.msra.mxu0 %v2044_v41 }
0x1770   :  { %1240 = vmatpush.msra.mxu2 %v2044_v41 }
0x1772   :  { %1470 = vmatpush.msrb.mxu2 %v2044_v41 }
0x17db   :  { %v870_v19 = vpop.permute.xlu0 %869 }
0x17dc   :  { %v872_v20 = vmul.f32 %v870_v19, %v862_v8 }
0x17de   :  { %874 = vrot.lane.b32.xlu1 %v872_v20, %s2268_s26 }
0x1850   :  { %v875_v25 = vpop.permute.xlu1 %874 }
0x1851   :  { %v877_v27 = vadd.f32 %v875_v25, %v867_v24 }
0x1853   :  { %2150 = vtanh.f32 %v877_v27  ;;  %v924_v52 = vrot.slane %v877_v27, 2  ;;  %v2518_v27 = vld [vmem:[%s2765_s3 + $0x2] ss:$0 sm:$0xff] }
0x1859   :  { %v2151_v28 = vpop.eup %2150 }
0x185a   :  { %880 = vrot.lane.b32.xlu2 %v2151_v28, %s2269_s27 }
0x18b4   :  { %v881_v29 = vpop.permute.xlu2 %880 }
0x18b5   :  { %v883_v30 = vmul.f32 %v881_v29, %v862_v8  ;;  %v2039_v8 = vld [vmem:[%s2762_s1 + $0x20] sm:$0xff]  ;;  %v1074_v29 = vpop.f32.mrf.mxu2 }
0x18b7   :  { %v889_v31 = vrot.slane %v883_v30, 4 }
0x18b9   :  { %890 = vrot.lane.b32.xlu0 %v889_v31, %s2270_s28 }
0x192b   :  { %v891_v32 = vpop.permute.xlu0 %890 }
0x192c   :  { %2037 = vmatmul.msk.f32.vlgmr.msrb.gmra.mxu3 %vm56_vm2, %v891_v32 }
0x192d   :  { %1299 = vmatpush.msrb.mxu3 %v2044_v41 }
0x19af   :  { %v911_v33 = vpop.f32.mrf.mxu3 }
0x19b0   :  { %v915_v5 = vrot.slane %v911_v33, 6 }
0x19b2   :  { %v917_v34 = vadd.f32 %v915_v5, %v2394_v48 }
0x19b4   :  { %2152 = vtanh.f32 %v917_v34  ;;  %v918_v36 = vmul.f32 0.5, %v917_v34 }
0x19b6   :  { %2154 = vtanh.f32 %v918_v36 }
0x19ba   :  { %v2153_v35 = vpop.eup %2152 }
0x19bb   :  { %928 = vrot.lane.b32.xlu1 %v2153_v35, %s2267_s25 }
0x19bc   :  { %v2155_v37 = vpop.eup %2154 }
0x19bd   :  { %v920_v38 = vmul.f32 0.5, %v2155_v37 }
0x19bf   :  { %v921_v39 = vadd.f32 0.5, %v920_v38 }
0x19c1   :  { %v926_v44 = vmul.f32 %v924_v52, %v921_v39 }
0x1a2d   :  { %v929_v42 = vpop.permute.xlu1 %928 }
0x1a2e   :  { %v931_v43 = vmul.f32 %v929_v42, %v921_v39 }
0x1a30   :  { %933 = vrot.lane.b32.xlu2 %v931_v43, %s2268_s26 }
0x1a8a   :  { %v934_v45 = vpop.permute.xlu2 %933 }
0x1a8b   :  { %v936_v46 = vadd.f32 %v934_v45, %v926_v44 }
0x1a8d   :  { %2156 = vtanh.f32 %v936_v46 }
0x1a93   :  { %v2157_v47 = vpop.eup %2156 }
0x1a94   :  { %939 = vrot.lane.b32.xlu0 %v2157_v47, %s2269_s27 }
0x1b06   :  { %v940_v49 = vpop.permute.xlu0 %939 }
0x1b07   :  { %v942_v50 = vmul.f32 %v940_v49, %v921_v39 }
0x1b09   :  { %v948_v2 = vrot.slane %v942_v50, 2 }
0x1b0b   :  { %949 = vrot.lane.b32.xlu1 %v948_v2, %s2270_s28 }
0x1b7d   :  { %v950_v53 = vpop.permute.xlu1 %949 }
0x1b7e   :  { %2038 = vmatmul.msk.f32.vlgmr.msrb.gmra.mxu0 %vm56_vm2, %v950_v53 }
0x1b7f   :  { %1352 = vmatpush.msrb.mxu0 %v2044_v41 }
0x1bfb   :  { %v970_v54 = vpop.f32.mrf.mxu0 }
0x1bfc   :  { %v973_v55 = vadd.f32 %v970_v54, %v2394_v48  ;;  %v980_v48 = vrot.slane %v936_v46, 2 }
0x1bfe   :  { %2158 = vtanh.f32 %v973_v55  ;;  %v974_v57 = vmul.f32 0.5, %v973_v55 }
0x1c00   :  { %2160 = vtanh.f32 %v974_v57 }
0x1c04   :  { %v2159_v56 = vpop.eup %2158 }
0x1c05   :  { %984 = vrot.lane.b32.xlu2 %v2159_v56, %s2267_s25 }
0x1c06   :  { %v2161_v58 = vpop.eup %2160 }
0x1c07   :  { %v976_v61 = vmul.f32 0.5, %v2161_v58 }
0x1c09   :  { %v977_v62 = vadd.f32 0.5, %v976_v61 }
0x1c0d   :  { %826 = vrot.lane.b32.xlu2 %v2460_v7, %s2270_s28  ;;  %v982_v7 = vmul.f32 %v980_v48, %v977_v62 }
0x1c5f   :  { %v985_v0 = vpop.permute.xlu2 %984 }
0x1c60   :  { %v987_v1 = vmul.f32 %v985_v0, %v977_v62 }
0x1c62   :  { %989 = vrot.lane.b32.xlu0 %v987_v1, %s2268_s26 }
0x1c67   :  { %v827_v3 = vpop.permute.xlu2 %826 }
0x1c68   :  { %829 = vst.msk [vmem:[#allocation3] sm:$0xc0] %vm284_vm3, %v827_v3 }
0x1c6a   :  { %885 = vrot.lane.b32.xlu0 %v883_v30, %s2270_s28 }
0x1c72   :  { %161 = vrot.lane.b32.xlu0 %v2332_v40, %s2270_s28 }
0x1cd4   :  { %v990_v9 = vpop.permute.xlu0 %989 }
0x1cd5   :  { %v992_v10 = vadd.f32 %v990_v9, %v982_v7 }
0x1cd7   :  { %2162 = vtanh.f32 %v992_v10 }
0x1cdc   :  { %v886_v11 = vpop.permute.xlu0 %885 }
0x1cdd   :  { %v2163_v12 = vpop.eup %2162  ;;  %888 = vst.msk [vmem:[#allocation3] sm:$0x30] %vm224_vm4, %v886_v11 }
0x1cde   :  { %995 = vrot.lane.b32.xlu1 %v2163_v12, %s2269_s27 }
0x1ce4   :  { %v162_v13 = vpop.permute.xlu0 %161 }
0x1ce5   :  { %165 = vst.msk [vmem:[#allocation2] sm:$0xc] %vm164_vm5, %v162_v13 }
0x1ce6   :  { %944 = vrot.lane.b32.xlu1 %v942_v50, %s2270_s28 }
0x1cee   :  { %221 = vrot.lane.b32.xlu1 %v2341_v59, %s2270_s28  ;;  %v2040_v59 = vld [vmem:[%s2762_s1 + $0x28] sm:$0xff] }
0x1cef   :  { %1046 = vmatpush.msrb.mxu1 %v2040_v59 }
0x1cf1   :  { %1047 = vmatpush.msrb.mxu1 %v2039_v8 }
0x1cf3   :  { %1411 = vmatpush.msra.mxu1 %v2044_v41 }
0x1d50   :  { %v996_v40 = vpop.permute.xlu1 %995 }
0x1d51   :  { %v998_v14 = vmul.f32 %v996_v40, %v977_v62 }
0x1d53   :  { %1000 = vrot.lane.b32.xlu2 %v998_v14, %s2270_s28 }
0x1d58   :  { %v945_v15 = vpop.permute.xlu1 %944 }
0x1d59   :  { %947 = vst.msk [vmem:[#allocation3] sm:$0xc] %vm164_vm5, %v945_v15 }
0x1d5b   :  { %281 = vrot.lane.b32.xlu2 %v2350_v17, %s2270_s28 }
0x1d60   :  { %v222_v16 = vpop.permute.xlu1 %221 }
0x1d61   :  { %225 = vst.msk [vmem:[#allocation2] sm:$0x30] %vm224_vm4, %v222_v16  ;;  %v483_v16 = vrot.slane %v2438_v6, 2 }
0x1d63   :  { %v485_v59 = vadd.f32 %v483_v16, %v2360_v22 }
0x1d65   :  { %v486_v6 = vmul.f32 0.5, %v485_v59 }
0x1dad   :  { %v1001_v17 = vpop.permute.xlu2 %1000 }
0x1dae   :  { %1003 = vst.msk [vmem:[#allocation3] sm:$0x3] %vm107_vm1, %v1001_v17 }
0x1db5   :  { %v282_v19 = vpop.permute.xlu2 %281  ;;  %v1006_v20 = vld [vmem:[#allocation3] sm:$0xff] }
0x1db6   :  { %285 = vst.msk [vmem:[#allocation2] sm:$0xc0] %vm284_vm3, %v282_v19  ;;  %1010 = vrot.lane.b32.xlu0 %v1006_v20, %s2268_s26 }
0x1dbd   :  { %v1004_v24 = vld [vmem:[#allocation2] sm:$0xff] }
0x1e28   :  { %v1011_v23 = vpop.permute.xlu0 %1010 }
0x1e29   :  { %v2511_v25 = vsel %vm56_vm2, %v1004_v24, %v1011_v23 }
0x1e2a   :  { %2042 = vmatmul.msk.f32.vlgmr.msrb.gmra.mxu1 %vm25_vm0, %v2511_v25 }
0x1ea7   :  { %v1049_v28 = vpop.f32.mrf.mxu1 }
0x1ea8   :  { %v2521_v30 = vadd.f32 %v2518_v27, %v1049_v28 }
0x1eaa   :  { %v1077_v31 = vadd.f32 %v1074_v29, %v2521_v30 }
0x1eac   :  { %2164 = vtanh.f32 %v1077_v31  ;;  %v1078_v33 = vmul.f32 0.5, %v1077_v31 }
0x1eae   :  { %2166 = vtanh.f32 %v1078_v33 }
0x1eb2   :  { %v2165_v32 = vpop.eup %2164 }
0x1eb3   :  { %1085 = vrot.lane.b32.xlu1 %v2165_v32, %s2267_s25 }
0x1eb4   :  { %v2167_v5 = vpop.eup %2166 }
0x1eb5   :  { %v1080_v34 = vmul.f32 0.5, %v2167_v5 }
0x1eb7   :  { %v1081_v35 = vadd.f32 0.5, %v1080_v34 }
0x1eb9   :  { %v1083_v38 = vmul.f32 0.0, %v1081_v35 }
0x1f25   :  { %v1086_v36 = vpop.permute.xlu1 %1085 }
0x1f26   :  { %v1088_v37 = vmul.f32 %v1086_v36, %v1081_v35 }
0x1f28   :  { %1090 = vrot.lane.b32.xlu2 %v1088_v37, %s2268_s26 }
0x1f82   :  { %v1091_v39 = vpop.permute.xlu2 %1090 }
0x1f83   :  { %v1093_v42 = vadd.f32 %v1091_v39, %v1083_v38  ;;  %v492_v38 = vrot.slane %v2422_v51, 6 }
0x1f85   :  { %2168 = vtanh.f32 %v1093_v42  ;;  %v1137_v58 = vrot.slane %v1093_v42, 6 }
0x1f8b   :  { %v2169_v43 = vpop.eup %2168 }
0x1f8c   :  { %1096 = vrot.lane.b32.xlu0 %v2169_v43, %s2269_s27 }
0x1ffe   :  { %v1097_v52 = vpop.permute.xlu0 %1096 }
0x1fff   :  { %v1099_v44 = vmul.f32 %v1097_v52, %v1081_v35 }
0x2001   :  { %1101 = vrot.lane.b32.xlu1 %v1099_v44, %s2270_s28 }
0x2073   :  { %v1102_v45 = vpop.permute.xlu1 %1101 }
0x2074   :  { %1104 = vst.msk [vmem:[#allocation4] sm:$0x3] %vm107_vm1, %v1102_v45  ;;  %2045 = vmatmul.msk.f32.vlgmr.msra.gmra.mxu3 %vm56_vm2, %v1102_v45 }
0x20f7   :  { %v1124_v46 = vpop.f32.mrf.mxu3 }
0x20f8   :  { %v1128_v47 = vrot.slane %v1124_v46, 6 }
0x20fa   :  { %v1130_v49 = vadd.f32 %v1128_v47, %v2521_v30 }
0x20fc   :  { %2170 = vtanh.f32 %v1130_v49  ;;  %v1131_v2 = vmul.f32 0.5, %v1130_v49 }
0x20fe   :  { %2172 = vtanh.f32 %v1131_v2 }
0x2102   :  { %v2171_v50 = vpop.eup %2170 }
0x2103   :  { %1141 = vrot.lane.b32.xlu2 %v2171_v50, %s2267_s25 }
0x2104   :  { %v2173_v53 = vpop.eup %2172 }
0x2105   :  { %v1133_v54 = vmul.f32 0.5, %v2173_v53 }
0x2107   :  { %v1134_v55 = vadd.f32 0.5, %v1133_v54 }
0x2109   :  { %v1139_v61 = vmul.f32 %v1137_v58, %v1134_v55 }
0x215d   :  { %v1142_v56 = vpop.permute.xlu2 %1141 }
0x215e   :  { %v1144_v57 = vmul.f32 %v1142_v56, %v1134_v55 }
0x2160   :  { %1146 = vrot.lane.b32.xlu0 %v1144_v57, %s2268_s26 }
0x21d2   :  { %v1147_v62 = vpop.permute.xlu0 %1146 }
0x21d3   :  { %v1149_v0 = vadd.f32 %v1147_v62, %v1139_v61 }
0x21d5   :  { %2174 = vtanh.f32 %v1149_v0  ;;  %v1196_v20 = vrot.slane %v1149_v0, 6 }
0x21db   :  { %v2175_v1 = vpop.eup %2174 }
0x21dc   :  { %1152 = vrot.lane.b32.xlu1 %v2175_v1, %s2269_s27 }
0x224e   :  { %v1153_v3 = vpop.permute.xlu1 %1152 }
0x224f   :  { %v2534_v48 = vmul.f32 %v1153_v3, %v1134_v55 }
0x2251   :  { %v1161_v7 = vrot.slane %v2534_v48, 2 }
0x2253   :  { %1162 = vrot.lane.b32.xlu2 %v1161_v7, %s2270_s28 }
0x22ad   :  { %v1163_v9 = vpop.permute.xlu2 %1162 }
0x22ae   :  { %2046 = vmatmul.msk.f32.vlgmr.msra.gmra.mxu0 %vm56_vm2, %v1163_v9 }
0x232b   :  { %v1183_v10 = vpop.f32.mrf.mxu0 }
0x232c   :  { %v1187_v11 = vrot.slane %v1183_v10, 4 }
0x232e   :  { %v1189_v12 = vadd.f32 %v1187_v11, %v2521_v30 }
0x2330   :  { %2176 = vtanh.f32 %v1189_v12  ;;  %v1190_v40 = vmul.f32 0.5, %v1189_v12 }
0x2332   :  { %2178 = vtanh.f32 %v1190_v40  ;;  %v2052_v40 = vld [vmem:[%s2762_s1 + $0x30] sm:$0xff] }
0x2333   :  { %2180 = vtanh.f32 %v485_v59 }
0x2336   :  { %v2177_v13 = vpop.eup %2176 }
0x2337   :  { %1200 = vrot.lane.b32.xlu0 %v2177_v13, %s2267_s25  ;;  %v2053_v13 = vld [vmem:[%s2762_s1 + $0x38] sm:$0xff] }
0x2338   :  { %v2179_v14 = vpop.eup %2178  ;;  %1531 = vmatpush.msra.mxu3 %v2053_v13 }
0x2339   :  { %v1192_v15 = vmul.f32 0.5, %v2179_v14  ;;  %v2181_v19 = vpop.eup %2180 }
0x233a   :  { %1532 = vmatpush.msra.mxu3 %v2052_v40 }
0x233b   :  { %v1193_v41 = vadd.f32 0.5, %v1192_v15 }
0x233d   :  { %v1198_v23 = vmul.f32 %v1196_v20, %v1193_v41 }
0x23a9   :  { %v1201_v8 = vpop.permute.xlu0 %1200 }
0x23aa   :  { %v1203_v17 = vmul.f32 %v1201_v8, %v1193_v41  ;;  %v2073_v8 = vld [vmem:[%s2765_s3 + $0x3] ss:$0 sm:$0xff] }
0x23ac   :  { %1205 = vrot.lane.b32.xlu1 %v1203_v17, %s2268_s26 }
0x23b4   :  { %496 = vrot.lane.b32.xlu1 %v2181_v19, %s2267_s25 }
0x241e   :  { %v1206_v24 = vpop.permute.xlu1 %1205 }
0x241f   :  { %v1208_v28 = vadd.f32 %v1206_v24, %v1198_v23 }
0x2421   :  { %2182 = vtanh.f32 %v1208_v28 }
0x2422   :  { %2184 = vtanh.f32 %v486_v6 }
0x2426   :  { %v497_v34 = vpop.permute.xlu1 %496 }
0x2427   :  { %v2183_v29 = vpop.eup %2182 }
0x2428   :  { %1211 = vrot.lane.b32.xlu2 %v2183_v29, %s2269_s27  ;;  %v2185_v32 = vpop.eup %2184 }
0x2429   :  { %v488_v5 = vmul.f32 0.5, %v2185_v32 }
0x242b   :  { %v489_v35 = vadd.f32 0.5, %v488_v5 }
0x242d   :  { %v499_v36 = vmul.f32 %v497_v34, %v489_v35  ;;  %v494_v39 = vmul.f32 %v492_v38, %v489_v35 }
0x2482   :  { %v1212_v31 = vpop.permute.xlu2 %1211 }
0x2483   :  { %v2546_v22 = vmul.f32 %v1212_v31, %v1193_v41 }
0x2485   :  { %v1220_v33 = vrot.slane %v2546_v22, 4 }
0x2487   :  { %1221 = vrot.lane.b32.xlu0 %v1220_v33, %s2270_s28 }
0x248f   :  { %501 = vrot.lane.b32.xlu0 %v499_v36, %s2268_s26  ;;  %v2608_v36 = vld [vmem:[%s2764_s2 + $0x18] sm:$0xff] }
0x2490   :  { %1557 = vmatpush.msra.mxu0 %v2608_v36  ;;  %1613 = vmatpush.msrb.mxu1 %v2608_v36 }
0x2497   :  { %596 = vrot.lane.b32.xlu0 %v2409_v21, %s2270_s28 }
0x24f9   :  { %v1222_v37 = vpop.permute.xlu0 %1221 }
0x24fa   :  { %2047 = vmatmul.msk.f32.vlgmr.msra.gmra.mxu2 %vm56_vm2, %v1222_v37 }
0x24fb   :  { %1672 = vmatpush.msra.mxu2 %v2608_v36 }
0x2501   :  { %v502_v42 = vpop.permute.xlu0 %501 }
0x2502   :  { %v504_v43 = vadd.f32 %v502_v42, %v494_v39 }
0x2509   :  { %v597_v52 = vpop.permute.xlu0 %596 }
0x250a   :  { %599 = vst.msk [vmem:[#allocation3 + $0x8] sm:$0xc0] %vm284_vm3, %v597_v52 }
0x257d   :  { %v1242_v44 = vpop.f32.mrf.mxu2 }
0x257e   :  { %v1246_v45 = vrot.slane %v1242_v44, 2 }
0x2580   :  { %v1248_v46 = vadd.f32 %v1246_v45, %v2521_v30 }
0x2582   :  { %2186 = vtanh.f32 %v1248_v46  ;;  %v1249_v51 = vmul.f32 0.5, %v1248_v46 }
0x2583   :  { %2188 = vtanh.f32 %v504_v43 }
0x2584   :  { %2190 = vtanh.f32 %v1249_v51 }
0x2588   :  { %v2187_v47 = vpop.eup %2186 }
0x2589   :  { %1259 = vrot.lane.b32.xlu2 %v2187_v47, %s2267_s25  ;;  %v2189_v21 = vpop.eup %2188 }
0x258a   :  { %v2191_v49 = vpop.eup %2190 }
0x258b   :  { %v1251_v50 = vmul.f32 0.5, %v2191_v49 }
0x258d   :  { %v1252_v2 = vadd.f32 0.5, %v1251_v50 }
0x2591   :  { %507 = vrot.lane.b32.xlu2 %v2189_v21, %s2269_s27 }
0x2599   :  { %714 = vrot.lane.b32.xlu2 %v2444_v26, %s2270_s28  ;;  %v1255_v26 = vrot.slane %v1208_v28, 6 }
0x259b   :  { %v1257_v56 = vmul.f32 %v1255_v26, %v1252_v2 }
0x25a1   :  { %453 = vrot.lane.b32.xlu2 %v2427_v60, %s2270_s28 }
0x25e3   :  { %v1260_v30 = vpop.permute.xlu2 %1259 }
0x25e4   :  { %v1262_v53 = vmul.f32 %v1260_v30, %v1252_v2 }
0x25e6   :  { %1264 = vrot.lane.b32.xlu1 %v1262_v53, %s2268_s26 }
0x25eb   :  { %v508_v54 = vpop.permute.xlu2 %507 }
0x25ee   :  { %655 = vrot.lane.b32.xlu1 %v2431_v63, %s2270_s28  ;;  %v510_v63 = vmul.f32 %v508_v54, %v489_v35 }
0x25f3   :  { %v715_v55 = vpop.permute.xlu2 %714 }
0x25f4   :  { %717 = vst.msk [vmem:[#allocation3 + $0x8] sm:$0xc] %vm164_vm5, %v715_v55 }
0x25f6   :  { %394 = vrot.lane.b32.xlu1 %v2405_v18, %s2270_s28 }
0x25fb   :  { %v454_v60 = vpop.permute.xlu2 %453 }
0x25fc   :  { %456 = vst.msk [vmem:[#allocation2 + $0x8] sm:$0x30] %vm224_vm4, %v454_v60 }
0x2658   :  { %v1265_v57 = vpop.permute.xlu1 %1264 }
0x2659   :  { %v1267_v58 = vadd.f32 %v1265_v57, %v1257_v56 }
0x265b   :  { %2192 = vtanh.f32 %v1267_v58  ;;  %v1311_v6 = vrot.slane %v1267_v58, 6 }
0x2660   :  { %v656_v61 = vpop.permute.xlu1 %655 }
0x2661   :  { %v2193_v62 = vpop.eup %2192  ;;  %658 = vst.msk [vmem:[#allocation3 + $0x8] sm:$0x30] %vm224_vm4, %v656_v61 }
0x2662   :  { %1270 = vrot.lane.b32.xlu0 %v2193_v62, %s2269_s27 }
0x2668   :  { %v395_v0 = vpop.permute.xlu1 %394  ;;  %v1007_v1 = vld [vmem:[#allocation3 + $0x8] sm:$0xff] }
0x2669   :  { %397 = vst.msk [vmem:[#allocation2 + $0x8] sm:$0xc] %vm164_vm5, %v395_v0  ;;  %1012 = vrot.lane.b32.xlu2 %v1007_v1, %s2268_s26 }
0x266a   :  { %512 = vrot.lane.b32.xlu0 %v510_v63, %s2270_s28 }
0x26c3   :  { %v1013_v10 = vpop.permute.xlu2 %1012 }
0x26d4   :  { %v1271_v18 = vpop.permute.xlu0 %1270 }
0x26d5   :  { %v2575_v3 = vmul.f32 %v1271_v18, %v1252_v2 }
0x26d7   :  { %v1279_v7 = vrot.slane %v2575_v3, 6 }
0x26d9   :  { %1280 = vrot.lane.b32.xlu1 %v1279_v7, %s2270_s28 }
0x26dc   :  { %v513_v9 = vpop.permute.xlu0 %512 }
0x26dd   :  { %515 = vst.msk [vmem:[#allocation2 + $0x8] sm:$0xc0] %vm284_vm3, %v513_v9 }
0x26e4   :  { %v1005_v11 = vld [vmem:[#allocation2 + $0x8] sm:$0xff] }
0x26e5   :  { %v1017_v12 = vsel %vm56_vm2, %v1005_v11, %v1013_v10 }
0x26e6   :  { %2043 = vmatmul.msk.f32.gmra.mxu1 %vm25_vm0, %v1017_v12 }
0x274b   :  { %v1281_v14 = vpop.permute.xlu1 %1280 }
0x274c   :  { %2048 = vmatmul.msk.f32.vlgmr.msrb.gmra.mxu3 %vm56_vm2, %v1281_v14 }
0x274d   :  { %1902 = vmatpush.msrb.mxu3 %v2608_v36 }
0x2754   :  { %2055 = vmatmul.msk.f32.vlgmr.msra.gmra.mxu3 %vm25_vm0, %v2511_v25 }
0x275c   :  { %2056 = vmatmul.msk.f32.gmra.mxu3 %vm25_vm0, %v1017_v12 }
0x2763   :  { %v1052_v15 = vpop.f32.mrf.mxu1 }
0x2764   :  { %v2593_v16 = vadd.f32 %v2518_v27, %v1052_v15 }
0x27cf   :  { %v1301_v41 = vpop.f32.mrf.mxu3 }
0x27d0   :  { %v1304_v59 = vadd.f32 %v1301_v41, %v2593_v16 }
0x27d2   :  { %2194 = vtanh.f32 %v1304_v59  ;;  %v1305_v25 = vmul.f32 0.5, %v1304_v59 }
0x27d4   :  { %2196 = vtanh.f32 %v1305_v25 }
0x27d7   :  { %v1534_v17 = vpop.f32.mrf.mxu3 }
0x27d8   :  { %v2195_v19 = vpop.eup %2194  ;;  %v2599_v20 = vadd.f32 %v2073_v8, %v1534_v17 }
0x27d9   :  { %1315 = vrot.lane.b32.xlu0 %v2195_v19, %s2267_s25 }
0x27da   :  { %v2197_v23 = vpop.eup %2196 }
0x27db   :  { %v1307_v24 = vmul.f32 0.5, %v2197_v23 }
0x27dd   :  { %v1308_v27 = vadd.f32 0.5, %v1307_v24 }
0x27df   :  { %v1313_v31 = vmul.f32 %v1311_v6, %v1308_v27  ;;  %v1537_v43 = vpop.f32.mrf.mxu3 }
0x27e0   :  { %v2620_v44 = vadd.f32 %v2073_v8, %v1537_v43 }
0x284b   :  { %v1316_v28 = vpop.permute.xlu0 %1315 }
0x284c   :  { %v1318_v29 = vmul.f32 %v1316_v28, %v1308_v27 }
0x284e   :  { %1320 = vrot.lane.b32.xlu1 %v1318_v29, %s2268_s26 }
0x28c0   :  { %v1321_v32 = vpop.permute.xlu1 %1320 }
0x28c1   :  { %v1323_v33 = vadd.f32 %v1321_v32, %v1313_v31 }
0x28c3   :  { %2198 = vtanh.f32 %v1323_v33  ;;  %v1367_v63 = vrot.slane %v1323_v33, 6 }
0x28c9   :  { %v2199_v5 = vpop.eup %2198 }
0x28ca   :  { %1326 = vrot.lane.b32.xlu2 %v2199_v5, %s2269_s27 }
0x2924   :  { %v1327_v34 = vpop.permute.xlu2 %1326 }
0x2925   :  { %v1329_v35 = vmul.f32 %v1327_v34, %v1308_v27 }
0x2927   :  { %1331 = vrot.lane.b32.xlu0 %v1329_v35, %s2270_s28 }
0x2999   :  { %v1332_v37 = vpop.permute.xlu0 %1331 }
0x299a   :  { %1334 = vst.msk [vmem:[#allocation4 + $0x8] sm:$0x3] %vm107_vm1, %v1332_v37  ;;  %2049 = vmatmul.msk.f32.vlgmr.msrb.gmra.mxu0 %vm56_vm2, %v1332_v37 }
0x299b   :  { %1731 = vmatpush.msrb.mxu0 %v2608_v36 }
0x29a2   :  { %1558 = vmatmul.f32.vlgmr.msra.gmra.mxu0 %v2266_v4 }
0x29a3   :  { %1961 = vmatpush.msra.mxu0 %v2608_v36 }
0x2a17   :  { %v1354_v38 = vpop.f32.mrf.mxu0 }
0x2a18   :  { %v1358_v39 = vrot.slane %v1354_v38, 6 }
0x2a1a   :  { %v1360_v42 = vadd.f32 %v1358_v39, %v2593_v16 }
0x2a1c   :  { %2200 = vtanh.f32 %v1360_v42  ;;  %v1361_v50 = vmul.f32 0.5, %v1360_v42 }
0x2a1f   :  { %v1559_v52 = vpop.f32.mrf.mxu0 }
0x2a20   :  { %v1563_v45 = vrot.slane %v1559_v52, 2 }
0x2a22   :  { %v2201_v46 = vpop.eup %2200  ;;  %v1565_v47 = vadd.f32 %v1563_v45, %v2620_v44 }
0x2a23   :  { %1371 = vrot.lane.b32.xlu1 %v2201_v46, %s2267_s25 }
0x2a24   :  { %2202 = vtanh.f32 %v1565_v47  ;;  %v1566_v4 = vmul.f32 0.5, %v1565_v47 }
0x2a26   :  { %2204 = vtanh.f32 %v1566_v4 }
0x2a27   :  { %2206 = vtanh.f32 %v1361_v50 }
0x2a2a   :  { %v2203_v21 = vpop.eup %2202 }
0x2a2b   :  { %1573 = vrot.lane.b32.xlu2 %v2203_v21, %s2267_s25 }
0x2a2c   :  { %v2205_v51 = vpop.eup %2204 }
0x2a2d   :  { %v1568_v49 = vmul.f32 0.5, %v2205_v51  ;;  %v2207_v54 = vpop.eup %2206 }
0x2a2e   :  { %v1363_v55 = vmul.f32 0.5, %v2207_v54 }
0x2a2f   :  { %v1569_v2 = vadd.f32 0.5, %v1568_v49 }
0x2a30   :  { %v1364_v60 = vadd.f32 0.5, %v1363_v55 }
0x2a31   :  { %v1571_v57 = vmul.f32 0.0, %v1569_v2 }
0x2a32   :  { %v1369_v0 = vmul.f32 %v1367_v63, %v1364_v60 }
0x2a85   :  { %v1574_v30 = vpop.permute.xlu2 %1573 }
0x2a86   :  { %v1576_v53 = vmul.f32 %v1574_v30, %v1569_v2 }
0x2a88   :  { %1578 = vrot.lane.b32.xlu1 %v1576_v53, %s2268_s26 }
0x2a95   :  { %v1372_v26 = vpop.permute.xlu1 %1371 }
0x2a96   :  { %v1374_v56 = vmul.f32 %v1372_v26, %v1364_v60 }
0x2a98   :  { %1376 = vrot.lane.b32.xlu0 %v1374_v56, %s2268_s26 }
0x2afa   :  { %v1579_v58 = vpop.permute.xlu1 %1578 }
0x2afb   :  { %v1581_v61 = vadd.f32 %v1579_v58, %v1571_v57 }
0x2afd   :  { %2208 = vtanh.f32 %v1581_v61  ;;  %v1628_v46 = vrot.slane %v1581_v61, 2 }
0x2b03   :  { %v2209_v62 = vpop.eup %2208 }
0x2b04   :  { %1584 = vrot.lane.b32.xlu0 %v2209_v62, %s2269_s27 }
0x2b0a   :  { %v1377_v1 = vpop.permute.xlu0 %1376 }
0x2b0b   :  { %v1379_v18 = vadd.f32 %v1377_v1, %v1369_v0 }
0x2b0d   :  { %2210 = vtanh.f32 %v1379_v18  ;;  %v1426_v39 = vrot.slane %v1379_v18, 6 }
0x2b13   :  { %v2211_v7 = vpop.eup %2210 }
0x2b14   :  { %1382 = vrot.lane.b32.xlu2 %v2211_v7, %s2269_s27 }
0x2b6e   :  { %v1383_v9 = vpop.permute.xlu2 %1382 }
0x2b6f   :  { %v2629_v10 = vmul.f32 %v1383_v9, %v1364_v60 }
0x2b71   :  { %v1391_v11 = vrot.slane %v2629_v10, 2 }
0x2b73   :  { %1392 = vrot.lane.b32.xlu1 %v1391_v11, %s2270_s28 }
0x2b76   :  { %v1585_v12 = vpop.permute.xlu0 %1584 }
0x2b77   :  { %v2633_v13 = vmul.f32 %v1585_v12, %v1569_v2 }
0x2b79   :  { %v1593_v40 = vrot.slane %v2633_v13, 6 }
0x2b7b   :  { %1594 = vrot.lane.b32.xlu2 %v1593_v40, %s2270_s28 }
0x2bd5   :  { %v1595_v15 = vpop.permute.xlu2 %1594 }
0x2be5   :  { %v1393_v14 = vpop.permute.xlu1 %1392 }
0x2be6   :  { %2050 = vmatmul.msk.f32.vlgmr.msra.gmra.mxu1 %vm56_vm2, %v1393_v14 }
0x2be7   :  { %1784 = vmatpush.msra.mxu1 %v2608_v36 }
0x2bee   :  { %2058 = vmatmul.msk.f32.vlgmr.msrb.gmra.mxu1 %vm56_vm2, %v1595_v15 }
0x2c63   :  { %v1413_v41 = vpop.f32.mrf.mxu1 }
0x2c64   :  { %v1417_v59 = vrot.slane %v1413_v41, 4 }
0x2c66   :  { %v1419_v8 = vadd.f32 %v1417_v59, %v2593_v16 }
0x2c68   :  { %2212 = vtanh.f32 %v1419_v8  ;;  %v1420_v27 = vmul.f32 0.5, %v1419_v8 }
0x2c6b   :  { %v1615_v17 = vpop.f32.mrf.mxu1 }
0x2c6c   :  { %v1619_v19 = vrot.slane %v1615_v17, 4 }
0x2c6e   :  { %v2213_v25 = vpop.eup %2212  ;;  %v1621_v23 = vadd.f32 %v1619_v19, %v2620_v44 }
0x2c6f   :  { %1430 = vrot.lane.b32.xlu0 %v2213_v25, %s2267_s25 }
0x2c70   :  { %2214 = vtanh.f32 %v1621_v23  ;;  %v1622_v28 = vmul.f32 0.5, %v1621_v23 }
0x2c71   :  { %2216 = vtanh.f32 %v1420_v27 }
0x2c72   :  { %2218 = vtanh.f32 %v1622_v28 }
0x2c76   :  { %v2215_v24 = vpop.eup %2214 }
0x2c77   :  { %1632 = vrot.lane.b32.xlu1 %v2215_v24, %s2267_s25  ;;  %v2217_v29 = vpop.eup %2216 }
0x2c78   :  { %v1422_v6 = vmul.f32 0.5, %v2217_v29  ;;  %v2219_v32 = vpop.eup %2218 }
0x2c79   :  { %v1624_v34 = vmul.f32 0.5, %v2219_v32 }
0x2c7a   :  { %v1423_v31 = vadd.f32 0.5, %v1422_v6 }
0x2c7b   :  { %v1625_v35 = vadd.f32 0.5, %v1624_v34 }
0x2c7c   :  { %v1428_v42 = vmul.f32 %v1426_v39, %v1423_v31 }
0x2c7d   :  { %v1630_v47 = vmul.f32 %v1628_v46, %v1625_v35 }
0x2ce1   :  { %v1431_v33 = vpop.permute.xlu0 %1430 }
0x2ce2   :  { %v1433_v5 = vmul.f32 %v1431_v33, %v1423_v31 }
0x2ce4   :  { %1435 = vrot.lane.b32.xlu2 %v1433_v5, %s2268_s26 }
0x2ce9   :  { %v1633_v37 = vpop.permute.xlu1 %1632 }
0x2cea   :  { %v1635_v38 = vmul.f32 %v1633_v37, %v1625_v35 }
0x2cec   :  { %1637 = vrot.lane.b32.xlu0 %v1635_v38, %s2268_s26 }
0x2d3e   :  { %v1436_v43 = vpop.permute.xlu2 %1435 }
0x2d3f   :  { %v2646_v52 = vadd.f32 %v1436_v43, %v1428_v42 }
0x2d41   :  { %2220 = vtanh.f32 %v2646_v52 }
0x2d47   :  { %v2221_v45 = vpop.eup %2220 }
0x2d48   :  { %1441 = vrot.lane.b32.xlu1 %v2221_v45, %s2269_s27 }
0x2d5e   :  { %v1638_v21 = vpop.permute.xlu0 %1637 }
0x2d5f   :  { %v1640_v4 = vadd.f32 %v1638_v21, %v1630_v47 }
0x2d61   :  { %2222 = vtanh.f32 %v1640_v4  ;;  %v1687_v7 = vrot.slane %v1640_v4, 2 }
0x2d67   :  { %v2223_v51 = vpop.eup %2222 }
0x2d68   :  { %1643 = vrot.lane.b32.xlu2 %v2223_v51, %s2269_s27 }
0x2dba   :  { %v1442_v49 = vpop.permute.xlu1 %1441 }
0x2dbb   :  { %v2651_v50 = vmul.f32 %v1442_v49, %v1423_v31 }
0x2dbd   :  { %v1450_v2 = vrot.slane %v2651_v50, 4 }
0x2dbf   :  { %1451 = vrot.lane.b32.xlu0 %v1450_v2, %s2270_s28 }
0x2dc2   :  { %v1644_v30 = vpop.permute.xlu2 %1643 }
0x2dc3   :  { %v2655_v53 = vmul.f32 %v1644_v30, %v1625_v35 }
0x2dc5   :  { %v1652_v54 = vrot.slane %v2655_v53, 4 }
0x2dc7   :  { %1653 = vrot.lane.b32.xlu1 %v1652_v54, %s2270_s28 }
0x2e31   :  { %v1452_v55 = vpop.permute.xlu0 %1451 }
0x2e32   :  { %2051 = vmatmul.msk.f32.vlgmr.msrb.gmra.mxu2 %vm56_vm2, %v1452_v55 }
0x2e33   :  { %1843 = vmatpush.msrb.mxu2 %v2608_v36 }
0x2e39   :  { %v1654_v60 = vpop.permute.xlu1 %1653 }
0x2e3a   :  { %2059 = vmatmul.msk.f32.vlgmr.msra.gmra.mxu2 %vm56_vm2, %v1654_v60 }
0x2eb5   :  { %v2662_v26 = vpop.f32.mrf.mxu2 }
0x2ebd   :  { %v1674_v56 = vpop.f32.mrf.mxu2 }
0x2ebe   :  { %v1678_v57 = vrot.slane %v1674_v56, 6 }
0x2ec0   :  { %v1680_v58 = vadd.f32 %v1678_v57, %v2620_v44 }
0x2ec2   :  { %2224 = vtanh.f32 %v1680_v58  ;;  %v1681_v62 = vmul.f32 0.5, %v1680_v58 }
0x2ec4   :  { %2226 = vtanh.f32 %v1681_v62 }
0x2ec8   :  { %v2225_v61 = vpop.eup %2224 }
0x2ec9   :  { %1691 = vrot.lane.b32.xlu2 %v2225_v61, %s2267_s25 }
0x2eca   :  { %v2227_v63 = vpop.eup %2226 }
0x2ecb   :  { %v1683_v0 = vmul.f32 0.5, %v2227_v63 }
0x2ecd   :  { %v1684_v1 = vadd.f32 0.5, %v1683_v0 }
0x2ecf   :  { %v1689_v9 = vmul.f32 %v1687_v7, %v1684_v1 }
0x2f23   :  { %v1692_v18 = vpop.permute.xlu2 %1691 }
0x2f24   :  { %v1694_v36 = vmul.f32 %v1692_v18, %v1684_v1 }
0x2f26   :  { %1696 = vrot.lane.b32.xlu0 %v1694_v36, %s2268_s26 }
0x2f98   :  { %v1697_v11 = vpop.permute.xlu0 %1696 }
0x2f99   :  { %v1699_v12 = vadd.f32 %v1697_v11, %v1689_v9 }
0x2f9b   :  { %2228 = vtanh.f32 %v1699_v12  ;;  %v1743_v6 = vrot.slane %v1699_v12, 2 }
0x2fa1   :  { %v2229_v40 = vpop.eup %2228 }
0x2fa2   :  { %1702 = vrot.lane.b32.xlu1 %v2229_v40, %s2269_s27 }
0x3014   :  { %v1703_v14 = vpop.permute.xlu1 %1702 }
0x3015   :  { %v2668_v15 = vmul.f32 %v1703_v14, %v1684_v1 }
0x3017   :  { %v1711_v41 = vrot.slane %v2668_v15, 2 }
0x3019   :  { %1712 = vrot.lane.b32.xlu2 %v1711_v41, %s2270_s28 }
0x3073   :  { %v1713_v59 = vpop.permute.xlu2 %1712 }
0x3074   :  { %2060 = vmatmul.msk.f32.vlgmr.msrb.gmra.mxu0 %vm56_vm2, %v1713_v59 }
0x30f1   :  { %v1733_v8 = vpop.f32.mrf.mxu0 }
0x30f2   :  { %v1736_v17 = vadd.f32 %v1733_v8, %v2620_v44 }
0x30f4   :  { %2230 = vtanh.f32 %v1736_v17  ;;  %v1737_v25 = vmul.f32 0.5, %v1736_v17 }
0x30f6   :  { %2232 = vtanh.f32 %v1737_v25 }
0x30fa   :  { %v2231_v19 = vpop.eup %2230 }
0x30fb   :  { %1747 = vrot.lane.b32.xlu0 %v2231_v19, %s2267_s25 }
0x30fc   :  { %v2233_v23 = vpop.eup %2232 }
0x30fd   :  { %v1739_v24 = vmul.f32 0.5, %v2233_v23 }
0x30ff   :  { %v1740_v27 = vadd.f32 0.5, %v1739_v24 }
0x3101   :  { %v1745_v31 = vmul.f32 %v1743_v6, %v1740_v27 }
0x316d   :  { %v1748_v28 = vpop.permute.xlu0 %1747 }
0x316e   :  { %v1750_v29 = vmul.f32 %v1748_v28, %v1740_v27 }
0x3170   :  { %1752 = vrot.lane.b32.xlu1 %v1750_v29, %s2268_s26 }
0x31e2   :  { %v1753_v32 = vpop.permute.xlu1 %1752 }
0x31e3   :  { %v1755_v33 = vadd.f32 %v1753_v32, %v1745_v31 }
0x31e5   :  { %2234 = vtanh.f32 %v1755_v33  ;;  %v1799_v51 = vrot.slane %v1755_v33, 2 }
0x31eb   :  { %v2235_v5 = vpop.eup %2234 }
0x31ec   :  { %1758 = vrot.lane.b32.xlu2 %v2235_v5, %s2269_s27 }
0x3246   :  { %v1759_v44 = vpop.permute.xlu2 %1758 }
0x3247   :  { %v1761_v34 = vmul.f32 %v1759_v44, %v1740_v27 }
0x3249   :  { %1763 = vrot.lane.b32.xlu0 %v1761_v34, %s2270_s28 }
0x32bb   :  { %v1764_v35 = vpop.permute.xlu0 %1763 }
0x32bc   :  { %1766 = vst.msk [vmem:[#allocation5 + $0x8] sm:$0x3] %vm107_vm1, %v1764_v35  ;;  %2061 = vmatmul.msk.f32.vlgmr.msra.gmra.mxu1 %vm56_vm2, %v1764_v35 }
0x3339   :  { %v1786_v37 = vpop.f32.mrf.mxu1 }
0x333a   :  { %v1790_v38 = vrot.slane %v1786_v37, 2  ;;  %v1476_v37 = vrot.slane %v2662_v26, 2 }
0x333c   :  { %v1792_v39 = vadd.f32 %v1790_v38, %v2599_v20  ;;  %v1478_v38 = vadd.f32 %v1476_v37, %v2593_v16 }
0x333e   :  { %2236 = vtanh.f32 %v1792_v39  ;;  %v1793_v43 = vmul.f32 0.5, %v1792_v39 }
0x3340   :  { %2238 = vtanh.f32 %v1793_v43 }
0x3344   :  { %v2237_v42 = vpop.eup %2236 }
0x3345   :  { %1803 = vrot.lane.b32.xlu1 %v2237_v42, %s2267_s25 }
0x3346   :  { %v2239_v45 = vpop.eup %2238 }
0x3347   :  { %v1795_v46 = vmul.f32 0.5, %v2239_v45 }
0x3349   :  { %v1796_v47 = vadd.f32 0.5, %v1795_v46 }
0x334b   :  { %v1801_v49 = vmul.f32 %v1799_v51, %v1796_v47 }
0x33b7   :  { %v1804_v21 = vpop.permute.xlu1 %1803 }
0x33b8   :  { %v1806_v4 = vmul.f32 %v1804_v21, %v1796_v47  ;;  %v1479_v21 = vmul.f32 0.5, %v1478_v38 }
0x33ba   :  { %1808 = vrot.lane.b32.xlu2 %v1806_v4, %s2268_s26 }
0x3414   :  { %v1809_v2 = vpop.permute.xlu2 %1808 }
0x3415   :  { %v1811_v30 = vadd.f32 %v1809_v2, %v1801_v49 }
0x3417   :  { %2240 = vtanh.f32 %v1811_v30  ;;  %v1858_v11 = vrot.slane %v1811_v30, 2 }
0x341d   :  { %v2241_v54 = vpop.eup %2240 }
0x341e   :  { %1814 = vrot.lane.b32.xlu0 %v2241_v54, %s2269_s27 }
0x3490   :  { %v1815_v55 = vpop.permute.xlu0 %1814 }
0x3491   :  { %v2684_v60 = vmul.f32 %v1815_v55, %v1796_v47 }
0x3493   :  { %v1823_v56 = vrot.slane %v2684_v60, 6 }
0x3495   :  { %1824 = vrot.lane.b32.xlu1 %v1823_v56, %s2270_s28 }
0x3507   :  { %v1825_v57 = vpop.permute.xlu1 %1824 }
0x3508   :  { %2062 = vmatmul.msk.f32.vlgmr.msrb.gmra.mxu2 %vm56_vm2, %v1825_v57 }
0x358b   :  { %v1845_v58 = vpop.f32.mrf.mxu2 }
0x358c   :  { %v1849_v61 = vrot.slane %v1845_v58, 4 }
0x358e   :  { %v1851_v62 = vadd.f32 %v1849_v61, %v2599_v20 }
0x3590   :  { %2242 = vtanh.f32 %v1851_v62  ;;  %v1852_v0 = vmul.f32 0.5, %v1851_v62  ;;  %v1485_v62 = vrot.slane %v2646_v52, 6 }
0x3592   :  { %2244 = vtanh.f32 %v1852_v0 }
0x3596   :  { %v2243_v63 = vpop.eup %2242 }
0x3597   :  { %1862 = vrot.lane.b32.xlu2 %v2243_v63, %s2267_s25 }
0x3598   :  { %v2245_v1 = vpop.eup %2244 }
0x3599   :  { %v1854_v18 = vmul.f32 0.5, %v2245_v1 }
0x359b   :  { %v1855_v36 = vadd.f32 0.5, %v1854_v18 }
0x359d   :  { %v1860_v12 = vmul.f32 %v1858_v11, %v1855_v36 }
0x35f1   :  { %v1863_v7 = vpop.permute.xlu2 %1862 }
0x35f2   :  { %v1865_v9 = vmul.f32 %v1863_v7, %v1855_v36 }
0x35f4   :  { %1867 = vrot.lane.b32.xlu0 %v1865_v9, %s2268_s26 }
0x3666   :  { %v1868_v40 = vpop.permute.xlu0 %1867 }
0x3667   :  { %v1870_v14 = vadd.f32 %v1868_v40, %v1860_v12 }
0x3669   :  { %2246 = vtanh.f32 %v1870_v14  ;;  %v1917_v5 = vrot.slane %v1870_v14, 2 }
0x366f   :  { %v2247_v41 = vpop.eup %2246 }
0x3670   :  { %1873 = vrot.lane.b32.xlu1 %v2247_v41, %s2269_s27 }
0x36e2   :  { %v1874_v59 = vpop.permute.xlu1 %1873 }
0x36e3   :  { %v2693_v8 = vmul.f32 %v1874_v59, %v1855_v36 }
0x36e5   :  { %v1882_v17 = vrot.slane %v2693_v8, 4 }
0x36e7   :  { %1883 = vrot.lane.b32.xlu2 %v1882_v17, %s2270_s28 }
0x3741   :  { %v1884_v19 = vpop.permute.xlu2 %1883 }
0x3742   :  { %2063 = vmatmul.msk.f32.vlgmr.msrb.gmra.mxu3 %vm56_vm2, %v1884_v19 }
0x37c5   :  { %v1904_v25 = vpop.f32.mrf.mxu3 }
0x37c6   :  { %v1908_v23 = vrot.slane %v1904_v25, 6 }
0x37c8   :  { %v1910_v24 = vadd.f32 %v1908_v23, %v2599_v20 }
0x37ca   :  { %2248 = vtanh.f32 %v1910_v24  ;;  %v1911_v28 = vmul.f32 0.5, %v1910_v24 }
0x37cc   :  { %2250 = vtanh.f32 %v1911_v28 }
0x37d0   :  { %v2249_v27 = vpop.eup %2248 }
0x37d1   :  { %1921 = vrot.lane.b32.xlu0 %v2249_v27, %s2267_s25 }
0x37d2   :  { %v2251_v29 = vpop.eup %2250 }
0x37d3   :  { %v1913_v6 = vmul.f32 0.5, %v2251_v29 }
0x37d5   :  { %v1914_v31 = vadd.f32 0.5, %v1913_v6 }
0x37d7   :  { %v1919_v44 = vmul.f32 %v1917_v5, %v1914_v31 }
0x3843   :  { %v1922_v32 = vpop.permute.xlu0 %1921 }
0x3844   :  { %v1924_v33 = vmul.f32 %v1922_v32, %v1914_v31 }
0x3846   :  { %1926 = vrot.lane.b32.xlu1 %v1924_v33, %s2268_s26 }
0x38b8   :  { %v1927_v34 = vpop.permute.xlu1 %1926 }
0x38b9   :  { %v1929_v35 = vadd.f32 %v1927_v34, %v1919_v44 }
0x38bb   :  { %2252 = vtanh.f32 %v1929_v35  ;;  %v1973_v52 = vrot.slane %v1929_v35, 2 }
0x38bc   :  { %2254 = vtanh.f32 %v1478_v38 }
0x38bd   :  { %2256 = vtanh.f32 %v1479_v21 }
0x38c1   :  { %v2253_v39 = vpop.eup %2252 }
0x38c2   :  { %1932 = vrot.lane.b32.xlu2 %v2253_v39, %s2269_s27  ;;  %v2255_v42 = vpop.eup %2254 }
0x38c3   :  { %v2257_v4 = vpop.eup %2256 }
0x38c4   :  { %v1481_v49 = vmul.f32 0.5, %v2257_v4 }
0x38c6   :  { %v1482_v30 = vadd.f32 0.5, %v1481_v49 }
0x38c8   :  { %v1487_v63 = vmul.f32 %v1485_v62, %v1482_v30 }
0x38ca   :  { %1489 = vrot.lane.b32.xlu2 %v2255_v42, %s2267_s25 }
0x391c   :  { %v1933_v43 = vpop.permute.xlu2 %1932 }
0x391d   :  { %v1935_v45 = vmul.f32 %v1933_v43, %v1914_v31 }
0x391f   :  { %v1941_v46 = vrot.slane %v1935_v45, 2 }
0x3921   :  { %1942 = vrot.lane.b32.xlu0 %v1941_v46, %s2270_s28 }
0x3924   :  { %v1490_v2 = vpop.permute.xlu2 %1489 }
0x3925   :  { %v1492_v54 = vmul.f32 %v1490_v2, %v1482_v30 }
0x3993   :  { %v1943_v47 = vpop.permute.xlu0 %1942 }
0x3994   :  { %2064 = vmatmul.msk.f32.vlgmr.msra.gmra.mxu0 %vm56_vm2, %v1943_v47 }
0x3a11   :  { %v1963_v26 = vpop.f32.mrf.mxu0 }
0x3a12   :  { %v1966_v16 = vadd.f32 %v1963_v26, %v2599_v20 }
0x3a14   :  { %2258 = vtanh.f32 %v1966_v16  ;;  %v1967_v55 = vmul.f32 0.5, %v1966_v16 }
0x3a16   :  { %2260 = vtanh.f32 %v1967_v55 }
0x3a1a   :  { %v2259_v51 = vpop.eup %2258 }
0x3a1b   :  { %1977 = vrot.lane.b32.xlu1 %v2259_v51, %s2267_s25 }
0x3a1c   :  { %v2261_v20 = vpop.eup %2260 }
0x3a1d   :  { %v1969_v56 = vmul.f32 0.5, %v2261_v20 }
0x3a1f   :  { %v1970_v57 = vadd.f32 0.5, %v1969_v56 }
0x3a21   :  { %v1975_v36 = vmul.f32 %v1973_v52, %v1970_v57 }
0x3a23   :  { %1494 = vrot.lane.b32.xlu1 %v1492_v54, %s2268_s26 }
0x3a2b   :  { %1589 = vrot.lane.b32.xlu1 %v2633_v13, %s2270_s28 }
0x3a33   :  { %1819 = vrot.lane.b32.xlu1 %v2684_v60, %s2270_s28 }
0x3a8d   :  { %v1978_v58 = vpop.permute.xlu1 %1977 }
0x3a8e   :  { %v1980_v61 = vmul.f32 %v1978_v58, %v1970_v57 }
0x3a90   :  { %1982 = vrot.lane.b32.xlu0 %v1980_v61, %s2268_s26 }
0x3a95   :  { %v1495_v0 = vpop.permute.xlu1 %1494 }
0x3a96   :  { %v1497_v1 = vadd.f32 %v1495_v0, %v1487_v63 }
0x3a98   :  { %2262 = vtanh.f32 %v1497_v1 }
0x3a9d   :  { %v1590_v18 = vpop.permute.xlu1 %1589 }
0x3a9e   :  { %v2263_v13 = vpop.eup %2262  ;;  %1592 = vst.msk [vmem:[#allocation5 + $0x8] sm:$0xc0] %vm284_vm3, %v1590_v18 }
0x3a9f   :  { %1500 = vrot.lane.b32.xlu0 %v2263_v13, %s2269_s27 }
0x3aa5   :  { %v1820_v60 = vpop.permute.xlu1 %1819 }
0x3aa6   :  { %1822 = vst.msk [vmem:[#allocation5] sm:$0xc0] %vm284_vm3, %v1820_v60 }
0x3aa7   :  { %1707 = vrot.lane.b32.xlu0 %v2668_v15, %s2270_s28 }
0x3aaf   :  { %1937 = vrot.lane.b32.xlu0 %v1935_v45, %s2270_s28 }
0x3ab7   :  { %1216 = vrot.lane.b32.xlu0 %v2546_v22, %s2270_s28 }
0x3abf   :  { %1446 = vrot.lane.b32.xlu0 %v2651_v50, %s2270_s28 }
0x3b02   :  { %v1983_v7 = vpop.permute.xlu0 %1982 }
0x3b03   :  { %v1985_v9 = vadd.f32 %v1983_v7, %v1975_v36 }
0x3b05   :  { %2264 = vtanh.f32 %v1985_v9 }
0x3b0b   :  { %v2265_v11 = vpop.eup %2264 }
0x3b0c   :  { %1988 = vrot.lane.b32.xlu2 %v2265_v11, %s2269_s27 }
0x3b11   :  { %v1501_v12 = vpop.permute.xlu0 %1500 }
0x3b14   :  { %1648 = vrot.lane.b32.xlu2 %v2655_v53, %s2270_s28 }
0x3b19   :  { %v1708_v15 = vpop.permute.xlu0 %1707 }
0x3b1a   :  { %1710 = vst.msk [vmem:[#allocation5 + $0x8] sm:$0xc] %vm164_vm5, %v1708_v15 }
0x3b1c   :  { %1878 = vrot.lane.b32.xlu2 %v2693_v8, %s2270_s28  ;;  %v1503_v8 = vmul.f32 %v1501_v12, %v1482_v30 }
0x3b21   :  { %v1938_v22 = vpop.permute.xlu0 %1937 }
0x3b22   :  { %1940 = vst.msk [vmem:[#allocation5] sm:$0xc] %vm164_vm5, %v1938_v22 }
0x3b24   :  { %1157 = vrot.lane.b32.xlu2 %v2534_v48, %s2270_s28 }
0x3b29   :  { %v1217_v50 = vpop.permute.xlu0 %1216 }
0x3b2a   :  { %1219 = vst.msk [vmem:[#allocation4] sm:$0x30] %vm224_vm4, %v1217_v50 }
0x3b2c   :  { %1387 = vrot.lane.b32.xlu2 %v2629_v10, %s2270_s28 }
0x3b31   :  { %v1447_v40 = vpop.permute.xlu0 %1446 }
0x3b32   :  { %1449 = vst.msk [vmem:[#allocation4 + $0x8] sm:$0x30] %vm224_vm4, %v1447_v40 }
0x3b66   :  { %v1989_v53 = vpop.permute.xlu2 %1988 }
0x3b67   :  { %v1991_v14 = vmul.f32 %v1989_v53, %v1970_v57 }
0x3b69   :  { %1993 = vrot.lane.b32.xlu1 %v1991_v14, %s2270_s28 }
0x3b6e   :  { %v1649_v41 = vpop.permute.xlu2 %1648 }
0x3b6f   :  { %1651 = vst.msk [vmem:[#allocation5 + $0x8] sm:$0x30] %vm224_vm4, %v1649_v41 }
0x3b71   :  { %1275 = vrot.lane.b32.xlu1 %v2575_v3, %s2270_s28 }
0x3b76   :  { %v1879_v48 = vpop.permute.xlu2 %1878  ;;  %v2000_v59 = vld [vmem:[#allocation5 + $0x8] sm:$0xff] }
0x3b77   :  { %1881 = vst.msk [vmem:[#allocation5] sm:$0x30] %vm224_vm4, %v1879_v48  ;;  %2005 = vrot.lane.b32.xlu0 %v2000_v59, %s2268_s26 }
0x3b79   :  { %1505 = vrot.lane.b32.xlu1 %v1503_v8, %s2270_s28 }
0x3b7e   :  { %v1158_v10 = vpop.permute.xlu2 %1157 }
0x3b7f   :  { %1160 = vst.msk [vmem:[#allocation4] sm:$0xc] %vm164_vm5, %v1158_v10 }
0x3b86   :  { %v1388_v17 = vpop.permute.xlu2 %1387 }
0x3b87   :  { %1390 = vst.msk [vmem:[#allocation4 + $0x8] sm:$0xc] %vm164_vm5, %v1388_v17 }
0x3bdb   :  { %v1994_v19 = vpop.permute.xlu1 %1993 }
0x3bdc   :  { %1996 = vst.msk [vmem:[#allocation5] sm:$0x3] %vm107_vm1, %v1994_v19 }
0x3be3   :  { %v1276_v25 = vpop.permute.xlu1 %1275  ;;  %v1999_v3 = vld [vmem:[#allocation5] sm:$0xff] }
0x3be4   :  { %1278 = vst.msk [vmem:[#allocation4] sm:$0xc0] %vm284_vm3, %v1276_v25  ;;  %2003 = vrot.lane.b32.xlu2 %v1999_v3, %s2268_s26 }
0x3be9   :  { %v2006_v24 = vpop.permute.xlu0 %2005 }
0x3beb   :  { %v1506_v23 = vpop.permute.xlu1 %1505  ;;  %v1997_v6 = vld [vmem:[#allocation4] sm:$0xff] }
0x3bec   :  { %1508 = vst.msk [vmem:[#allocation4 + $0x8] sm:$0xc0] %vm284_vm3, %v1506_v23 }
0x3bf3   :  { %v1998_v27 = vld [vmem:[#allocation4 + $0x8] sm:$0xff] }
0x3bf4   :  { %v2010_v28 = vsel %vm56_vm2, %v1998_v27, %v2006_v24 }
0x3bf5   :  { %2012 = vst.msk [vmem:[%s2766_s4 + $0x8] sm:$0xff] %vm25_vm0, %v2010_v28 }
0x3c3e   :  { %v2004_v29 = vpop.permute.xlu2 %2003 }
0x3c3f   :  { %v2009_v31 = vsel %vm56_vm2, %v1997_v6, %v2004_v29 }
0x3c40   :  { %2011 = vst.msk [vmem:[%s2766_s4] sm:$0xff] %vm25_vm0, %v2009_v31 }

</bundles_post_ra>
